<compile_context>
chip_gen: v5e
topology: v5e:2x2
jax: 0.10.0
libtpu: 0.0.40
codegen_flags: <defaults>
</compile_context>

<pallas_src>
import functools
import math

import numpy as np
import jax
import jax.numpy as jnp
from jax import lax
from jax.experimental import pallas as pl
from jax.experimental.pallas import tpu as pltpu


CONFIG = dict(
    in_channels=4,
    image_size=(16, 16),
    encoder_channels=(8, 16),
    latent_dim=8,
    decoder_channels=(16, 8),
    kernel_size=4,
    stride=2,
    padding=1,
    quant=False,
    sigmoid_base=None,
)


# ----------------------------------------------------------------------------
# Parameter init (deterministic synthetic weights, PyTorch-compatible layouts)
# ----------------------------------------------------------------------------
def init_params(key, cfg):
    params = {}
    k = cfg["kernel_size"]

    def nxt():
        nonlocal key
        key, sub = jax.random.split(key)
        return sub

    in_ch = cfg["in_channels"]
    params["enc"] = []
    for out_ch in cfg["encoder_channels"]:
        w = 0.1 * jax.random.normal(nxt(), (k, k, in_ch, out_ch), jnp.float32)
        b = 0.05 * jax.random.normal(nxt(), (out_ch,), jnp.float32)
        params["enc"].append((w, b))
        in_ch = out_ch
    for name in ("mu", "logvar"):
        w = 0.1 * jax.random.normal(nxt(), (1, 1, in_ch, cfg["latent_dim"]), jnp.float32)
        b = 0.05 * jax.random.normal(nxt(), (cfg["latent_dim"],), jnp.float32)
        params[name] = (w, b)
    # decoder (torch ConvTranspose2d weight layout (Cin, Cout, KH, KW)); mirrors
    # the torch reference: decoder_channels[1:] starting from latent_dim, then a
    # final layer back to in_channels.
    dec_in = cfg["latent_dim"]
    params["dec"] = []
    for out_ch in cfg["decoder_channels"][1:]:
        w = 0.1 * jax.random.normal(nxt(), (dec_in, out_ch, k, k), jnp.float32)
        b = 0.05 * jax.random.normal(nxt(), (out_ch,), jnp.float32)
        params["dec"].append((w, b))
        dec_in = out_ch
    w = 0.1 * jax.random.normal(nxt(), (dec_in, cfg["in_channels"], k, k), jnp.float32)
    b = 0.05 * jax.random.normal(nxt(), (cfg["in_channels"],), jnp.float32)
    params["dec"].append((w, b))
    return params


# ----------------------------------------------------------------------------
# Host-side operator construction (spatial gather mats / stacked weights)
# ----------------------------------------------------------------------------
def _conv_gather(H, W, k, s, p):
    """G[t] (H*W, OH*OW): 0/1 gather for Conv2d tap t=(kh,kw); folds padding."""
    OH = (H + 2 * p - k) // s + 1
    OW = (W + 2 * p - k) // s + 1
    g = np.zeros((k * k, H * W, OH * OW), np.float32)
    for kh in range(k):
        for kw in range(k):
            t = kh * k + kw
            for oh in range(OH):
                h = oh * s + kh - p
                if h < 0 or h >= H:
                    continue
                for ow in range(OW):
                    w = ow * s + kw - p
                    if w < 0 or w >= W:
                        continue
                    g[t, h * W + w, oh * OW + ow] = 1.0
    return g, OH, OW


def _convT_gather(H, W, k, s, p):
    """G[t] (H*W, OH*OW): 0/1 scatter for ConvTranspose2d tap t=(kh,kw)."""
    OH = (H - 1) * s - 2 * p + k
    OW = (W - 1) * s - 2 * p + k
    g = np.zeros((k * k, H * W, OH * OW), np.float32)
    for kh in range(k):
        for kw in range(k):
            t = kh * k + kw
            for ih in range(H):
                oh = ih * s + kh - p
                if oh < 0 or oh >= OH:
                    continue
                for iw in range(W):
                    ow = iw * s + kw - p
                    if ow < 0 or ow >= OW:
                        continue
                    g[t, ih * W + iw, oh * OW + ow] = 1.0
    return g, OH, OW


def build_plan(params, cfg, batch_block):
    """Precompute constants: bf16 gather mats, bf16 stacked im2col weights, biases."""
    k, s, p = cfg["kernel_size"], cfg["stride"], cfg["padding"]
    kk = k * k
    Bb = batch_block
    h, w = cfg["image_size"]
    consts, scratch_shapes = [], []
    eye = np.eye(Bb, dtype=np.float32)

    def add_conv_layer(gather, w_tap_T, bias, cin):
        # gather: (kk, HW, OHOW);  w_tap_T: (kk, Cout, Cin);  bias: (Cout,)
        blocks = [np.kron(eye, w_tap_T[t]) for t in range(kk)]   # (Bb*Cout, Bb*Cin)
        w_stack = np.concatenate(blocks, axis=1)                 # (Bb*Cout, kk*Bb*Cin)
        b_col = np.tile(np.asarray(bias, np.float32), Bb).reshape(-1, 1)
        consts.extend([
            jnp.asarray(gather, dtype=jnp.bfloat16),             # 0/1 -> lossless bf16
            jnp.asarray(w_stack, dtype=jnp.bfloat16),
            jnp.asarray(b_col, dtype=jnp.float32),
        ])
        scratch_shapes.append((kk * Bb * cin, gather.shape[2]))

    # encoder Conv2d layers
    in_ch = cfg["in_channels"]
    for wt, bs in params["enc"]:
        g, h2, w2 = _conv_gather(h, w, k, s, p)
        wt = np.asarray(wt, np.float32)                          # (k,k,Cin,Cout)
        w_tap_T = np.transpose(wt, (0, 1, 3, 2)).reshape(kk, wt.shape[3], wt.shape[2])
        add_conv_layer(g, w_tap_T, bs, in_ch)
        in_ch = wt.shape[3]
        h, w = h2, w2
    lat_hw = (h, w)

    # fused mu/logvar 1x1 convs -> one GEMM
    wmu, bmu = params["mu"]
    wlv, blv = params["logvar"]
    vmu = np.kron(eye, np.asarray(wmu, np.float32)[0, 0].T)      # (Bb*lat, Bb*Cenc)
    vlv = np.kron(eye, np.asarray(wlv, np.float32)[0, 0].T)
    w_ml = np.concatenate([vmu, vlv], axis=0)
    b_ml = np.concatenate([np.tile(np.asarray(bmu, np.float32), Bb),
                           np.tile(np.asarray(blv, np.float32), Bb)]).reshape(-1, 1)
    consts.extend([jnp.asarray(w_ml, dtype=jnp.bfloat16),
                   jnp.asarray(b_ml, dtype=jnp.float32)])

    # decoder ConvTranspose2d layers
    for wt, bs in params["dec"]:
        g, h2, w2 = _convT_gather(h, w, k, s, p)
        wt = np.asarray(wt, np.float32)                          # (Cin,Cout,k,k)
        w_tap_T = np.stack([wt[:, :, kh, kw].T for kh in range(k) for kw in range(k)])
        add_conv_layer(g, w_tap_T, bs, wt.shape[0])
        h, w = h2, w2

    return dict(consts=consts, scratch_shapes=scratch_shapes,
                n_enc=len(params["enc"]), n_dec=len(params["dec"]),
                batch_block=Bb, latent=cfg["latent_dim"],
                out_channels=cfg["in_channels"], lat_hw=lat_hw, out_hw=(h, w))


# ----------------------------------------------------------------------------
# The single fused Pallas kernel
# ----------------------------------------------------------------------------
def _vae_fused_kernel(*refs, n_enc, n_dec, lat_rows):
    it = iter(refs)
    x_ref, eps_ref = next(it), next(it)
    enc = [(next(it), next(it), next(it)) for _ in range(n_enc)]
    wml_ref, bml_ref = next(it), next(it)
    dec = [(next(it), next(it), next(it)) for _ in range(n_dec)]
    recon_ref, ml_ref = next(it), next(it)
    scratches = list(it)
    enc_scr, dec_scr = scratches[:n_enc], scratches[n_enc:]

    def conv_im2col(a, g_ref, w_ref, b_ref, scr_ref, relu):
        # im2col: per-tap gather GEMMs (K = H*W, lane-dense) stacked along the
        # scratch sublane axis in 8-aligned chunks, then ONE weight GEMM with
        # K = k*k*Bb*Cin so the MXU accumulates over taps + input channels.
        kk = g_ref.shape[0]
        rin = a.shape[0]
        group = math.lcm(rin, 8) // rin           # 8-sublane aligned scratch writes
        if kk % group != 0:
            group = 1
        a_bf = a.astype(jnp.bfloat16)
        for t0 in range(0, kk, group):            # static unroll
            parts = [jnp.dot(a_bf, g_ref[t0 + j],
                             preferred_element_type=jnp.float32)
                     for j in range(group)]
            blk = parts[0] if group == 1 else jnp.concatenate(parts, axis=0)
            scr_ref[t0 * rin:(t0 + group) * rin, :] = blk.astype(jnp.bfloat16)
        out = jnp.dot(w_ref[...], scr_ref[...],
                      preferred_element_type=jnp.float32) + b_ref[...]
        return jnp.maximum(out, 0.0) if relu else out

    a = x_ref[...]                                                  # (Bb*Cin, H*W)
    for (g_ref, w_ref, b_ref), scr in zip(enc, enc_scr):            # Conv2d + ReLU
        a = conv_im2col(a, g_ref, w_ref, b_ref, scr, relu=True)

    # fused mu/logvar 1x1 convs: one GEMM, one output block [mu; logvar]
    ml = jnp.dot(wml_ref[...], a.astype(jnp.bfloat16),
                 preferred_element_type=jnp.float32) + bml_ref[...]
    ml_ref[...] = ml
    mu, logvar = ml[:lat_rows, :], ml[lat_rows:, :]

    # reparameterize: z = mu + eps * exp(0.5*logvar)  (f32 elementwise, v5e-safe)
    a = mu + eps_ref[...] * jnp.exp(0.5 * logvar)

    for i, ((g_ref, w_ref, b_ref), scr) in enumerate(zip(dec, dec_scr)):
        a = conv_im2col(a, g_ref, w_ref, b_ref, scr, relu=(i < n_dec - 1))

    recon_ref[...] = 1.0 / (1.0 + jnp.exp(-a))      # exact sigmoid (EUP exp)


def vae_forward_fused(plan, x, eps):
    B, C, H, W = x.shape
    Bb = plan["batch_block"]
    assert B % Bb == 0
    nblk = B // Bb
    lat = plan["latent"]
    hl, wl = plan["lat_hw"]
    oh, ow = plan["out_hw"]
    cout = plan["out_channels"]

    # flattened NCHW == kernel layout (free reshapes, no transposes)
    x3 = x.reshape(nblk, Bb * C, H * W)
    eps3 = eps.reshape(nblk, Bb * lat, hl * wl)
    consts = plan["consts"]

    def resident(shape):  # constant index_map -> DMA'd once, VMEM-resident
        nd = len(shape)
        return pl.BlockSpec(shape, lambda i, _z=(0,) * nd: _z)

    in_specs = [
        pl.BlockSpec((None, Bb * C, H * W), lambda i: (i, 0, 0)),
        pl.BlockSpec((None, Bb * lat, hl * wl), lambda i: (i, 0, 0)),
    ] + [resident(c.shape) for c in consts]

    out_shape = (
        jax.ShapeDtypeStruct((nblk, Bb * cout, oh * ow), jnp.float32),     # recon
        jax.ShapeDtypeStruct((nblk, 2 * Bb * lat, hl * wl), jnp.float32),  # [mu;logvar]
    )
    out_specs = (
        pl.BlockSpec((None, Bb * cout, oh * ow), lambda i: (i, 0, 0)),
        pl.BlockSpec((None, 2 * Bb * lat, hl * wl), lambda i: (i, 0, 0)),
    )
    scratch_shapes = [pltpu.VMEM(s, jnp.bfloat16) for s in plan["scratch_shapes"]]

    kernel = functools.partial(_vae_fused_kernel, n_enc=plan["n_enc"],
                               n_dec=plan["n_dec"], lat_rows=Bb * lat)

    recon3, ml3 = pl.pallas_call(
        kernel,
        out_shape=out_shape,
        grid=(nblk,),
        in_specs=in_specs,
        out_specs=out_specs,
        scratch_shapes=scratch_shapes,
        compiler_params=pltpu.CompilerParams(
            dimension_semantics=("parallel",)),     # v7x: 2 TCs split batch blocks
    )(x3, eps3, *consts)

    recon = recon3.reshape(B, cout, oh, ow)          # NCHW order -> free reshape
    ml = ml3.reshape(nblk, 2, Bb, lat, hl, wl)
    mu = ml[:, 0].reshape(B, lat, hl, wl)
    logvar = ml[:, 1].reshape(B, lat, hl, wl)
    return recon, mu, logvar


# ----------------------------------------------------------------------------
# Plain-JAX (XLA) reference of the same forward, for a numerical smoke test
# ----------------------------------------------------------------------------
def vae_reference(params, x, eps, cfg):
    s, p, k = cfg["stride"], cfg["padding"], cfg["kernel_size"]
    dn = ("NCHW", "HWIO", "NCHW")
    a = x
    for wt, bs in params["enc"]:
        a = lax.conv_general_dilated(a, wt, (s, s), [(p, p), (p, p)], dimension_numbers=dn)
        a = jax.nn.relu(a + bs.reshape(1, -1, 1, 1))
    wmu, bmu = params["mu"]
    wlv, blv = params["logvar"]
    mu = lax.conv_general_dilated(a, wmu, (1, 1), [(0, 0), (0, 0)], dimension_numbers=dn)
    mu = mu + bmu.reshape(1, -1, 1, 1)
    logvar = lax.conv_general_dilated(a, wlv, (1, 1), [(0, 0), (0, 0)], dimension_numbers=dn)
    logvar = logvar + blv.reshape(1, -1, 1, 1)
    z = mu + eps * jnp.exp(0.5 * logvar)
    y = z
    n_dec = len(params["dec"])
    for i, (wt, bs) in enumerate(params["dec"]):
        wf = jnp.transpose(wt[:, :, ::-1, ::-1], (2, 3, 0, 1))   # flip + to HWIO
        y = lax.conv_general_dilated(y, wf, (1, 1), [(k - 1 - p, k - 1 - p)] * 2,
                                     lhs_dilation=(s, s), dimension_numbers=dn)
        y = y + bs.reshape(1, -1, 1, 1)
        if i < n_dec - 1:
            y = jax.nn.relu(y)
    return jax.nn.sigmoid(y), mu, logvar


if __name__ == "__main__":
    key = jax.random.PRNGKey(0)
    pkey, xkey, ekey = jax.random.split(key, 3)

    params = init_params(pkey, CONFIG)
    B = 2
    H, W = CONFIG["image_size"]
    x = jax.random.uniform(xkey, (B, CONFIG["in_channels"], H, W), jnp.float32)

    # batch_block=1 -> grid=(2,) "parallel": v7x's two TensorCores each take one
    # image; constants are DMA'd once and stay resident across grid steps.
    # TODO(synk): for large batches raise batch_block so Bb*Cout ~ 128-256 rows
    # (v6e/v7x MXU occupancy) while budgeting VMEM against v7x's 64 MiB.
    plan = build_plan(params, CONFIG, batch_block=1)
    hl, wl = plan["lat_hw"]
    eps = jax.random.normal(ekey, (B, CONFIG["latent_dim"], hl, wl), jnp.float32)

    fwd = jax.jit(functools.partial(vae_forward_fused, plan))
    recon, mu, logvar = fwd(x, eps)
    jax.block_until_ready((recon, mu, logvar))

    assert recon.shape == (B, CONFIG["in_channels"], H, W), recon.shape
    assert mu.shape == (B, CONFIG["latent_dim"], hl, wl), mu.shape
    assert logvar.shape == (B, CONFIG["latent_dim"], hl, wl), logvar.shape

    # numerical smoke test vs the XLA reference (tolerance covers bf16 MXU passes)
    r_ref, m_ref, lv_ref = vae_reference(params, x, eps, CONFIG)
    np.testing.assert_allclose(np.asarray(mu), np.asarray(m_ref), atol=2e-2, rtol=0)
    np.testing.assert_allclose(np.asarray(logvar), np.asarray(lv_ref), atol=2e-2, rtol=0)
    np.testing.assert_allclose(np.asarray(recon), np.asarray(r_ref), atol=2e-2, rtol=0)

    print("KERNEL_OK")
</pallas_src>

<mosaic_0001>
module attributes {stable_mosaic.version = 11 : i64} {
  func.func @_vae_fused_kernel(%arg0: i32, %arg1: memref<1x4x256xf32, #tpu.memory_space<vmem>>, %arg2: memref<1x8x16xf32, #tpu.memory_space<vmem>>, %arg3: memref<16x256x64xbf16, #tpu.memory_space<vmem>>, %arg4: memref<8x64xbf16, #tpu.memory_space<vmem>>, %arg5: memref<8x1xf32, #tpu.memory_space<vmem>>, %arg6: memref<16x64x16xbf16, #tpu.memory_space<vmem>>, %arg7: memref<16x128xbf16, #tpu.memory_space<vmem>>, %arg8: memref<16x1xf32, #tpu.memory_space<vmem>>, %arg9: memref<16x16xbf16, #tpu.memory_space<vmem>>, %arg10: memref<16x1xf32, #tpu.memory_space<vmem>>, %arg11: memref<16x16x64xbf16, #tpu.memory_space<vmem>>, %arg12: memref<8x128xbf16, #tpu.memory_space<vmem>>, %arg13: memref<8x1xf32, #tpu.memory_space<vmem>>, %arg14: memref<16x64x256xbf16, #tpu.memory_space<vmem>>, %arg15: memref<4x128xbf16, #tpu.memory_space<vmem>>, %arg16: memref<4x1xf32, #tpu.memory_space<vmem>>, %arg17: memref<1x4x256xf32, #tpu.memory_space<vmem>>, %arg18: memref<1x16x16xf32, #tpu.memory_space<vmem>>, %arg19: memref<64x64xbf16, #tpu.memory_space<vmem>>, %arg20: memref<128x16xbf16, #tpu.memory_space<vmem>>, %arg21: memref<128x64xbf16, #tpu.memory_space<vmem>>, %arg22: memref<128x256xbf16, #tpu.memory_space<vmem>>) attributes {dimension_semantics = [#tpu.dimension_semantics<parallel>], iteration_bounds = array<i64: 2>, scalar_prefetch = 0 : i64, scratch_operands = 4 : i64, tpu.core_type = #tpu.core_type<tc>, window_params = [{transform_indices = @transform_0, window_bounds = array<i64: 1, 4, 256>}, {transform_indices = @transform_1, window_bounds = array<i64: 1, 8, 16>}, {pipeline_mode = #tpu.pipeline_mode<synchronous>, transform_indices = @transform_2, window_bounds = array<i64: 16, 256, 64>}, {pipeline_mode = #tpu.pipeline_mode<synchronous>, transform_indices = @transform_3, window_bounds = array<i64: 8, 64>}, {pipeline_mode = #tpu.pipeline_mode<synchronous>, transform_indices = @transform_4, window_bounds = array<i64: 8, 1>}, {pipeline_mode = #tpu.pipeline_mode<synchronous>, transform_indices = @transform_5, window_bounds = array<i64: 16, 64, 16>}, {pipeline_mode = #tpu.pipeline_mode<synchronous>, transform_indices = @transform_6, window_bounds = array<i64: 16, 128>}, {pipeline_mode = #tpu.pipeline_mode<synchronous>, transform_indices = @transform_7, window_bounds = array<i64: 16, 1>}, {pipeline_mode = #tpu.pipeline_mode<synchronous>, transform_indices = @transform_8, window_bounds = array<i64: 16, 16>}, {pipeline_mode = #tpu.pipeline_mode<synchronous>, transform_indices = @transform_9, window_bounds = array<i64: 16, 1>}, {pipeline_mode = #tpu.pipeline_mode<synchronous>, transform_indices = @transform_10, window_bounds = array<i64: 16, 16, 64>}, {pipeline_mode = #tpu.pipeline_mode<synchronous>, transform_indices = @transform_11, window_bounds = array<i64: 8, 128>}, {pipeline_mode = #tpu.pipeline_mode<synchronous>, transform_indices = @transform_12, window_bounds = array<i64: 8, 1>}, {pipeline_mode = #tpu.pipeline_mode<synchronous>, transform_indices = @transform_13, window_bounds = array<i64: 16, 64, 256>}, {pipeline_mode = #tpu.pipeline_mode<synchronous>, transform_indices = @transform_14, window_bounds = array<i64: 4, 128>}, {pipeline_mode = #tpu.pipeline_mode<synchronous>, transform_indices = @transform_15, window_bounds = array<i64: 4, 1>}, {transform_indices = @transform_16, window_bounds = array<i64: 1, 4, 256>}, {transform_indices = @transform_17, window_bounds = array<i64: 1, 16, 16>}]} {
    %c0 = arith.constant 0 : index
    %c0_0 = arith.constant 0 : index
    %c0_1 = arith.constant 0 : index
    %0 = vector.load %arg1[%c0, %c0_0, %c0_1] : memref<1x4x256xf32, #tpu.memory_space<vmem>>, vector<1x4x256xf32>
    %1 = vector.shape_cast %0 : vector<1x4x256xf32> to vector<4x256xf32>
    %2 = arith.truncf %1 : vector<4x256xf32> to vector<4x256xbf16>
    %c0_2 = arith.constant 0 : index
    %c0_3 = arith.constant 0 : index
    %c0_4 = arith.constant 0 : index
    %3 = vector.load %arg3[%c0_2, %c0_3, %c0_4] : memref<16x256x64xbf16, #tpu.memory_space<vmem>>, vector<1x256x64xbf16>
    %4 = vector.shape_cast %3 : vector<1x256x64xbf16> to vector<256x64xbf16>
    %cst = arith.constant dense<0.000000e+00> : vector<4x64xf32>
    %5 = tpu.matmul %2, %4, %cst {dimension_numbers = #tpu.dot_dimension_numbers<[1], [0], [0], [1], [0, 0, 1, 1], [], []>} : vector<4x256xbf16>, vector<256x64xbf16>, vector<4x64xf32> -> vector<4x64xf32>
    %c1 = arith.constant 1 : index
    %c0_5 = arith.constant 0 : index
    %c0_6 = arith.constant 0 : index
    %6 = vector.load %arg3[%c1, %c0_5, %c0_6] : memref<16x256x64xbf16, #tpu.memory_space<vmem>>, vector<1x256x64xbf16>
    %7 = vector.shape_cast %6 : vector<1x256x64xbf16> to vector<256x64xbf16>
    %cst_7 = arith.constant dense<0.000000e+00> : vector<4x64xf32>
    %8 = tpu.matmul %2, %7, %cst_7 {dimension_numbers = #tpu.dot_dimension_numbers<[1], [0], [0], [1], [0, 0, 1, 1], [], []>} : vector<4x256xbf16>, vector<256x64xbf16>, vector<4x64xf32> -> vector<4x64xf32>
    %9 = tpu.concatenate %5, %8 in 0 : vector<4x64xf32>, vector<4x64xf32> -> vector<8x64xf32>
    %10 = arith.truncf %9 : vector<8x64xf32> to vector<8x64xbf16>
    %c0_8 = arith.constant 0 : index
    %c0_9 = arith.constant 0 : index
    %11 = vector.load %arg19[%c0_8, %c0_9] : memref<64x64xbf16, #tpu.memory_space<vmem>>, vector<8x64xbf16>
    tpu.vector_store %arg19[%c0_8, %c0_9], %10 {strides = array<i32>} : memref<64x64xbf16, #tpu.memory_space<vmem>>, vector<8x64xbf16>,
    %c2 = arith.constant 2 : index
    %c0_10 = arith.constant 0 : index
    %c0_11 = arith.constant 0 : index
    %12 = vector.load %arg3[%c2, %c0_10, %c0_11] : memref<16x256x64xbf16, #tpu.memory_space<vmem>>, vector<1x256x64xbf16>
    %13 = vector.shape_cast %12 : vector<1x256x64xbf16> to vector<256x64xbf16>
    %cst_12 = arith.constant dense<0.000000e+00> : vector<4x64xf32>
    %14 = tpu.matmul %2, %13, %cst_12 {dimension_numbers = #tpu.dot_dimension_numbers<[1], [0], [0], [1], [0, 0, 1, 1], [], []>} : vector<4x256xbf16>, vector<256x64xbf16>, vector<4x64xf32> -> vector<4x64xf32>
    %c3 = arith.constant 3 : index
    %c0_13 = arith.constant 0 : index
    %c0_14 = arith.constant 0 : index
    %15 = vector.load %arg3[%c3, %c0_13, %c0_14] : memref<16x256x64xbf16, #tpu.memory_space<vmem>>, vector<1x256x64xbf16>
    %16 = vector.shape_cast %15 : vector<1x256x64xbf16> to vector<256x64xbf16>
    %cst_15 = arith.constant dense<0.000000e+00> : vector<4x64xf32>
    %17 = tpu.matmul %2, %16, %cst_15 {dimension_numbers = #tpu.dot_dimension_numbers<[1], [0], [0], [1], [0, 0, 1, 1], [], []>} : vector<4x256xbf16>, vector<256x64xbf16>, vector<4x64xf32> -> vector<4x64xf32>
    %18 = tpu.concatenate %14, %17 in 0 : vector<4x64xf32>, vector<4x64xf32> -> vector<8x64xf32>
    %19 = arith.truncf %18 : vector<8x64xf32> to vector<8x64xbf16>
    %c8 = arith.constant 8 : index
    %c0_16 = arith.constant 0 : index
    %20 = vector.load %arg19[%c8, %c0_16] : memref<64x64xbf16, #tpu.memory_space<vmem>>, vector<8x64xbf16>
    tpu.vector_store %arg19[%c8, %c0_16], %19 {strides = array<i32>} : memref<64x64xbf16, #tpu.memory_space<vmem>>, vector<8x64xbf16>,
    %c4 = arith.constant 4 : index
    %c0_17 = arith.constant 0 : index
    %c0_18 = arith.constant 0 : index
    %21 = vector.load %arg3[%c4, %c0_17, %c0_18] : memref<16x256x64xbf16, #tpu.memory_space<vmem>>, vector<1x256x64xbf16>
    %22 = vector.shape_cast %21 : vector<1x256x64xbf16> to vector<256x64xbf16>
    %cst_19 = arith.constant dense<0.000000e+00> : vector<4x64xf32>
    %23 = tpu.matmul %2, %22, %cst_19 {dimension_numbers = #tpu.dot_dimension_numbers<[1], [0], [0], [1], [0, 0, 1, 1], [], []>} : vector<4x256xbf16>, vector<256x64xbf16>, vector<4x64xf32> -> vector<4x64xf32>
    %c5 = arith.constant 5 : index
    %c0_20 = arith.constant 0 : index
    %c0_21 = arith.constant 0 : index
    %24 = vector.load %arg3[%c5, %c0_20, %c0_21] : memref<16x256x64xbf16, #tpu.memory_space<vmem>>, vector<1x256x64xbf16>
    %25 = vector.shape_cast %24 : vector<1x256x64xbf16> to vector<256x64xbf16>
    %cst_22 = arith.constant dense<0.000000e+00> : vector<4x64xf32>
    %26 = tpu.matmul %2, %25, %cst_22 {dimension_numbers = #tpu.dot_dimension_numbers<[1], [0], [0], [1], [0, 0, 1, 1], [], []>} : vector<4x256xbf16>, vector<256x64xbf16>, vector<4x64xf32> -> vector<4x64xf32>
    %27 = tpu.concatenate %23, %26 in 0 : vector<4x64xf32>, vector<4x64xf32> -> vector<8x64xf32>
    %28 = arith.truncf %27 : vector<8x64xf32> to vector<8x64xbf16>
    %c16 = arith.constant 16 : index
    %c0_23 = arith.constant 0 : index
    %29 = vector.load %arg19[%c16, %c0_23] : memref<64x64xbf16, #tpu.memory_space<vmem>>, vector<8x64xbf16>
    tpu.vector_store %arg19[%c16, %c0_23], %28 {strides = array<i32>} : memref<64x64xbf16, #tpu.memory_space<vmem>>, vector<8x64xbf16>,
    %c6 = arith.constant 6 : index
    %c0_24 = arith.constant 0 : index
    %c0_25 = arith.constant 0 : index
    %30 = vector.load %arg3[%c6, %c0_24, %c0_25] : memref<16x256x64xbf16, #tpu.memory_space<vmem>>, vector<1x256x64xbf16>
    %31 = vector.shape_cast %30 : vector<1x256x64xbf16> to vector<256x64xbf16>
    %cst_26 = arith.constant dense<0.000000e+00> : vector<4x64xf32>
    %32 = tpu.matmul %2, %31, %cst_26 {dimension_numbers = #tpu.dot_dimension_numbers<[1], [0], [0], [1], [0, 0, 1, 1], [], []>} : vector<4x256xbf16>, vector<256x64xbf16>, vector<4x64xf32> -> vector<4x64xf32>
    %c7 = arith.constant 7 : index
    %c0_27 = arith.constant 0 : index
    %c0_28 = arith.constant 0 : index
    %33 = vector.load %arg3[%c7, %c0_27, %c0_28] : memref<16x256x64xbf16, #tpu.memory_space<vmem>>, vector<1x256x64xbf16>
    %34 = vector.shape_cast %33 : vector<1x256x64xbf16> to vector<256x64xbf16>
    %cst_29 = arith.constant dense<0.000000e+00> : vector<4x64xf32>
    %35 = tpu.matmul %2, %34, %cst_29 {dimension_numbers = #tpu.dot_dimension_numbers<[1], [0], [0], [1], [0, 0, 1, 1], [], []>} : vector<4x256xbf16>, vector<256x64xbf16>, vector<4x64xf32> -> vector<4x64xf32>
    %36 = tpu.concatenate %32, %35 in 0 : vector<4x64xf32>, vector<4x64xf32> -> vector<8x64xf32>
    %37 = arith.truncf %36 : vector<8x64xf32> to vector<8x64xbf16>
    %c24 = arith.constant 24 : index
    %c0_30 = arith.constant 0 : index
    %38 = vector.load %arg19[%c24, %c0_30] : memref<64x64xbf16, #tpu.memory_space<vmem>>, vector<8x64xbf16>
    tpu.vector_store %arg19[%c24, %c0_30], %37 {strides = array<i32>} : memref<64x64xbf16, #tpu.memory_space<vmem>>, vector<8x64xbf16>,
    %c8_31 = arith.constant 8 : index
    %c0_32 = arith.constant 0 : index
    %c0_33 = arith.constant 0 : index
    %39 = vector.load %arg3[%c8_31, %c0_32, %c0_33] : memref<16x256x64xbf16, #tpu.memory_space<vmem>>, vector<1x256x64xbf16>
    %40 = vector.shape_cast %39 : vector<1x256x64xbf16> to vector<256x64xbf16>
    %cst_34 = arith.constant dense<0.000000e+00> : vector<4x64xf32>
    %41 = tpu.matmul %2, %40, %cst_34 {dimension_numbers = #tpu.dot_dimension_numbers<[1], [0], [0], [1], [0, 0, 1, 1], [], []>} : vector<4x256xbf16>, vector<256x64xbf16>, vector<4x64xf32> -> vector<4x64xf32>
    %c9 = arith.constant 9 : index
    %c0_35 = arith.constant 0 : index
    %c0_36 = arith.constant 0 : index
    %42 = vector.load %arg3[%c9, %c0_35, %c0_36] : memref<16x256x64xbf16, #tpu.memory_space<vmem>>, vector<1x256x64xbf16>
    %43 = vector.shape_cast %42 : vector<1x256x64xbf16> to vector<256x64xbf16>
    %cst_37 = arith.constant dense<0.000000e+00> : vector<4x64xf32>
    %44 = tpu.matmul %2, %43, %cst_37 {dimension_numbers = #tpu.dot_dimension_numbers<[1], [0], [0], [1], [0, 0, 1, 1], [], []>} : vector<4x256xbf16>, vector<256x64xbf16>, vector<4x64xf32> -> vector<4x64xf32>
    %45 = tpu.concatenate %41, %44 in 0 : vector<4x64xf32>, vector<4x64xf32> -> vector<8x64xf32>
    %46 = arith.truncf %45 : vector<8x64xf32> to vector<8x64xbf16>
    %c32 = arith.constant 32 : index
    %c0_38 = arith.constant 0 : index
    %47 = vector.load %arg19[%c32, %c0_38] : memref<64x64xbf16, #tpu.memory_space<vmem>>, vector<8x64xbf16>
    tpu.vector_store %arg19[%c32, %c0_38], %46 {strides = array<i32>} : memref<64x64xbf16, #tpu.memory_space<vmem>>, vector<8x64xbf16>,
    %c10 = arith.constant 10 : index
    %c0_39 = arith.constant 0 : index
    %c0_40 = arith.constant 0 : index
    %48 = vector.load %arg3[%c10, %c0_39, %c0_40] : memref<16x256x64xbf16, #tpu.memory_space<vmem>>, vector<1x256x64xbf16>
    %49 = vector.shape_cast %48 : vector<1x256x64xbf16> to vector<256x64xbf16>
    %cst_41 = arith.constant dense<0.000000e+00> : vector<4x64xf32>
    %50 = tpu.matmul %2, %49, %cst_41 {dimension_numbers = #tpu.dot_dimension_numbers<[1], [0], [0], [1], [0, 0, 1, 1], [], []>} : vector<4x256xbf16>, vector<256x64xbf16>, vector<4x64xf32> -> vector<4x64xf32>
    %c11 = arith.constant 11 : index
    %c0_42 = arith.constant 0 : index
    %c0_43 = arith.constant 0 : index
    %51 = vector.load %arg3[%c11, %c0_42, %c0_43] : memref<16x256x64xbf16, #tpu.memory_space<vmem>>, vector<1x256x64xbf16>
    %52 = vector.shape_cast %51 : vector<1x256x64xbf16> to vector<256x64xbf16>
    %cst_44 = arith.constant dense<0.000000e+00> : vector<4x64xf32>
    %53 = tpu.matmul %2, %52, %cst_44 {dimension_numbers = #tpu.dot_dimension_numbers<[1], [0], [0], [1], [0, 0, 1, 1], [], []>} : vector<4x256xbf16>, vector<256x64xbf16>, vector<4x64xf32> -> vector<4x64xf32>
    %54 = tpu.concatenate %50, %53 in 0 : vector<4x64xf32>, vector<4x64xf32> -> vector<8x64xf32>
    %55 = arith.truncf %54 : vector<8x64xf32> to vector<8x64xbf16>
    %c40 = arith.constant 40 : index
    %c0_45 = arith.constant 0 : index
    %56 = vector.load %arg19[%c40, %c0_45] : memref<64x64xbf16, #tpu.memory_space<vmem>>, vector<8x64xbf16>
    tpu.vector_store %arg19[%c40, %c0_45], %55 {strides = array<i32>} : memref<64x64xbf16, #tpu.memory_space<vmem>>, vector<8x64xbf16>,
    %c12 = arith.constant 12 : index
    %c0_46 = arith.constant 0 : index
    %c0_47 = arith.constant 0 : index
    %57 = vector.load %arg3[%c12, %c0_46, %c0_47] : memref<16x256x64xbf16, #tpu.memory_space<vmem>>, vector<1x256x64xbf16>
    %58 = vector.shape_cast %57 : vector<1x256x64xbf16> to vector<256x64xbf16>
    %cst_48 = arith.constant dense<0.000000e+00> : vector<4x64xf32>
    %59 = tpu.matmul %2, %58, %cst_48 {dimension_numbers = #tpu.dot_dimension_numbers<[1], [0], [0], [1], [0, 0, 1, 1], [], []>} : vector<4x256xbf16>, vector<256x64xbf16>, vector<4x64xf32> -> vector<4x64xf32>
    %c13 = arith.constant 13 : index
    %c0_49 = arith.constant 0 : index
    %c0_50 = arith.constant 0 : index
    %60 = vector.load %arg3[%c13, %c0_49, %c0_50] : memref<16x256x64xbf16, #tpu.memory_space<vmem>>, vector<1x256x64xbf16>
    %61 = vector.shape_cast %60 : vector<1x256x64xbf16> to vector<256x64xbf16>
    %cst_51 = arith.constant dense<0.000000e+00> : vector<4x64xf32>
    %62 = tpu.matmul %2, %61, %cst_51 {dimension_numbers = #tpu.dot_dimension_numbers<[1], [0], [0], [1], [0, 0, 1, 1], [], []>} : vector<4x256xbf16>, vector<256x64xbf16>, vector<4x64xf32> -> vector<4x64xf32>
    %63 = tpu.concatenate %59, %62 in 0 : vector<4x64xf32>, vector<4x64xf32> -> vector<8x64xf32>
    %64 = arith.truncf %63 : vector<8x64xf32> to vector<8x64xbf16>
    %c48 = arith.constant 48 : index
    %c0_52 = arith.constant 0 : index
    %65 = vector.load %arg19[%c48, %c0_52] : memref<64x64xbf16, #tpu.memory_space<vmem>>, vector<8x64xbf16>
    tpu.vector_store %arg19[%c48, %c0_52], %64 {strides = array<i32>} : memref<64x64xbf16, #tpu.memory_space<vmem>>, vector<8x64xbf16>,
    %c14 = arith.constant 14 : index
    %c0_53 = arith.constant 0 : index
    %c0_54 = arith.constant 0 : index
    %66 = vector.load %arg3[%c14, %c0_53, %c0_54] : memref<16x256x64xbf16, #tpu.memory_space<vmem>>, vector<1x256x64xbf16>
    %67 = vector.shape_cast %66 : vector<1x256x64xbf16> to vector<256x64xbf16>
    %cst_55 = arith.constant dense<0.000000e+00> : vector<4x64xf32>
    %68 = tpu.matmul %2, %67, %cst_55 {dimension_numbers = #tpu.dot_dimension_numbers<[1], [0], [0], [1], [0, 0, 1, 1], [], []>} : vector<4x256xbf16>, vector<256x64xbf16>, vector<4x64xf32> -> vector<4x64xf32>
    %c15 = arith.constant 15 : index
    %c0_56 = arith.constant 0 : index
    %c0_57 = arith.constant 0 : index
    %69 = vector.load %arg3[%c15, %c0_56, %c0_57] : memref<16x256x64xbf16, #tpu.memory_space<vmem>>, vector<1x256x64xbf16>
    %70 = vector.shape_cast %69 : vector<1x256x64xbf16> to vector<256x64xbf16>
    %cst_58 = arith.constant dense<0.000000e+00> : vector<4x64xf32>
    %71 = tpu.matmul %2, %70, %cst_58 {dimension_numbers = #tpu.dot_dimension_numbers<[1], [0], [0], [1], [0, 0, 1, 1], [], []>} : vector<4x256xbf16>, vector<256x64xbf16>, vector<4x64xf32> -> vector<4x64xf32>
    %72 = tpu.concatenate %68, %71 in 0 : vector<4x64xf32>, vector<4x64xf32> -> vector<8x64xf32>
    %73 = arith.truncf %72 : vector<8x64xf32> to vector<8x64xbf16>
    %c56 = arith.constant 56 : index
    %c0_59 = arith.constant 0 : index
    %74 = vector.load %arg19[%c56, %c0_59] : memref<64x64xbf16, #tpu.memory_space<vmem>>, vector<8x64xbf16>
    tpu.vector_store %arg19[%c56, %c0_59], %73 {strides = array<i32>} : memref<64x64xbf16, #tpu.memory_space<vmem>>, vector<8x64xbf16>,
    %c0_60 = arith.constant 0 : index
    %c0_61 = arith.constant 0 : index
    %75 = vector.load %arg4[%c0_60, %c0_61] : memref<8x64xbf16, #tpu.memory_space<vmem>>, vector<8x64xbf16>
    %c0_62 = arith.constant 0 : index
    %c0_63 = arith.constant 0 : index
    %76 = vector.load %arg19[%c0_62, %c0_63] : memref<64x64xbf16, #tpu.memory_space<vmem>>, vector<64x64xbf16>
    %cst_64 = arith.constant dense<0.000000e+00> : vector<8x64xf32>
    %77 = tpu.matmul %75, %76, %cst_64 {dimension_numbers = #tpu.dot_dimension_numbers<[1], [0], [0], [1], [0, 0, 1, 1], [], []>} : vector<8x64xbf16>, vector<64x64xbf16>, vector<8x64xf32> -> vector<8x64xf32>
    %c0_65 = arith.constant 0 : index
    %c0_66 = arith.constant 0 : index
    %78 = vector.load %arg5[%c0_65, %c0_66] : memref<8x1xf32, #tpu.memory_space<vmem>>, vector<8x1xf32>
    %79 = vector.broadcast %78 : vector<8x1xf32> to vector<8x64xf32>
    %80 = arith.addf %77, %79 : vector<8x64xf32>
    %cst_67 = arith.constant 0.000000e+00 : f32
    %81 = vector.broadcast %cst_67 : f32 to vector<8x64xf32>
    %82 = arith.maximumf %80, %81 : vector<8x64xf32>
    %83 = arith.truncf %82 : vector<8x64xf32> to vector<8x64xbf16>
    %c0_68 = arith.constant 0 : index
    %c0_69 = arith.constant 0 : index
    %c0_70 = arith.constant 0 : index
    %84 = vector.load %arg6[%c0_68, %c0_69, %c0_70] : memref<16x64x16xbf16, #tpu.memory_space<vmem>>, vector<1x64x16xbf16>
    %85 = vector.shape_cast %84 : vector<1x64x16xbf16> to vector<64x16xbf16>
    %cst_71 = arith.constant dense<0.000000e+00> : vector<8x16xf32>
    %86 = tpu.matmul %83, %85, %cst_71 {dimension_numbers = #tpu.dot_dimension_numbers<[1], [0], [0], [1], [0, 0, 1, 1], [], []>} : vector<8x64xbf16>, vector<64x16xbf16>, vector<8x16xf32> -> vector<8x16xf32>
    %87 = arith.truncf %86 : vector<8x16xf32> to vector<8x16xbf16>
    %c0_72 = arith.constant 0 : index
    %c0_73 = arith.constant 0 : index
    %88 = vector.load %arg20[%c0_72, %c0_73] : memref<128x16xbf16, #tpu.memory_space<vmem>>, vector<8x16xbf16>
    tpu.vector_store %arg20[%c0_72, %c0_73], %87 {strides = array<i32>} : memref<128x16xbf16, #tpu.memory_space<vmem>>, vector<8x16xbf16>,
    %c1_74 = arith.constant 1 : index
    %c0_75 = arith.constant 0 : index
    %c0_76 = arith.constant 0 : index
    %89 = vector.load %arg6[%c1_74, %c0_75, %c0_76] : memref<16x64x16xbf16, #tpu.memory_space<vmem>>, vector<1x64x16xbf16>
    %90 = vector.shape_cast %89 : vector<1x64x16xbf16> to vector<64x16xbf16>
    %cst_77 = arith.constant dense<0.000000e+00> : vector<8x16xf32>
    %91 = tpu.matmul %83, %90, %cst_77 {dimension_numbers = #tpu.dot_dimension_numbers<[1], [0], [0], [1], [0, 0, 1, 1], [], []>} : vector<8x64xbf16>, vector<64x16xbf16>, vector<8x16xf32> -> vector<8x16xf32>
    %92 = arith.truncf %91 : vector<8x16xf32> to vector<8x16xbf16>
    %c8_78 = arith.constant 8 : index
    %c0_79 = arith.constant 0 : index
    %93 = vector.load %arg20[%c8_78, %c0_79] : memref<128x16xbf16, #tpu.memory_space<vmem>>, vector<8x16xbf16>
    tpu.vector_store %arg20[%c8_78, %c0_79], %92 {strides = array<i32>} : memref<128x16xbf16, #tpu.memory_space<vmem>>, vector<8x16xbf16>,
    %c2_80 = arith.constant 2 : index
    %c0_81 = arith.constant 0 : index
    %c0_82 = arith.constant 0 : index
    %94 = vector.load %arg6[%c2_80, %c0_81, %c0_82] : memref<16x64x16xbf16, #tpu.memory_space<vmem>>, vector<1x64x16xbf16>
    %95 = vector.shape_cast %94 : vector<1x64x16xbf16> to vector<64x16xbf16>
    %cst_83 = arith.constant dense<0.000000e+00> : vector<8x16xf32>
    %96 = tpu.matmul %83, %95, %cst_83 {dimension_numbers = #tpu.dot_dimension_numbers<[1], [0], [0], [1], [0, 0, 1, 1], [], []>} : vector<8x64xbf16>, vector<64x16xbf16>, vector<8x16xf32> -> vector<8x16xf32>
    %97 = arith.truncf %96 : vector<8x16xf32> to vector<8x16xbf16>
    %c16_84 = arith.constant 16 : index
    %c0_85 = arith.constant 0 : index
    %98 = vector.load %arg20[%c16_84, %c0_85] : memref<128x16xbf16, #tpu.memory_space<vmem>>, vector<8x16xbf16>
    tpu.vector_store %arg20[%c16_84, %c0_85], %97 {strides = array<i32>} : memref<128x16xbf16, #tpu.memory_space<vmem>>, vector<8x16xbf16>,
    %c3_86 = arith.constant 3 : index
    %c0_87 = arith.constant 0 : index
    %c0_88 = arith.constant 0 : index
    %99 = vector.load %arg6[%c3_86, %c0_87, %c0_88] : memref<16x64x16xbf16, #tpu.memory_space<vmem>>, vector<1x64x16xbf16>
    %100 = vector.shape_cast %99 : vector<1x64x16xbf16> to vector<64x16xbf16>
    %cst_89 = arith.constant dense<0.000000e+00> : vector<8x16xf32>
    %101 = tpu.matmul %83, %100, %cst_89 {dimension_numbers = #tpu.dot_dimension_numbers<[1], [0], [0], [1], [0, 0, 1, 1], [], []>} : vector<8x64xbf16>, vector<64x16xbf16>, vector<8x16xf32> -> vector<8x16xf32>
    %102 = arith.truncf %101 : vector<8x16xf32> to vector<8x16xbf16>
    %c24_90 = arith.constant 24 : index
    %c0_91 = arith.constant 0 : index
    %103 = vector.load %arg20[%c24_90, %c0_91] : memref<128x16xbf16, #tpu.memory_space<vmem>>, vector<8x16xbf16>
    tpu.vector_store %arg20[%c24_90, %c0_91], %102 {strides = array<i32>} : memref<128x16xbf16, #tpu.memory_space<vmem>>, vector<8x16xbf16>,
    %c4_92 = arith.constant 4 : index
    %c0_93 = arith.constant 0 : index
    %c0_94 = arith.constant 0 : index
    %104 = vector.load %arg6[%c4_92, %c0_93, %c0_94] : memref<16x64x16xbf16, #tpu.memory_space<vmem>>, vector<1x64x16xbf16>
    %105 = vector.shape_cast %104 : vector<1x64x16xbf16> to vector<64x16xbf16>
    %cst_95 = arith.constant dense<0.000000e+00> : vector<8x16xf32>
    %106 = tpu.matmul %83, %105, %cst_95 {dimension_numbers = #tpu.dot_dimension_numbers<[1], [0], [0], [1], [0, 0, 1, 1], [], []>} : vector<8x64xbf16>, vector<64x16xbf16>, vector<8x16xf32> -> vector<8x16xf32>
    %107 = arith.truncf %106 : vector<8x16xf32> to vector<8x16xbf16>
    %c32_96 = arith.constant 32 : index
    %c0_97 = arith.constant 0 : index
    %108 = vector.load %arg20[%c32_96, %c0_97] : memref<128x16xbf16, #tpu.memory_space<vmem>>, vector<8x16xbf16>
    tpu.vector_store %arg20[%c32_96, %c0_97], %107 {strides = array<i32>} : memref<128x16xbf16, #tpu.memory_space<vmem>>, vector<8x16xbf16>,
    %c5_98 = arith.constant 5 : index
    %c0_99 = arith.constant 0 : index
    %c0_100 = arith.constant 0 : index
    %109 = vector.load %arg6[%c5_98, %c0_99, %c0_100] : memref<16x64x16xbf16, #tpu.memory_space<vmem>>, vector<1x64x16xbf16>
    %110 = vector.shape_cast %109 : vector<1x64x16xbf16> to vector<64x16xbf16>
    %cst_101 = arith.constant dense<0.000000e+00> : vector<8x16xf32>
    %111 = tpu.matmul %83, %110, %cst_101 {dimension_numbers = #tpu.dot_dimension_numbers<[1], [0], [0], [1], [0, 0, 1, 1], [], []>} : vector<8x64xbf16>, vector<64x16xbf16>, vector<8x16xf32> -> vector<8x16xf32>
    %112 = arith.truncf %111 : vector<8x16xf32> to vector<8x16xbf16>
    %c40_102 = arith.constant 40 : index
    %c0_103 = arith.constant 0 : index
    %113 = vector.load %arg20[%c40_102, %c0_103] : memref<128x16xbf16, #tpu.memory_space<vmem>>, vector<8x16xbf16>
    tpu.vector_store %arg20[%c40_102, %c0_103], %112 {strides = array<i32>} : memref<128x16xbf16, #tpu.memory_space<vmem>>, vector<8x16xbf16>,
    %c6_104 = arith.constant 6 : index
    %c0_105 = arith.constant 0 : index
    %c0_106 = arith.constant 0 : index
    %114 = vector.load %arg6[%c6_104, %c0_105, %c0_106] : memref<16x64x16xbf16, #tpu.memory_space<vmem>>, vector<1x64x16xbf16>
    %115 = vector.shape_cast %114 : vector<1x64x16xbf16> to vector<64x16xbf16>
    %cst_107 = arith.constant dense<0.000000e+00> : vector<8x16xf32>
    %116 = tpu.matmul %83, %115, %cst_107 {dimension_numbers = #tpu.dot_dimension_numbers<[1], [0], [0], [1], [0, 0, 1, 1], [], []>} : vector<8x64xbf16>, vector<64x16xbf16>, vector<8x16xf32> -> vector<8x16xf32>
    %117 = arith.truncf %116 : vector<8x16xf32> to vector<8x16xbf16>
    %c48_108 = arith.constant 48 : index
    %c0_109 = arith.constant 0 : index
    %118 = vector.load %arg20[%c48_108, %c0_109] : memref<128x16xbf16, #tpu.memory_space<vmem>>, vector<8x16xbf16>
    tpu.vector_store %arg20[%c48_108, %c0_109], %117 {strides = array<i32>} : memref<128x16xbf16, #tpu.memory_space<vmem>>, vector<8x16xbf16>,
    %c7_110 = arith.constant 7 : index
    %c0_111 = arith.constant 0 : index
    %c0_112 = arith.constant 0 : index
    %119 = vector.load %arg6[%c7_110, %c0_111, %c0_112] : memref<16x64x16xbf16, #tpu.memory_space<vmem>>, vector<1x64x16xbf16>
    %120 = vector.shape_cast %119 : vector<1x64x16xbf16> to vector<64x16xbf16>
    %cst_113 = arith.constant dense<0.000000e+00> : vector<8x16xf32>
    %121 = tpu.matmul %83, %120, %cst_113 {dimension_numbers = #tpu.dot_dimension_numbers<[1], [0], [0], [1], [0, 0, 1, 1], [], []>} : vector<8x64xbf16>, vector<64x16xbf16>, vector<8x16xf32> -> vector<8x16xf32>
    %122 = arith.truncf %121 : vector<8x16xf32> to vector<8x16xbf16>
    %c56_114 = arith.constant 56 : index
    %c0_115 = arith.constant 0 : index
    %123 = vector.load %arg20[%c56_114, %c0_115] : memref<128x16xbf16, #tpu.memory_space<vmem>>, vector<8x16xbf16>
    tpu.vector_store %arg20[%c56_114, %c0_115], %122 {strides = array<i32>} : memref<128x16xbf16, #tpu.memory_space<vmem>>, vector<8x16xbf16>,
    %c8_116 = arith.constant 8 : index
    %c0_117 = arith.constant 0 : index
    %c0_118 = arith.constant 0 : index
    %124 = vector.load %arg6[%c8_116, %c0_117, %c0_118] : memref<16x64x16xbf16, #tpu.memory_space<vmem>>, vector<1x64x16xbf16>
    %125 = vector.shape_cast %124 : vector<1x64x16xbf16> to vector<64x16xbf16>
    %cst_119 = arith.constant dense<0.000000e+00> : vector<8x16xf32>
    %126 = tpu.matmul %83, %125, %cst_119 {dimension_numbers = #tpu.dot_dimension_numbers<[1], [0], [0], [1], [0, 0, 1, 1], [], []>} : vector<8x64xbf16>, vector<64x16xbf16>, vector<8x16xf32> -> vector<8x16xf32>
    %127 = arith.truncf %126 : vector<8x16xf32> to vector<8x16xbf16>
    %c64 = arith.constant 64 : index
    %c0_120 = arith.constant 0 : index
    %128 = vector.load %arg20[%c64, %c0_120] : memref<128x16xbf16, #tpu.memory_space<vmem>>, vector<8x16xbf16>
    tpu.vector_store %arg20[%c64, %c0_120], %127 {strides = array<i32>} : memref<128x16xbf16, #tpu.memory_space<vmem>>, vector<8x16xbf16>,
    %c9_121 = arith.constant 9 : index
    %c0_122 = arith.constant 0 : index
    %c0_123 = arith.constant 0 : index
    %129 = vector.load %arg6[%c9_121, %c0_122, %c0_123] : memref<16x64x16xbf16, #tpu.memory_space<vmem>>, vector<1x64x16xbf16>
    %130 = vector.shape_cast %129 : vector<1x64x16xbf16> to vector<64x16xbf16>
    %cst_124 = arith.constant dense<0.000000e+00> : vector<8x16xf32>
    %131 = tpu.matmul %83, %130, %cst_124 {dimension_numbers = #tpu.dot_dimension_numbers<[1], [0], [0], [1], [0, 0, 1, 1], [], []>} : vector<8x64xbf16>, vector<64x16xbf16>, vector<8x16xf32> -> vector<8x16xf32>
    %132 = arith.truncf %131 : vector<8x16xf32> to vector<8x16xbf16>
    %c72 = arith.constant 72 : index
    %c0_125 = arith.constant 0 : index
    %133 = vector.load %arg20[%c72, %c0_125] : memref<128x16xbf16, #tpu.memory_space<vmem>>, vector<8x16xbf16>
    tpu.vector_store %arg20[%c72, %c0_125], %132 {strides = array<i32>} : memref<128x16xbf16, #tpu.memory_space<vmem>>, vector<8x16xbf16>,
    %c10_126 = arith.constant 10 : index
    %c0_127 = arith.constant 0 : index
    %c0_128 = arith.constant 0 : index
    %134 = vector.load %arg6[%c10_126, %c0_127, %c0_128] : memref<16x64x16xbf16, #tpu.memory_space<vmem>>, vector<1x64x16xbf16>
    %135 = vector.shape_cast %134 : vector<1x64x16xbf16> to vector<64x16xbf16>
    %cst_129 = arith.constant dense<0.000000e+00> : vector<8x16xf32>
    %136 = tpu.matmul %83, %135, %cst_129 {dimension_numbers = #tpu.dot_dimension_numbers<[1], [0], [0], [1], [0, 0, 1, 1], [], []>} : vector<8x64xbf16>, vector<64x16xbf16>, vector<8x16xf32> -> vector<8x16xf32>
    %137 = arith.truncf %136 : vector<8x16xf32> to vector<8x16xbf16>
    %c80 = arith.constant 80 : index
    %c0_130 = arith.constant 0 : index
    %138 = vector.load %arg20[%c80, %c0_130] : memref<128x16xbf16, #tpu.memory_space<vmem>>, vector<8x16xbf16>
    tpu.vector_store %arg20[%c80, %c0_130], %137 {strides = array<i32>} : memref<128x16xbf16, #tpu.memory_space<vmem>>, vector<8x16xbf16>,
    %c11_131 = arith.constant 11 : index
    %c0_132 = arith.constant 0 : index
    %c0_133 = arith.constant 0 : index
    %139 = vector.load %arg6[%c11_131, %c0_132, %c0_133] : memref<16x64x16xbf16, #tpu.memory_space<vmem>>, vector<1x64x16xbf16>
    %140 = vector.shape_cast %139 : vector<1x64x16xbf16> to vector<64x16xbf16>
    %cst_134 = arith.constant dense<0.000000e+00> : vector<8x16xf32>
    %141 = tpu.matmul %83, %140, %cst_134 {dimension_numbers = #tpu.dot_dimension_numbers<[1], [0], [0], [1], [0, 0, 1, 1], [], []>} : vector<8x64xbf16>, vector<64x16xbf16>, vector<8x16xf32> -> vector<8x16xf32>
    %142 = arith.truncf %141 : vector<8x16xf32> to vector<8x16xbf16>
    %c88 = arith.constant 88 : index
    %c0_135 = arith.constant 0 : index
    %143 = vector.load %arg20[%c88, %c0_135] : memref<128x16xbf16, #tpu.memory_space<vmem>>, vector<8x16xbf16>
    tpu.vector_store %arg20[%c88, %c0_135], %142 {strides = array<i32>} : memref<128x16xbf16, #tpu.memory_space<vmem>>, vector<8x16xbf16>,
    %c12_136 = arith.constant 12 : index
    %c0_137 = arith.constant 0 : index
    %c0_138 = arith.constant 0 : index
    %144 = vector.load %arg6[%c12_136, %c0_137, %c0_138] : memref<16x64x16xbf16, #tpu.memory_space<vmem>>, vector<1x64x16xbf16>
    %145 = vector.shape_cast %144 : vector<1x64x16xbf16> to vector<64x16xbf16>
    %cst_139 = arith.constant dense<0.000000e+00> : vector<8x16xf32>
    %146 = tpu.matmul %83, %145, %cst_139 {dimension_numbers = #tpu.dot_dimension_numbers<[1], [0], [0], [1], [0, 0, 1, 1], [], []>} : vector<8x64xbf16>, vector<64x16xbf16>, vector<8x16xf32> -> vector<8x16xf32>
    %147 = arith.truncf %146 : vector<8x16xf32> to vector<8x16xbf16>
    %c96 = arith.constant 96 : index
    %c0_140 = arith.constant 0 : index
    %148 = vector.load %arg20[%c96, %c0_140] : memref<128x16xbf16, #tpu.memory_space<vmem>>, vector<8x16xbf16>
    tpu.vector_store %arg20[%c96, %c0_140], %147 {strides = array<i32>} : memref<128x16xbf16, #tpu.memory_space<vmem>>, vector<8x16xbf16>,
    %c13_141 = arith.constant 13 : index
    %c0_142 = arith.constant 0 : index
    %c0_143 = arith.constant 0 : index
    %149 = vector.load %arg6[%c13_141, %c0_142, %c0_143] : memref<16x64x16xbf16, #tpu.memory_space<vmem>>, vector<1x64x16xbf16>
    %150 = vector.shape_cast %149 : vector<1x64x16xbf16> to vector<64x16xbf16>
    %cst_144 = arith.constant dense<0.000000e+00> : vector<8x16xf32>
    %151 = tpu.matmul %83, %150, %cst_144 {dimension_numbers = #tpu.dot_dimension_numbers<[1], [0], [0], [1], [0, 0, 1, 1], [], []>} : vector<8x64xbf16>, vector<64x16xbf16>, vector<8x16xf32> -> vector<8x16xf32>
    %152 = arith.truncf %151 : vector<8x16xf32> to vector<8x16xbf16>
    %c104 = arith.constant 104 : index
    %c0_145 = arith.constant 0 : index
    %153 = vector.load %arg20[%c104, %c0_145] : memref<128x16xbf16, #tpu.memory_space<vmem>>, vector<8x16xbf16>
    tpu.vector_store %arg20[%c104, %c0_145], %152 {strides = array<i32>} : memref<128x16xbf16, #tpu.memory_space<vmem>>, vector<8x16xbf16>,
    %c14_146 = arith.constant 14 : index
    %c0_147 = arith.constant 0 : index
    %c0_148 = arith.constant 0 : index
    %154 = vector.load %arg6[%c14_146, %c0_147, %c0_148] : memref<16x64x16xbf16, #tpu.memory_space<vmem>>, vector<1x64x16xbf16>
    %155 = vector.shape_cast %154 : vector<1x64x16xbf16> to vector<64x16xbf16>
    %cst_149 = arith.constant dense<0.000000e+00> : vector<8x16xf32>
    %156 = tpu.matmul %83, %155, %cst_149 {dimension_numbers = #tpu.dot_dimension_numbers<[1], [0], [0], [1], [0, 0, 1, 1], [], []>} : vector<8x64xbf16>, vector<64x16xbf16>, vector<8x16xf32> -> vector<8x16xf32>
    %157 = arith.truncf %156 : vector<8x16xf32> to vector<8x16xbf16>
    %c112 = arith.constant 112 : index
    %c0_150 = arith.constant 0 : index
    %158 = vector.load %arg20[%c112, %c0_150] : memref<128x16xbf16, #tpu.memory_space<vmem>>, vector<8x16xbf16>
    tpu.vector_store %arg20[%c112, %c0_150], %157 {strides = array<i32>} : memref<128x16xbf16, #tpu.memory_space<vmem>>, vector<8x16xbf16>,
    %c15_151 = arith.constant 15 : index
    %c0_152 = arith.constant 0 : index
    %c0_153 = arith.constant 0 : index
    %159 = vector.load %arg6[%c15_151, %c0_152, %c0_153] : memref<16x64x16xbf16, #tpu.memory_space<vmem>>, vector<1x64x16xbf16>
    %160 = vector.shape_cast %159 : vector<1x64x16xbf16> to vector<64x16xbf16>
    %cst_154 = arith.constant dense<0.000000e+00> : vector<8x16xf32>
    %161 = tpu.matmul %83, %160, %cst_154 {dimension_numbers = #tpu.dot_dimension_numbers<[1], [0], [0], [1], [0, 0, 1, 1], [], []>} : vector<8x64xbf16>, vector<64x16xbf16>, vector<8x16xf32> -> vector<8x16xf32>
    %162 = arith.truncf %161 : vector<8x16xf32> to vector<8x16xbf16>
    %c120 = arith.constant 120 : index
    %c0_155 = arith.constant 0 : index
    %163 = vector.load %arg20[%c120, %c0_155] : memref<128x16xbf16, #tpu.memory_space<vmem>>, vector<8x16xbf16>
    tpu.vector_store %arg20[%c120, %c0_155], %162 {strides = array<i32>} : memref<128x16xbf16, #tpu.memory_space<vmem>>, vector<8x16xbf16>,
    %c0_156 = arith.constant 0 : index
    %c0_157 = arith.constant 0 : index
    %164 = vector.load %arg7[%c0_156, %c0_157] : memref<16x128xbf16, #tpu.memory_space<vmem>>, vector<16x128xbf16>
    %c0_158 = arith.constant 0 : index
    %c0_159 = arith.constant 0 : index
    %165 = vector.load %arg20[%c0_158, %c0_159] : memref<128x16xbf16, #tpu.memory_space<vmem>>, vector<128x16xbf16>
    %cst_160 = arith.constant dense<0.000000e+00> : vector<16x16xf32>
    %166 = tpu.matmul %164, %165, %cst_160 {dimension_numbers = #tpu.dot_dimension_numbers<[1], [0], [0], [1], [0, 0, 1, 1], [], []>} : vector<16x128xbf16>, vector<128x16xbf16>, vector<16x16xf32> -> vector<16x16xf32>
    %c0_161 = arith.constant 0 : index
    %c0_162 = arith.constant 0 : index
    %167 = vector.load %arg8[%c0_161, %c0_162] : memref<16x1xf32, #tpu.memory_space<vmem>>, vector<16x1xf32>
    %168 = vector.broadcast %167 : vector<16x1xf32> to vector<16x16xf32>
    %169 = arith.addf %166, %168 : vector<16x16xf32>
    %cst_163 = arith.constant 0.000000e+00 : f32
    %170 = vector.broadcast %cst_163 : f32 to vector<16x16xf32>
    %171 = arith.maximumf %169, %170 : vector<16x16xf32>
    %c0_164 = arith.constant 0 : index
    %c0_165 = arith.constant 0 : index
    %172 = vector.load %arg9[%c0_164, %c0_165] : memref<16x16xbf16, #tpu.memory_space<vmem>>, vector<16x16xbf16>
    %173 = arith.truncf %171 : vector<16x16xf32> to vector<16x16xbf16>
    %cst_166 = arith.constant dense<0.000000e+00> : vector<16x16xf32>
    %174 = tpu.matmul %172, %173, %cst_166 {dimension_numbers = #tpu.dot_dimension_numbers<[1], [0], [0], [1], [0, 0, 1, 1], [], []>} : vector<16x16xbf16>, vector<16x16xbf16>, vector<16x16xf32> -> vector<16x16xf32>
    %c0_167 = arith.constant 0 : index
    %c0_168 = arith.constant 0 : index
    %175 = vector.load %arg10[%c0_167, %c0_168] : memref<16x1xf32, #tpu.memory_space<vmem>>, vector<16x1xf32>
    %176 = vector.broadcast %175 : vector<16x1xf32> to vector<16x16xf32>
    %177 = arith.addf %174, %176 : vector<16x16xf32>
    %c0_169 = arith.constant 0 : index
    %c0_170 = arith.constant 0 : index
    %c0_171 = arith.constant 0 : index
    %178 = vector.load %arg18[%c0_169, %c0_170, %c0_171] : memref<1x16x16xf32, #tpu.memory_space<vmem>>, vector<1x16x16xf32>
    %179 = vector.shape_cast %178 : vector<1x16x16xf32> to vector<16x16xf32>
    %180 = vector.shape_cast %177 : vector<16x16xf32> to vector<1x16x16xf32>
    tpu.vector_store %arg18[%c0_169, %c0_170, %c0_171], %180 {strides = array<i32>} : memref<1x16x16xf32, #tpu.memory_space<vmem>>, vector<1x16x16xf32>,
    %181 = vector.extract_strided_slice %177 {offsets = [0, 0], sizes = [8, 16], strides = [1, 1]} : vector<16x16xf32> to vector<8x16xf32>
    %182 = vector.extract_strided_slice %177 {offsets = [8, 0], sizes = [8, 16], strides = [1, 1]} : vector<16x16xf32> to vector<8x16xf32>
    %c0_172 = arith.constant 0 : index
    %c0_173 = arith.constant 0 : index
    %c0_174 = arith.constant 0 : index
    %183 = vector.load %arg2[%c0_172, %c0_173, %c0_174] : memref<1x8x16xf32, #tpu.memory_space<vmem>>, vector<1x8x16xf32>
    %184 = vector.shape_cast %183 : vector<1x8x16xf32> to vector<8x16xf32>
    %cst_175 = arith.constant 5.000000e-01 : f32
    %185 = vector.broadcast %cst_175 : f32 to vector<8x16xf32>
    %186 = arith.mulf %185, %182 : vector<8x16xf32>
    %187 = math.exp %186 : vector<8x16xf32>
    %188 = arith.mulf %184, %187 : vector<8x16xf32>
    %189 = arith.addf %181, %188 : vector<8x16xf32>
    %190 = arith.truncf %189 : vector<8x16xf32> to vector<8x16xbf16>
    %c0_176 = arith.constant 0 : index
    %c0_177 = arith.constant 0 : index
    %c0_178 = arith.constant 0 : index
    %191 = vector.load %arg11[%c0_176, %c0_177, %c0_178] : memref<16x16x64xbf16, #tpu.memory_space<vmem>>, vector<1x16x64xbf16>
    %192 = vector.shape_cast %191 : vector<1x16x64xbf16> to vector<16x64xbf16>
    %cst_179 = arith.constant dense<0.000000e+00> : vector<8x64xf32>
    %193 = tpu.matmul %190, %192, %cst_179 {dimension_numbers = #tpu.dot_dimension_numbers<[1], [0], [0], [1], [0, 0, 1, 1], [], []>} : vector<8x16xbf16>, vector<16x64xbf16>, vector<8x64xf32> -> vector<8x64xf32>
    %194 = arith.truncf %193 : vector<8x64xf32> to vector<8x64xbf16>
    %c0_180 = arith.constant 0 : index
    %c0_181 = arith.constant 0 : index
    %195 = vector.load %arg21[%c0_180, %c0_181] : memref<128x64xbf16, #tpu.memory_space<vmem>>, vector<8x64xbf16>
    tpu.vector_store %arg21[%c0_180, %c0_181], %194 {strides = array<i32>} : memref<128x64xbf16, #tpu.memory_space<vmem>>, vector<8x64xbf16>,
    %c1_182 = arith.constant 1 : index
    %c0_183 = arith.constant 0 : index
    %c0_184 = arith.constant 0 : index
    %196 = vector.load %arg11[%c1_182, %c0_183, %c0_184] : memref<16x16x64xbf16, #tpu.memory_space<vmem>>, vector<1x16x64xbf16>
    %197 = vector.shape_cast %196 : vector<1x16x64xbf16> to vector<16x64xbf16>
    %cst_185 = arith.constant dense<0.000000e+00> : vector<8x64xf32>
    %198 = tpu.matmul %190, %197, %cst_185 {dimension_numbers = #tpu.dot_dimension_numbers<[1], [0], [0], [1], [0, 0, 1, 1], [], []>} : vector<8x16xbf16>, vector<16x64xbf16>, vector<8x64xf32> -> vector<8x64xf32>
    %199 = arith.truncf %198 : vector<8x64xf32> to vector<8x64xbf16>
    %c8_186 = arith.constant 8 : index
    %c0_187 = arith.constant 0 : index
    %200 = vector.load %arg21[%c8_186, %c0_187] : memref<128x64xbf16, #tpu.memory_space<vmem>>, vector<8x64xbf16>
    tpu.vector_store %arg21[%c8_186, %c0_187], %199 {strides = array<i32>} : memref<128x64xbf16, #tpu.memory_space<vmem>>, vector<8x64xbf16>,
    %c2_188 = arith.constant 2 : index
    %c0_189 = arith.constant 0 : index
    %c0_190 = arith.constant 0 : index
    %201 = vector.load %arg11[%c2_188, %c0_189, %c0_190] : memref<16x16x64xbf16, #tpu.memory_space<vmem>>, vector<1x16x64xbf16>
    %202 = vector.shape_cast %201 : vector<1x16x64xbf16> to vector<16x64xbf16>
    %cst_191 = arith.constant dense<0.000000e+00> : vector<8x64xf32>
    %203 = tpu.matmul %190, %202, %cst_191 {dimension_numbers = #tpu.dot_dimension_numbers<[1], [0], [0], [1], [0, 0, 1, 1], [], []>} : vector<8x16xbf16>, vector<16x64xbf16>, vector<8x64xf32> -> vector<8x64xf32>
    %204 = arith.truncf %203 : vector<8x64xf32> to vector<8x64xbf16>
    %c16_192 = arith.constant 16 : index
    %c0_193 = arith.constant 0 : index
    %205 = vector.load %arg21[%c16_192, %c0_193] : memref<128x64xbf16, #tpu.memory_space<vmem>>, vector<8x64xbf16>
    tpu.vector_store %arg21[%c16_192, %c0_193], %204 {strides = array<i32>} : memref<128x64xbf16, #tpu.memory_space<vmem>>, vector<8x64xbf16>,
    %c3_194 = arith.constant 3 : index
    %c0_195 = arith.constant 0 : index
    %c0_196 = arith.constant 0 : index
    %206 = vector.load %arg11[%c3_194, %c0_195, %c0_196] : memref<16x16x64xbf16, #tpu.memory_space<vmem>>, vector<1x16x64xbf16>
    %207 = vector.shape_cast %206 : vector<1x16x64xbf16> to vector<16x64xbf16>
    %cst_197 = arith.constant dense<0.000000e+00> : vector<8x64xf32>
    %208 = tpu.matmul %190, %207, %cst_197 {dimension_numbers = #tpu.dot_dimension_numbers<[1], [0], [0], [1], [0, 0, 1, 1], [], []>} : vector<8x16xbf16>, vector<16x64xbf16>, vector<8x64xf32> -> vector<8x64xf32>
    %209 = arith.truncf %208 : vector<8x64xf32> to vector<8x64xbf16>
    %c24_198 = arith.constant 24 : index
    %c0_199 = arith.constant 0 : index
    %210 = vector.load %arg21[%c24_198, %c0_199] : memref<128x64xbf16, #tpu.memory_space<vmem>>, vector<8x64xbf16>
    tpu.vector_store %arg21[%c24_198, %c0_199], %209 {strides = array<i32>} : memref<128x64xbf16, #tpu.memory_space<vmem>>, vector<8x64xbf16>,
    %c4_200 = arith.constant 4 : index
    %c0_201 = arith.constant 0 : index
    %c0_202 = arith.constant 0 : index
    %211 = vector.load %arg11[%c4_200, %c0_201, %c0_202] : memref<16x16x64xbf16, #tpu.memory_space<vmem>>, vector<1x16x64xbf16>
    %212 = vector.shape_cast %211 : vector<1x16x64xbf16> to vector<16x64xbf16>
    %cst_203 = arith.constant dense<0.000000e+00> : vector<8x64xf32>
    %213 = tpu.matmul %190, %212, %cst_203 {dimension_numbers = #tpu.dot_dimension_numbers<[1], [0], [0], [1], [0, 0, 1, 1], [], []>} : vector<8x16xbf16>, vector<16x64xbf16>, vector<8x64xf32> -> vector<8x64xf32>
    %214 = arith.truncf %213 : vector<8x64xf32> to vector<8x64xbf16>
    %c32_204 = arith.constant 32 : index
    %c0_205 = arith.constant 0 : index
    %215 = vector.load %arg21[%c32_204, %c0_205] : memref<128x64xbf16, #tpu.memory_space<vmem>>, vector<8x64xbf16>
    tpu.vector_store %arg21[%c32_204, %c0_205], %214 {strides = array<i32>} : memref<128x64xbf16, #tpu.memory_space<vmem>>, vector<8x64xbf16>,
    %c5_206 = arith.constant 5 : index
    %c0_207 = arith.constant 0 : index
    %c0_208 = arith.constant 0 : index
    %216 = vector.load %arg11[%c5_206, %c0_207, %c0_208] : memref<16x16x64xbf16, #tpu.memory_space<vmem>>, vector<1x16x64xbf16>
    %217 = vector.shape_cast %216 : vector<1x16x64xbf16> to vector<16x64xbf16>
    %cst_209 = arith.constant dense<0.000000e+00> : vector<8x64xf32>
    %218 = tpu.matmul %190, %217, %cst_209 {dimension_numbers = #tpu.dot_dimension_numbers<[1], [0], [0], [1], [0, 0, 1, 1], [], []>} : vector<8x16xbf16>, vector<16x64xbf16>, vector<8x64xf32> -> vector<8x64xf32>
    %219 = arith.truncf %218 : vector<8x64xf32> to vector<8x64xbf16>
    %c40_210 = arith.constant 40 : index
    %c0_211 = arith.constant 0 : index
    %220 = vector.load %arg21[%c40_210, %c0_211] : memref<128x64xbf16, #tpu.memory_space<vmem>>, vector<8x64xbf16>
    tpu.vector_store %arg21[%c40_210, %c0_211], %219 {strides = array<i32>} : memref<128x64xbf16, #tpu.memory_space<vmem>>, vector<8x64xbf16>,
    %c6_212 = arith.constant 6 : index
    %c0_213 = arith.constant 0 : index
    %c0_214 = arith.constant 0 : index
    %221 = vector.load %arg11[%c6_212, %c0_213, %c0_214] : memref<16x16x64xbf16, #tpu.memory_space<vmem>>, vector<1x16x64xbf16>
    %222 = vector.shape_cast %221 : vector<1x16x64xbf16> to vector<16x64xbf16>
    %cst_215 = arith.constant dense<0.000000e+00> : vector<8x64xf32>
    %223 = tpu.matmul %190, %222, %cst_215 {dimension_numbers = #tpu.dot_dimension_numbers<[1], [0], [0], [1], [0, 0, 1, 1], [], []>} : vector<8x16xbf16>, vector<16x64xbf16>, vector<8x64xf32> -> vector<8x64xf32>
    %224 = arith.truncf %223 : vector<8x64xf32> to vector<8x64xbf16>
    %c48_216 = arith.constant 48 : index
    %c0_217 = arith.constant 0 : index
    %225 = vector.load %arg21[%c48_216, %c0_217] : memref<128x64xbf16, #tpu.memory_space<vmem>>, vector<8x64xbf16>
    tpu.vector_store %arg21[%c48_216, %c0_217], %224 {strides = array<i32>} : memref<128x64xbf16, #tpu.memory_space<vmem>>, vector<8x64xbf16>,
    %c7_218 = arith.constant 7 : index
    %c0_219 = arith.constant 0 : index
    %c0_220 = arith.constant 0 : index
    %226 = vector.load %arg11[%c7_218, %c0_219, %c0_220] : memref<16x16x64xbf16, #tpu.memory_space<vmem>>, vector<1x16x64xbf16>
    %227 = vector.shape_cast %226 : vector<1x16x64xbf16> to vector<16x64xbf16>
    %cst_221 = arith.constant dense<0.000000e+00> : vector<8x64xf32>
    %228 = tpu.matmul %190, %227, %cst_221 {dimension_numbers = #tpu.dot_dimension_numbers<[1], [0], [0], [1], [0, 0, 1, 1], [], []>} : vector<8x16xbf16>, vector<16x64xbf16>, vector<8x64xf32> -> vector<8x64xf32>
    %229 = arith.truncf %228 : vector<8x64xf32> to vector<8x64xbf16>
    %c56_222 = arith.constant 56 : index
    %c0_223 = arith.constant 0 : index
    %230 = vector.load %arg21[%c56_222, %c0_223] : memref<128x64xbf16, #tpu.memory_space<vmem>>, vector<8x64xbf16>
    tpu.vector_store %arg21[%c56_222, %c0_223], %229 {strides = array<i32>} : memref<128x64xbf16, #tpu.memory_space<vmem>>, vector<8x64xbf16>,
    %c8_224 = arith.constant 8 : index
    %c0_225 = arith.constant 0 : index
    %c0_226 = arith.constant 0 : index
    %231 = vector.load %arg11[%c8_224, %c0_225, %c0_226] : memref<16x16x64xbf16, #tpu.memory_space<vmem>>, vector<1x16x64xbf16>
    %232 = vector.shape_cast %231 : vector<1x16x64xbf16> to vector<16x64xbf16>
    %cst_227 = arith.constant dense<0.000000e+00> : vector<8x64xf32>
    %233 = tpu.matmul %190, %232, %cst_227 {dimension_numbers = #tpu.dot_dimension_numbers<[1], [0], [0], [1], [0, 0, 1, 1], [], []>} : vector<8x16xbf16>, vector<16x64xbf16>, vector<8x64xf32> -> vector<8x64xf32>
    %234 = arith.truncf %233 : vector<8x64xf32> to vector<8x64xbf16>
    %c64_228 = arith.constant 64 : index
    %c0_229 = arith.constant 0 : index
    %235 = vector.load %arg21[%c64_228, %c0_229] : memref<128x64xbf16, #tpu.memory_space<vmem>>, vector<8x64xbf16>
    tpu.vector_store %arg21[%c64_228, %c0_229], %234 {strides = array<i32>} : memref<128x64xbf16, #tpu.memory_space<vmem>>, vector<8x64xbf16>,
    %c9_230 = arith.constant 9 : index
    %c0_231 = arith.constant 0 : index
    %c0_232 = arith.constant 0 : index
    %236 = vector.load %arg11[%c9_230, %c0_231, %c0_232] : memref<16x16x64xbf16, #tpu.memory_space<vmem>>, vector<1x16x64xbf16>
    %237 = vector.shape_cast %236 : vector<1x16x64xbf16> to vector<16x64xbf16>
    %cst_233 = arith.constant dense<0.000000e+00> : vector<8x64xf32>
    %238 = tpu.matmul %190, %237, %cst_233 {dimension_numbers = #tpu.dot_dimension_numbers<[1], [0], [0], [1], [0, 0, 1, 1], [], []>} : vector<8x16xbf16>, vector<16x64xbf16>, vector<8x64xf32> -> vector<8x64xf32>
    %239 = arith.truncf %238 : vector<8x64xf32> to vector<8x64xbf16>
    %c72_234 = arith.constant 72 : index
    %c0_235 = arith.constant 0 : index
    %240 = vector.load %arg21[%c72_234, %c0_235] : memref<128x64xbf16, #tpu.memory_space<vmem>>, vector<8x64xbf16>
    tpu.vector_store %arg21[%c72_234, %c0_235], %239 {strides = array<i32>} : memref<128x64xbf16, #tpu.memory_space<vmem>>, vector<8x64xbf16>,
    %c10_236 = arith.constant 10 : index
    %c0_237 = arith.constant 0 : index
    %c0_238 = arith.constant 0 : index
    %241 = vector.load %arg11[%c10_236, %c0_237, %c0_238] : memref<16x16x64xbf16, #tpu.memory_space<vmem>>, vector<1x16x64xbf16>
    %242 = vector.shape_cast %241 : vector<1x16x64xbf16> to vector<16x64xbf16>
    %cst_239 = arith.constant dense<0.000000e+00> : vector<8x64xf32>
    %243 = tpu.matmul %190, %242, %cst_239 {dimension_numbers = #tpu.dot_dimension_numbers<[1], [0], [0], [1], [0, 0, 1, 1], [], []>} : vector<8x16xbf16>, vector<16x64xbf16>, vector<8x64xf32> -> vector<8x64xf32>
    %244 = arith.truncf %243 : vector<8x64xf32> to vector<8x64xbf16>
    %c80_240 = arith.constant 80 : index
    %c0_241 = arith.constant 0 : index
    %245 = vector.load %arg21[%c80_240, %c0_241] : memref<128x64xbf16, #tpu.memory_space<vmem>>, vector<8x64xbf16>
    tpu.vector_store %arg21[%c80_240, %c0_241], %244 {strides = array<i32>} : memref<128x64xbf16, #tpu.memory_space<vmem>>, vector<8x64xbf16>,
    %c11_242 = arith.constant 11 : index
    %c0_243 = arith.constant 0 : index
    %c0_244 = arith.constant 0 : index
    %246 = vector.load %arg11[%c11_242, %c0_243, %c0_244] : memref<16x16x64xbf16, #tpu.memory_space<vmem>>, vector<1x16x64xbf16>
    %247 = vector.shape_cast %246 : vector<1x16x64xbf16> to vector<16x64xbf16>
    %cst_245 = arith.constant dense<0.000000e+00> : vector<8x64xf32>
    %248 = tpu.matmul %190, %247, %cst_245 {dimension_numbers = #tpu.dot_dimension_numbers<[1], [0], [0], [1], [0, 0, 1, 1], [], []>} : vector<8x16xbf16>, vector<16x64xbf16>, vector<8x64xf32> -> vector<8x64xf32>
    %249 = arith.truncf %248 : vector<8x64xf32> to vector<8x64xbf16>
    %c88_246 = arith.constant 88 : index
    %c0_247 = arith.constant 0 : index
    %250 = vector.load %arg21[%c88_246, %c0_247] : memref<128x64xbf16, #tpu.memory_space<vmem>>, vector<8x64xbf16>
    tpu.vector_store %arg21[%c88_246, %c0_247], %249 {strides = array<i32>} : memref<128x64xbf16, #tpu.memory_space<vmem>>, vector<8x64xbf16>,
    %c12_248 = arith.constant 12 : index
    %c0_249 = arith.constant 0 : index
    %c0_250 = arith.constant 0 : index
    %251 = vector.load %arg11[%c12_248, %c0_249, %c0_250] : memref<16x16x64xbf16, #tpu.memory_space<vmem>>, vector<1x16x64xbf16>
    %252 = vector.shape_cast %251 : vector<1x16x64xbf16> to vector<16x64xbf16>
    %cst_251 = arith.constant dense<0.000000e+00> : vector<8x64xf32>
    %253 = tpu.matmul %190, %252, %cst_251 {dimension_numbers = #tpu.dot_dimension_numbers<[1], [0], [0], [1], [0, 0, 1, 1], [], []>} : vector<8x16xbf16>, vector<16x64xbf16>, vector<8x64xf32> -> vector<8x64xf32>
    %254 = arith.truncf %253 : vector<8x64xf32> to vector<8x64xbf16>
    %c96_252 = arith.constant 96 : index
    %c0_253 = arith.constant 0 : index
    %255 = vector.load %arg21[%c96_252, %c0_253] : memref<128x64xbf16, #tpu.memory_space<vmem>>, vector<8x64xbf16>
    tpu.vector_store %arg21[%c96_252, %c0_253], %254 {strides = array<i32>} : memref<128x64xbf16, #tpu.memory_space<vmem>>, vector<8x64xbf16>,
    %c13_254 = arith.constant 13 : index
    %c0_255 = arith.constant 0 : index
    %c0_256 = arith.constant 0 : index
    %256 = vector.load %arg11[%c13_254, %c0_255, %c0_256] : memref<16x16x64xbf16, #tpu.memory_space<vmem>>, vector<1x16x64xbf16>
    %257 = vector.shape_cast %256 : vector<1x16x64xbf16> to vector<16x64xbf16>
    %cst_257 = arith.constant dense<0.000000e+00> : vector<8x64xf32>
    %258 = tpu.matmul %190, %257, %cst_257 {dimension_numbers = #tpu.dot_dimension_numbers<[1], [0], [0], [1], [0, 0, 1, 1], [], []>} : vector<8x16xbf16>, vector<16x64xbf16>, vector<8x64xf32> -> vector<8x64xf32>
    %259 = arith.truncf %258 : vector<8x64xf32> to vector<8x64xbf16>
    %c104_258 = arith.constant 104 : index
    %c0_259 = arith.constant 0 : index
    %260 = vector.load %arg21[%c104_258, %c0_259] : memref<128x64xbf16, #tpu.memory_space<vmem>>, vector<8x64xbf16>
    tpu.vector_store %arg21[%c104_258, %c0_259], %259 {strides = array<i32>} : memref<128x64xbf16, #tpu.memory_space<vmem>>, vector<8x64xbf16>,
    %c14_260 = arith.constant 14 : index
    %c0_261 = arith.constant 0 : index
    %c0_262 = arith.constant 0 : index
    %261 = vector.load %arg11[%c14_260, %c0_261, %c0_262] : memref<16x16x64xbf16, #tpu.memory_space<vmem>>, vector<1x16x64xbf16>
    %262 = vector.shape_cast %261 : vector<1x16x64xbf16> to vector<16x64xbf16>
    %cst_263 = arith.constant dense<0.000000e+00> : vector<8x64xf32>
    %263 = tpu.matmul %190, %262, %cst_263 {dimension_numbers = #tpu.dot_dimension_numbers<[1], [0], [0], [1], [0, 0, 1, 1], [], []>} : vector<8x16xbf16>, vector<16x64xbf16>, vector<8x64xf32> -> vector<8x64xf32>
    %264 = arith.truncf %263 : vector<8x64xf32> to vector<8x64xbf16>
    %c112_264 = arith.constant 112 : index
    %c0_265 = arith.constant 0 : index
    %265 = vector.load %arg21[%c112_264, %c0_265] : memref<128x64xbf16, #tpu.memory_space<vmem>>, vector<8x64xbf16>
    tpu.vector_store %arg21[%c112_264, %c0_265], %264 {strides = array<i32>} : memref<128x64xbf16, #tpu.memory_space<vmem>>, vector<8x64xbf16>,
    %c15_266 = arith.constant 15 : index
    %c0_267 = arith.constant 0 : index
    %c0_268 = arith.constant 0 : index
    %266 = vector.load %arg11[%c15_266, %c0_267, %c0_268] : memref<16x16x64xbf16, #tpu.memory_space<vmem>>, vector<1x16x64xbf16>
    %267 = vector.shape_cast %266 : vector<1x16x64xbf16> to vector<16x64xbf16>
    %cst_269 = arith.constant dense<0.000000e+00> : vector<8x64xf32>
    %268 = tpu.matmul %190, %267, %cst_269 {dimension_numbers = #tpu.dot_dimension_numbers<[1], [0], [0], [1], [0, 0, 1, 1], [], []>} : vector<8x16xbf16>, vector<16x64xbf16>, vector<8x64xf32> -> vector<8x64xf32>
    %269 = arith.truncf %268 : vector<8x64xf32> to vector<8x64xbf16>
    %c120_270 = arith.constant 120 : index
    %c0_271 = arith.constant 0 : index
    %270 = vector.load %arg21[%c120_270, %c0_271] : memref<128x64xbf16, #tpu.memory_space<vmem>>, vector<8x64xbf16>
    tpu.vector_store %arg21[%c120_270, %c0_271], %269 {strides = array<i32>} : memref<128x64xbf16, #tpu.memory_space<vmem>>, vector<8x64xbf16>,
    %c0_272 = arith.constant 0 : index
    %c0_273 = arith.constant 0 : index
    %271 = vector.load %arg12[%c0_272, %c0_273] : memref<8x128xbf16, #tpu.memory_space<vmem>>, vector<8x128xbf16>
    %c0_274 = arith.constant 0 : index
    %c0_275 = arith.constant 0 : index
    %272 = vector.load %arg21[%c0_274, %c0_275] : memref<128x64xbf16, #tpu.memory_space<vmem>>, vector<128x64xbf16>
    %cst_276 = arith.constant dense<0.000000e+00> : vector<8x64xf32>
    %273 = tpu.matmul %271, %272, %cst_276 {dimension_numbers = #tpu.dot_dimension_numbers<[1], [0], [0], [1], [0, 0, 1, 1], [], []>} : vector<8x128xbf16>, vector<128x64xbf16>, vector<8x64xf32> -> vector<8x64xf32>
    %c0_277 = arith.constant 0 : index
    %c0_278 = arith.constant 0 : index
    %274 = vector.load %arg13[%c0_277, %c0_278] : memref<8x1xf32, #tpu.memory_space<vmem>>, vector<8x1xf32>
    %275 = vector.broadcast %274 : vector<8x1xf32> to vector<8x64xf32>
    %276 = arith.addf %273, %275 : vector<8x64xf32>
    %cst_279 = arith.constant 0.000000e+00 : f32
    %277 = vector.broadcast %cst_279 : f32 to vector<8x64xf32>
    %278 = arith.maximumf %276, %277 : vector<8x64xf32>
    %279 = arith.truncf %278 : vector<8x64xf32> to vector<8x64xbf16>
    %c0_280 = arith.constant 0 : index
    %c0_281 = arith.constant 0 : index
    %c0_282 = arith.constant 0 : index
    %280 = vector.load %arg14[%c0_280, %c0_281, %c0_282] : memref<16x64x256xbf16, #tpu.memory_space<vmem>>, vector<1x64x256xbf16>
    %281 = vector.shape_cast %280 : vector<1x64x256xbf16> to vector<64x256xbf16>
    %cst_283 = arith.constant dense<0.000000e+00> : vector<8x256xf32>
    %282 = tpu.matmul %279, %281, %cst_283 {dimension_numbers = #tpu.dot_dimension_numbers<[1], [0], [0], [1], [0, 0, 1, 1], [], []>} : vector<8x64xbf16>, vector<64x256xbf16>, vector<8x256xf32> -> vector<8x256xf32>
    %283 = arith.truncf %282 : vector<8x256xf32> to vector<8x256xbf16>
    %c0_284 = arith.constant 0 : index
    %c0_285 = arith.constant 0 : index
    %284 = vector.load %arg22[%c0_284, %c0_285] : memref<128x256xbf16, #tpu.memory_space<vmem>>, vector<8x256xbf16>
    tpu.vector_store %arg22[%c0_284, %c0_285], %283 {strides = array<i32>} : memref<128x256xbf16, #tpu.memory_space<vmem>>, vector<8x256xbf16>,
    %c1_286 = arith.constant 1 : index
    %c0_287 = arith.constant 0 : index
    %c0_288 = arith.constant 0 : index
    %285 = vector.load %arg14[%c1_286, %c0_287, %c0_288] : memref<16x64x256xbf16, #tpu.memory_space<vmem>>, vector<1x64x256xbf16>
    %286 = vector.shape_cast %285 : vector<1x64x256xbf16> to vector<64x256xbf16>
    %cst_289 = arith.constant dense<0.000000e+00> : vector<8x256xf32>
    %287 = tpu.matmul %279, %286, %cst_289 {dimension_numbers = #tpu.dot_dimension_numbers<[1], [0], [0], [1], [0, 0, 1, 1], [], []>} : vector<8x64xbf16>, vector<64x256xbf16>, vector<8x256xf32> -> vector<8x256xf32>
    %288 = arith.truncf %287 : vector<8x256xf32> to vector<8x256xbf16>
    %c8_290 = arith.constant 8 : index
    %c0_291 = arith.constant 0 : index
    %289 = vector.load %arg22[%c8_290, %c0_291] : memref<128x256xbf16, #tpu.memory_space<vmem>>, vector<8x256xbf16>
    tpu.vector_store %arg22[%c8_290, %c0_291], %288 {strides = array<i32>} : memref<128x256xbf16, #tpu.memory_space<vmem>>, vector<8x256xbf16>,
    %c2_292 = arith.constant 2 : index
    %c0_293 = arith.constant 0 : index
    %c0_294 = arith.constant 0 : index
    %290 = vector.load %arg14[%c2_292, %c0_293, %c0_294] : memref<16x64x256xbf16, #tpu.memory_space<vmem>>, vector<1x64x256xbf16>
    %291 = vector.shape_cast %290 : vector<1x64x256xbf16> to vector<64x256xbf16>
    %cst_295 = arith.constant dense<0.000000e+00> : vector<8x256xf32>
    %292 = tpu.matmul %279, %291, %cst_295 {dimension_numbers = #tpu.dot_dimension_numbers<[1], [0], [0], [1], [0, 0, 1, 1], [], []>} : vector<8x64xbf16>, vector<64x256xbf16>, vector<8x256xf32> -> vector<8x256xf32>
    %293 = arith.truncf %292 : vector<8x256xf32> to vector<8x256xbf16>
    %c16_296 = arith.constant 16 : index
    %c0_297 = arith.constant 0 : index
    %294 = vector.load %arg22[%c16_296, %c0_297] : memref<128x256xbf16, #tpu.memory_space<vmem>>, vector<8x256xbf16>
    tpu.vector_store %arg22[%c16_296, %c0_297], %293 {strides = array<i32>} : memref<128x256xbf16, #tpu.memory_space<vmem>>, vector<8x256xbf16>,
    %c3_298 = arith.constant 3 : index
    %c0_299 = arith.constant 0 : index
    %c0_300 = arith.constant 0 : index
    %295 = vector.load %arg14[%c3_298, %c0_299, %c0_300] : memref<16x64x256xbf16, #tpu.memory_space<vmem>>, vector<1x64x256xbf16>
    %296 = vector.shape_cast %295 : vector<1x64x256xbf16> to vector<64x256xbf16>
    %cst_301 = arith.constant dense<0.000000e+00> : vector<8x256xf32>
    %297 = tpu.matmul %279, %296, %cst_301 {dimension_numbers = #tpu.dot_dimension_numbers<[1], [0], [0], [1], [0, 0, 1, 1], [], []>} : vector<8x64xbf16>, vector<64x256xbf16>, vector<8x256xf32> -> vector<8x256xf32>
    %298 = arith.truncf %297 : vector<8x256xf32> to vector<8x256xbf16>
    %c24_302 = arith.constant 24 : index
    %c0_303 = arith.constant 0 : index
    %299 = vector.load %arg22[%c24_302, %c0_303] : memref<128x256xbf16, #tpu.memory_space<vmem>>, vector<8x256xbf16>
    tpu.vector_store %arg22[%c24_302, %c0_303], %298 {strides = array<i32>} : memref<128x256xbf16, #tpu.memory_space<vmem>>, vector<8x256xbf16>,
    %c4_304 = arith.constant 4 : index
    %c0_305 = arith.constant 0 : index
    %c0_306 = arith.constant 0 : index
    %300 = vector.load %arg14[%c4_304, %c0_305, %c0_306] : memref<16x64x256xbf16, #tpu.memory_space<vmem>>, vector<1x64x256xbf16>
    %301 = vector.shape_cast %300 : vector<1x64x256xbf16> to vector<64x256xbf16>
    %cst_307 = arith.constant dense<0.000000e+00> : vector<8x256xf32>
    %302 = tpu.matmul %279, %301, %cst_307 {dimension_numbers = #tpu.dot_dimension_numbers<[1], [0], [0], [1], [0, 0, 1, 1], [], []>} : vector<8x64xbf16>, vector<64x256xbf16>, vector<8x256xf32> -> vector<8x256xf32>
    %303 = arith.truncf %302 : vector<8x256xf32> to vector<8x256xbf16>
    %c32_308 = arith.constant 32 : index
    %c0_309 = arith.constant 0 : index
    %304 = vector.load %arg22[%c32_308, %c0_309] : memref<128x256xbf16, #tpu.memory_space<vmem>>, vector<8x256xbf16>
    tpu.vector_store %arg22[%c32_308, %c0_309], %303 {strides = array<i32>} : memref<128x256xbf16, #tpu.memory_space<vmem>>, vector<8x256xbf16>,
    %c5_310 = arith.constant 5 : index
    %c0_311 = arith.constant 0 : index
    %c0_312 = arith.constant 0 : index
    %305 = vector.load %arg14[%c5_310, %c0_311, %c0_312] : memref<16x64x256xbf16, #tpu.memory_space<vmem>>, vector<1x64x256xbf16>
    %306 = vector.shape_cast %305 : vector<1x64x256xbf16> to vector<64x256xbf16>
    %cst_313 = arith.constant dense<0.000000e+00> : vector<8x256xf32>
    %307 = tpu.matmul %279, %306, %cst_313 {dimension_numbers = #tpu.dot_dimension_numbers<[1], [0], [0], [1], [0, 0, 1, 1], [], []>} : vector<8x64xbf16>, vector<64x256xbf16>, vector<8x256xf32> -> vector<8x256xf32>
    %308 = arith.truncf %307 : vector<8x256xf32> to vector<8x256xbf16>
    %c40_314 = arith.constant 40 : index
    %c0_315 = arith.constant 0 : index
    %309 = vector.load %arg22[%c40_314, %c0_315] : memref<128x256xbf16, #tpu.memory_space<vmem>>, vector<8x256xbf16>
    tpu.vector_store %arg22[%c40_314, %c0_315], %308 {strides = array<i32>} : memref<128x256xbf16, #tpu.memory_space<vmem>>, vector<8x256xbf16>,
    %c6_316 = arith.constant 6 : index
    %c0_317 = arith.constant 0 : index
    %c0_318 = arith.constant 0 : index
    %310 = vector.load %arg14[%c6_316, %c0_317, %c0_318] : memref<16x64x256xbf16, #tpu.memory_space<vmem>>, vector<1x64x256xbf16>
    %311 = vector.shape_cast %310 : vector<1x64x256xbf16> to vector<64x256xbf16>
    %cst_319 = arith.constant dense<0.000000e+00> : vector<8x256xf32>
    %312 = tpu.matmul %279, %311, %cst_319 {dimension_numbers = #tpu.dot_dimension_numbers<[1], [0], [0], [1], [0, 0, 1, 1], [], []>} : vector<8x64xbf16>, vector<64x256xbf16>, vector<8x256xf32> -> vector<8x256xf32>
    %313 = arith.truncf %312 : vector<8x256xf32> to vector<8x256xbf16>
    %c48_320 = arith.constant 48 : index
    %c0_321 = arith.constant 0 : index
    %314 = vector.load %arg22[%c48_320, %c0_321] : memref<128x256xbf16, #tpu.memory_space<vmem>>, vector<8x256xbf16>
    tpu.vector_store %arg22[%c48_320, %c0_321], %313 {strides = array<i32>} : memref<128x256xbf16, #tpu.memory_space<vmem>>, vector<8x256xbf16>,
    %c7_322 = arith.constant 7 : index
    %c0_323 = arith.constant 0 : index
    %c0_324 = arith.constant 0 : index
    %315 = vector.load %arg14[%c7_322, %c0_323, %c0_324] : memref<16x64x256xbf16, #tpu.memory_space<vmem>>, vector<1x64x256xbf16>
    %316 = vector.shape_cast %315 : vector<1x64x256xbf16> to vector<64x256xbf16>
    %cst_325 = arith.constant dense<0.000000e+00> : vector<8x256xf32>
    %317 = tpu.matmul %279, %316, %cst_325 {dimension_numbers = #tpu.dot_dimension_numbers<[1], [0], [0], [1], [0, 0, 1, 1], [], []>} : vector<8x64xbf16>, vector<64x256xbf16>, vector<8x256xf32> -> vector<8x256xf32>
    %318 = arith.truncf %317 : vector<8x256xf32> to vector<8x256xbf16>
    %c56_326 = arith.constant 56 : index
    %c0_327 = arith.constant 0 : index
    %319 = vector.load %arg22[%c56_326, %c0_327] : memref<128x256xbf16, #tpu.memory_space<vmem>>, vector<8x256xbf16>
    tpu.vector_store %arg22[%c56_326, %c0_327], %318 {strides = array<i32>} : memref<128x256xbf16, #tpu.memory_space<vmem>>, vector<8x256xbf16>,
    %c8_328 = arith.constant 8 : index
    %c0_329 = arith.constant 0 : index
    %c0_330 = arith.constant 0 : index
    %320 = vector.load %arg14[%c8_328, %c0_329, %c0_330] : memref<16x64x256xbf16, #tpu.memory_space<vmem>>, vector<1x64x256xbf16>
    %321 = vector.shape_cast %320 : vector<1x64x256xbf16> to vector<64x256xbf16>
    %cst_331 = arith.constant dense<0.000000e+00> : vector<8x256xf32>
    %322 = tpu.matmul %279, %321, %cst_331 {dimension_numbers = #tpu.dot_dimension_numbers<[1], [0], [0], [1], [0, 0, 1, 1], [], []>} : vector<8x64xbf16>, vector<64x256xbf16>, vector<8x256xf32> -> vector<8x256xf32>
    %323 = arith.truncf %322 : vector<8x256xf32> to vector<8x256xbf16>
    %c64_332 = arith.constant 64 : index
    %c0_333 = arith.constant 0 : index
    %324 = vector.load %arg22[%c64_332, %c0_333] : memref<128x256xbf16, #tpu.memory_space<vmem>>, vector<8x256xbf16>
    tpu.vector_store %arg22[%c64_332, %c0_333], %323 {strides = array<i32>} : memref<128x256xbf16, #tpu.memory_space<vmem>>, vector<8x256xbf16>,
    %c9_334 = arith.constant 9 : index
    %c0_335 = arith.constant 0 : index
    %c0_336 = arith.constant 0 : index
    %325 = vector.load %arg14[%c9_334, %c0_335, %c0_336] : memref<16x64x256xbf16, #tpu.memory_space<vmem>>, vector<1x64x256xbf16>
    %326 = vector.shape_cast %325 : vector<1x64x256xbf16> to vector<64x256xbf16>
    %cst_337 = arith.constant dense<0.000000e+00> : vector<8x256xf32>
    %327 = tpu.matmul %279, %326, %cst_337 {dimension_numbers = #tpu.dot_dimension_numbers<[1], [0], [0], [1], [0, 0, 1, 1], [], []>} : vector<8x64xbf16>, vector<64x256xbf16>, vector<8x256xf32> -> vector<8x256xf32>
    %328 = arith.truncf %327 : vector<8x256xf32> to vector<8x256xbf16>
    %c72_338 = arith.constant 72 : index
    %c0_339 = arith.constant 0 : index
    %329 = vector.load %arg22[%c72_338, %c0_339] : memref<128x256xbf16, #tpu.memory_space<vmem>>, vector<8x256xbf16>
    tpu.vector_store %arg22[%c72_338, %c0_339], %328 {strides = array<i32>} : memref<128x256xbf16, #tpu.memory_space<vmem>>, vector<8x256xbf16>,
    %c10_340 = arith.constant 10 : index
    %c0_341 = arith.constant 0 : index
    %c0_342 = arith.constant 0 : index
    %330 = vector.load %arg14[%c10_340, %c0_341, %c0_342] : memref<16x64x256xbf16, #tpu.memory_space<vmem>>, vector<1x64x256xbf16>
    %331 = vector.shape_cast %330 : vector<1x64x256xbf16> to vector<64x256xbf16>
    %cst_343 = arith.constant dense<0.000000e+00> : vector<8x256xf32>
    %332 = tpu.matmul %279, %331, %cst_343 {dimension_numbers = #tpu.dot_dimension_numbers<[1], [0], [0], [1], [0, 0, 1, 1], [], []>} : vector<8x64xbf16>, vector<64x256xbf16>, vector<8x256xf32> -> vector<8x256xf32>
    %333 = arith.truncf %332 : vector<8x256xf32> to vector<8x256xbf16>
    %c80_344 = arith.constant 80 : index
    %c0_345 = arith.constant 0 : index
    %334 = vector.load %arg22[%c80_344, %c0_345] : memref<128x256xbf16, #tpu.memory_space<vmem>>, vector<8x256xbf16>
    tpu.vector_store %arg22[%c80_344, %c0_345], %333 {strides = array<i32>} : memref<128x256xbf16, #tpu.memory_space<vmem>>, vector<8x256xbf16>,
    %c11_346 = arith.constant 11 : index
    %c0_347 = arith.constant 0 : index
    %c0_348 = arith.constant 0 : index
    %335 = vector.load %arg14[%c11_346, %c0_347, %c0_348] : memref<16x64x256xbf16, #tpu.memory_space<vmem>>, vector<1x64x256xbf16>
    %336 = vector.shape_cast %335 : vector<1x64x256xbf16> to vector<64x256xbf16>
    %cst_349 = arith.constant dense<0.000000e+00> : vector<8x256xf32>
    %337 = tpu.matmul %279, %336, %cst_349 {dimension_numbers = #tpu.dot_dimension_numbers<[1], [0], [0], [1], [0, 0, 1, 1], [], []>} : vector<8x64xbf16>, vector<64x256xbf16>, vector<8x256xf32> -> vector<8x256xf32>
    %338 = arith.truncf %337 : vector<8x256xf32> to vector<8x256xbf16>
    %c88_350 = arith.constant 88 : index
    %c0_351 = arith.constant 0 : index
    %339 = vector.load %arg22[%c88_350, %c0_351] : memref<128x256xbf16, #tpu.memory_space<vmem>>, vector<8x256xbf16>
    tpu.vector_store %arg22[%c88_350, %c0_351], %338 {strides = array<i32>} : memref<128x256xbf16, #tpu.memory_space<vmem>>, vector<8x256xbf16>,
    %c12_352 = arith.constant 12 : index
    %c0_353 = arith.constant 0 : index
    %c0_354 = arith.constant 0 : index
    %340 = vector.load %arg14[%c12_352, %c0_353, %c0_354] : memref<16x64x256xbf16, #tpu.memory_space<vmem>>, vector<1x64x256xbf16>
    %341 = vector.shape_cast %340 : vector<1x64x256xbf16> to vector<64x256xbf16>
    %cst_355 = arith.constant dense<0.000000e+00> : vector<8x256xf32>
    %342 = tpu.matmul %279, %341, %cst_355 {dimension_numbers = #tpu.dot_dimension_numbers<[1], [0], [0], [1], [0, 0, 1, 1], [], []>} : vector<8x64xbf16>, vector<64x256xbf16>, vector<8x256xf32> -> vector<8x256xf32>
    %343 = arith.truncf %342 : vector<8x256xf32> to vector<8x256xbf16>
    %c96_356 = arith.constant 96 : index
    %c0_357 = arith.constant 0 : index
    %344 = vector.load %arg22[%c96_356, %c0_357] : memref<128x256xbf16, #tpu.memory_space<vmem>>, vector<8x256xbf16>
    tpu.vector_store %arg22[%c96_356, %c0_357], %343 {strides = array<i32>} : memref<128x256xbf16, #tpu.memory_space<vmem>>, vector<8x256xbf16>,
    %c13_358 = arith.constant 13 : index
    %c0_359 = arith.constant 0 : index
    %c0_360 = arith.constant 0 : index
    %345 = vector.load %arg14[%c13_358, %c0_359, %c0_360] : memref<16x64x256xbf16, #tpu.memory_space<vmem>>, vector<1x64x256xbf16>
    %346 = vector.shape_cast %345 : vector<1x64x256xbf16> to vector<64x256xbf16>
    %cst_361 = arith.constant dense<0.000000e+00> : vector<8x256xf32>
    %347 = tpu.matmul %279, %346, %cst_361 {dimension_numbers = #tpu.dot_dimension_numbers<[1], [0], [0], [1], [0, 0, 1, 1], [], []>} : vector<8x64xbf16>, vector<64x256xbf16>, vector<8x256xf32> -> vector<8x256xf32>
    %348 = arith.truncf %347 : vector<8x256xf32> to vector<8x256xbf16>
    %c104_362 = arith.constant 104 : index
    %c0_363 = arith.constant 0 : index
    %349 = vector.load %arg22[%c104_362, %c0_363] : memref<128x256xbf16, #tpu.memory_space<vmem>>, vector<8x256xbf16>
    tpu.vector_store %arg22[%c104_362, %c0_363], %348 {strides = array<i32>} : memref<128x256xbf16, #tpu.memory_space<vmem>>, vector<8x256xbf16>,
    %c14_364 = arith.constant 14 : index
    %c0_365 = arith.constant 0 : index
    %c0_366 = arith.constant 0 : index
    %350 = vector.load %arg14[%c14_364, %c0_365, %c0_366] : memref<16x64x256xbf16, #tpu.memory_space<vmem>>, vector<1x64x256xbf16>
    %351 = vector.shape_cast %350 : vector<1x64x256xbf16> to vector<64x256xbf16>
    %cst_367 = arith.constant dense<0.000000e+00> : vector<8x256xf32>
    %352 = tpu.matmul %279, %351, %cst_367 {dimension_numbers = #tpu.dot_dimension_numbers<[1], [0], [0], [1], [0, 0, 1, 1], [], []>} : vector<8x64xbf16>, vector<64x256xbf16>, vector<8x256xf32> -> vector<8x256xf32>
    %353 = arith.truncf %352 : vector<8x256xf32> to vector<8x256xbf16>
    %c112_368 = arith.constant 112 : index
    %c0_369 = arith.constant 0 : index
    %354 = vector.load %arg22[%c112_368, %c0_369] : memref<128x256xbf16, #tpu.memory_space<vmem>>, vector<8x256xbf16>
    tpu.vector_store %arg22[%c112_368, %c0_369], %353 {strides = array<i32>} : memref<128x256xbf16, #tpu.memory_space<vmem>>, vector<8x256xbf16>,
    %c15_370 = arith.constant 15 : index
    %c0_371 = arith.constant 0 : index
    %c0_372 = arith.constant 0 : index
    %355 = vector.load %arg14[%c15_370, %c0_371, %c0_372] : memref<16x64x256xbf16, #tpu.memory_space<vmem>>, vector<1x64x256xbf16>
    %356 = vector.shape_cast %355 : vector<1x64x256xbf16> to vector<64x256xbf16>
    %cst_373 = arith.constant dense<0.000000e+00> : vector<8x256xf32>
    %357 = tpu.matmul %279, %356, %cst_373 {dimension_numbers = #tpu.dot_dimension_numbers<[1], [0], [0], [1], [0, 0, 1, 1], [], []>} : vector<8x64xbf16>, vector<64x256xbf16>, vector<8x256xf32> -> vector<8x256xf32>
    %358 = arith.truncf %357 : vector<8x256xf32> to vector<8x256xbf16>
    %c120_374 = arith.constant 120 : index
    %c0_375 = arith.constant 0 : index
    %359 = vector.load %arg22[%c120_374, %c0_375] : memref<128x256xbf16, #tpu.memory_space<vmem>>, vector<8x256xbf16>
    tpu.vector_store %arg22[%c120_374, %c0_375], %358 {strides = array<i32>} : memref<128x256xbf16, #tpu.memory_space<vmem>>, vector<8x256xbf16>,
    %c0_376 = arith.constant 0 : index
    %c0_377 = arith.constant 0 : index
    %360 = vector.load %arg15[%c0_376, %c0_377] : memref<4x128xbf16, #tpu.memory_space<vmem>>, vector<4x128xbf16>
    %c0_378 = arith.constant 0 : index
    %c0_379 = arith.constant 0 : index
    %361 = vector.load %arg22[%c0_378, %c0_379] : memref<128x256xbf16, #tpu.memory_space<vmem>>, vector<128x256xbf16>
    %cst_380 = arith.constant dense<0.000000e+00> : vector<4x256xf32>
    %362 = tpu.matmul %360, %361, %cst_380 {dimension_numbers = #tpu.dot_dimension_numbers<[1], [0], [0], [1], [0, 0, 1, 1], [], []>} : vector<4x128xbf16>, vector<128x256xbf16>, vector<4x256xf32> -> vector<4x256xf32>
    %c0_381 = arith.constant 0 : index
    %c0_382 = arith.constant 0 : index
    %363 = vector.load %arg16[%c0_381, %c0_382] : memref<4x1xf32, #tpu.memory_space<vmem>>, vector<4x1xf32>
    %364 = vector.broadcast %363 : vector<4x1xf32> to vector<4x256xf32>
    %365 = arith.addf %362, %364 : vector<4x256xf32>
    %cst_383 = arith.constant 0.000000e+00 : f32
    %366 = vector.broadcast %cst_383 : f32 to vector<4x256xf32>
    %367 = arith.subf %366, %365 : vector<4x256xf32>
    %368 = math.exp %367 : vector<4x256xf32>
    %cst_384 = arith.constant 1.000000e+00 : f32
    %369 = vector.broadcast %cst_384 : f32 to vector<4x256xf32>
    %370 = arith.addf %369, %368 : vector<4x256xf32>
    %cst_385 = arith.constant 1.000000e+00 : f32
    %371 = vector.broadcast %cst_385 : f32 to vector<4x256xf32>
    %372 = arith.divf %371, %370 : vector<4x256xf32>
    %c0_386 = arith.constant 0 : index
    %c0_387 = arith.constant 0 : index
    %c0_388 = arith.constant 0 : index
    %373 = vector.load %arg17[%c0_386, %c0_387, %c0_388] : memref<1x4x256xf32, #tpu.memory_space<vmem>>, vector<1x4x256xf32>
    %374 = vector.shape_cast %373 : vector<1x4x256xf32> to vector<4x256xf32>
    %375 = vector.shape_cast %372 : vector<4x256xf32> to vector<1x4x256xf32>
    tpu.vector_store %arg17[%c0_386, %c0_387, %c0_388], %375 {strides = array<i32>} : memref<1x4x256xf32, #tpu.memory_space<vmem>>, vector<1x4x256xf32>,
    return
  }
  func.func @transform_0(%arg0: i32) -> (i32, i32, i32) {
    %c0_i32 = arith.constant 0 : i32
    %c0_i32_0 = arith.constant 0 : i32
    %c0_i32_1 = arith.constant 0 : i32
    return %arg0, %c0_i32, %c0_i32_0 : i32, i32, i32
  }
  func.func @transform_1(%arg0: i32) -> (i32, i32, i32) {
    %c0_i32 = arith.constant 0 : i32
    %c0_i32_0 = arith.constant 0 : i32
    %c0_i32_1 = arith.constant 0 : i32
    return %arg0, %c0_i32, %c0_i32_0 : i32, i32, i32
  }
  func.func @transform_2(%arg0: i32) -> (i32, i32, i32) {
    %c0_i32 = arith.constant 0 : i32
    %c0_i32_0 = arith.constant 0 : i32
    %c0_i32_1 = arith.constant 0 : i32
    %c0_i32_2 = arith.constant 0 : i32
    return %c0_i32, %c0_i32_0, %c0_i32_1 : i32, i32, i32
  }
  func.func @transform_3(%arg0: i32) -> (i32, i32) {
    %c0_i32 = arith.constant 0 : i32
    %c0_i32_0 = arith.constant 0 : i32
    %c0_i32_1 = arith.constant 0 : i32
    return %c0_i32, %c0_i32_0 : i32, i32
  }
  func.func @transform_4(%arg0: i32) -> (i32, i32) {
    %c0_i32 = arith.constant 0 : i32
    %c0_i32_0 = arith.constant 0 : i32
    %c0_i32_1 = arith.constant 0 : i32
    return %c0_i32, %c0_i32_0 : i32, i32
  }
  func.func @transform_5(%arg0: i32) -> (i32, i32, i32) {
    %c0_i32 = arith.constant 0 : i32
    %c0_i32_0 = arith.constant 0 : i32
    %c0_i32_1 = arith.constant 0 : i32
    %c0_i32_2 = arith.constant 0 : i32
    return %c0_i32, %c0_i32_0, %c0_i32_1 : i32, i32, i32
  }
  func.func @transform_6(%arg0: i32) -> (i32, i32) {
    %c0_i32 = arith.constant 0 : i32
    %c0_i32_0 = arith.constant 0 : i32
    %c0_i32_1 = arith.constant 0 : i32
    return %c0_i32, %c0_i32_0 : i32, i32
  }
  func.func @transform_7(%arg0: i32) -> (i32, i32) {
    %c0_i32 = arith.constant 0 : i32
    %c0_i32_0 = arith.constant 0 : i32
    %c0_i32_1 = arith.constant 0 : i32
    return %c0_i32, %c0_i32_0 : i32, i32
  }
  func.func @transform_8(%arg0: i32) -> (i32, i32) {
    %c0_i32 = arith.constant 0 : i32
    %c0_i32_0 = arith.constant 0 : i32
    %c0_i32_1 = arith.constant 0 : i32
    return %c0_i32, %c0_i32_0 : i32, i32
  }
  func.func @transform_9(%arg0: i32) -> (i32, i32) {
    %c0_i32 = arith.constant 0 : i32
    %c0_i32_0 = arith.constant 0 : i32
    %c0_i32_1 = arith.constant 0 : i32
    return %c0_i32, %c0_i32_0 : i32, i32
  }
  func.func @transform_10(%arg0: i32) -> (i32, i32, i32) {
    %c0_i32 = arith.constant 0 : i32
    %c0_i32_0 = arith.constant 0 : i32
    %c0_i32_1 = arith.constant 0 : i32
    %c0_i32_2 = arith.constant 0 : i32
    return %c0_i32, %c0_i32_0, %c0_i32_1 : i32, i32, i32
  }
  func.func @transform_11(%arg0: i32) -> (i32, i32) {
    %c0_i32 = arith.constant 0 : i32
    %c0_i32_0 = arith.constant 0 : i32
    %c0_i32_1 = arith.constant 0 : i32
    return %c0_i32, %c0_i32_0 : i32, i32
  }
  func.func @transform_12(%arg0: i32) -> (i32, i32) {
    %c0_i32 = arith.constant 0 : i32
    %c0_i32_0 = arith.constant 0 : i32
    %c0_i32_1 = arith.constant 0 : i32
    return %c0_i32, %c0_i32_0 : i32, i32
  }
  func.func @transform_13(%arg0: i32) -> (i32, i32, i32) {
    %c0_i32 = arith.constant 0 : i32
    %c0_i32_0 = arith.constant 0 : i32
    %c0_i32_1 = arith.constant 0 : i32
    %c0_i32_2 = arith.constant 0 : i32
    return %c0_i32, %c0_i32_0, %c0_i32_1 : i32, i32, i32
  }
  func.func @transform_14(%arg0: i32) -> (i32, i32) {
    %c0_i32 = arith.constant 0 : i32
    %c0_i32_0 = arith.constant 0 : i32
    %c0_i32_1 = arith.constant 0 : i32
    return %c0_i32, %c0_i32_0 : i32, i32
  }
  func.func @transform_15(%arg0: i32) -> (i32, i32) {
    %c0_i32 = arith.constant 0 : i32
    %c0_i32_0 = arith.constant 0 : i32
    %c0_i32_1 = arith.constant 0 : i32
    return %c0_i32, %c0_i32_0 : i32, i32
  }
  func.func @transform_16(%arg0: i32) -> (i32, i32, i32) {
    %c0_i32 = arith.constant 0 : i32
    %c0_i32_0 = arith.constant 0 : i32
    %c0_i32_1 = arith.constant 0 : i32
    return %arg0, %c0_i32, %c0_i32_0 : i32, i32, i32
  }
  func.func @transform_17(%arg0: i32) -> (i32, i32, i32) {
    %c0_i32 = arith.constant 0 : i32
    %c0_i32_0 = arith.constant 0 : i32
    %c0_i32_1 = arith.constant 0 : i32
    return %arg0, %c0_i32, %c0_i32_0 : i32, i32, i32
  }
}

</mosaic_0001>

<bundles_post_ra>
// kernel: vae_forward_fused.1
= control target key start
LH: loop header
LB: loop body
LE: loop exit
PB: predicated region body
PF: predicated region fallthrough
CT: control target
= control target key end

     0   :  { %s9793_s0 = inlined_call_operand.vmem [shape: f32[2,4,256], index: 0, kind: input, shape index: {}]   ;;  %s9794_s1 = inlined_call_operand.vmem [shape: f32[2,8,16], index: 1, kind: input, shape index: {}]   ;;  %s9795_s2 = inlined_call_operand.hbm [shape: bf16[16,256,64], index: 2, kind: input, shape index: {}]   ;;  %s9796_s3 = inlined_call_operand.hbm [shape: bf16[8,64], index: 3, kind: input, shape index: {}]   ;;  %s9797_s4 = inlined_call_operand.hbm [shape: f32[8,1], index: 4, kind: input, shape index: {}]   ;;  %s9798_s5 = inlined_call_operand.hbm [shape: bf16[16,64,16], index: 5, kind: input, shape index: {}]   ;;  %s9799_s6 = inlined_call_operand.hbm [shape: bf16[16,128], index: 6, kind: input, shape index: {}]   ;;  %s9800_s7 = inlined_call_operand.vmem [shape: f32[16,1], index: 7, kind: input, shape index: {}]   ;;  %s9801_s8 = inlined_call_operand.hbm [shape: bf16[16,16], index: 8, kind: input, shape index: {}]   ;;  %s9802_s9 = inlined_call_operand.vmem [shape: f32[16,1], index: 9, kind: input, shape index: {}]   ;;  %s9803_s10 = inlined_call_operand.vmem [shape: bf16[16,16,64], index: 10, kind: input, shape index: {}]   ;;  %s9804_s11 = inlined_call_operand.hbm [shape: bf16[8,128], index: 11, kind: input, shape index: {}]   ;;  %s9805_s12 = inlined_call_operand.vmem [shape: f32[8,1], index: 12, kind: input, shape index: {}]   ;;  %s9806_s13 = inlined_call_operand.hbm [shape: bf16[16,64,256], index: 13, kind: input, shape index: {}]   ;;  %s9807_s14 = inlined_call_operand.vmem [shape: bf16[4,128], index: 14, kind: input, shape index: {}]   ;;  %s9808_s15 = inlined_call_operand.vmem [shape: f32[4,1], index: 15, kind: input, shape index: {}]   ;;  %s9809_s16 = inlined_call_operand.vmem [shape: f32[2,4,256], index: 16, kind: output, shape index: {0}]   ;;  %s9810_s17 = inlined_call_operand.vmem [shape: f32[2,16,16], index: 17, kind: output, shape index: {1}]  }
   0x1   :  { %9811 = sst [smem:[#allocation24_spill]] %s9793_s0 }
   0x2   :  { %9812 = sst [smem:[#allocation25_spill]] %s9794_s1 }
   0x3   :  { %9813 = sst [smem:[#allocation26_spill]] %s9795_s2 }
   0x4   :  { %9814 = sst [smem:[#allocation27_spill]] %s9796_s3 }
   0x5   :  { %9815 = sst [smem:[#allocation28_spill]] %s9797_s4 }
   0x6   :  { %9816 = sst [smem:[#allocation29_spill]] %s9798_s5 }
   0x7   :  { %23 = vsyncpa [#allocation7], 0 }
   0x8   :  { %24 = vsyncpa [#allocation9], 0 }
   0x9   :  { %25 = vsyncpa [#allocation12], 0 }
   0xa   :  { %26 = vsyncpa [#allocation15], 0 }
   0xb   :  { %27 = vsyncpa [#allocation18], 0  ;;  %s9396_s24 = smov 0  }
   0xc LB: > { %s9817_s3 = sld [smem:[#allocation27_spill]]  ;;  %s9405_s28 = sadd.s32 4294967295, %s9291_s24   ;;  %s9291_s24 = sphi %s9396_s24, %s33_s24  }
   0xd   : > { %p6281_p0 = scmp.ge.s32.totalorder %s9291_s24, 1  ;;  %p436_p1 = scmp.lt.s32.totalorder %s9291_s24, 3 }
   0xe   : > { %p8975_p2 = scmp.eq.s32.totalorder %s9405_s28, 0  ;;  %s9293_s0 = smov [#allocation8]  }
   0xf   : > { %p9410_p3 = pnand %p6281_p0, %p436_p1  ;;  %s464_s30 = sshll.u32 %s9293_s0, 4  ;;  %s465_s30 = int_to_ptr.vmem [resolvable:$true] %s464_s30 }
  0x10   : > { %s9819_s5 = sld [smem:[#allocation29_spill]]  ;;  %s9294_s21 = smov [#allocation11]  }
  0x11   : > { %p8950_p4 = pneg %p9410_p3  ;;  %s487_s22 = sshll.u32 %s9294_s21, 4  ;;  %s488_s22 = int_to_ptr.vmem [resolvable:$true] %s487_s22 }
  0x12   : > { %s462_s27 = sshll.u32 %s9817_s3, 4  ;;  %s516_s26 = sshll.u32 %s9801_s8, 4  ;;  %s463_s27 = int_to_ptr.hbm [resolvable:$true] %s462_s27  ;;  %s517_s26 = int_to_ptr.hbm [resolvable:$true] %s516_s26 }
  0x13   : > { %p9421_p5 = pnand %p8975_p2, %p8950_p4  ;;  %s9295_s0 = smov 64  }
  0x14   : > { %s9296_s18 = smov 4   ;;  %s9297_s19 = smov [#allocation14]  }
  0x15   : > { %8956 = dma.hbm_to_vmem [thread:$0]  (!%p9421_p5), %s463_s27, 64, %s465_s30, [#allocation9]  }
  0x16   : > { %s485_s1 = sshll.u32 %s9819_s5, 4  ;;  %s518_s3 = sshll.u32 %s9297_s19, 4  ;;  %s486_s1 = int_to_ptr.hbm [resolvable:$true] %s485_s1  ;;  %s519_s3 = int_to_ptr.vmem [resolvable:$true] %s518_s3 }
  0x17   : > { %8962 = dma.hbm_to_vmem [thread:$0]  (!%p9421_p5), %s486_s1, 8192, %s488_s22, [#allocation12], %s9295_s0, %s9295_s0, %s9296_s18  }
  0x18   : > { %s9821_s2 = sld [smem:[#allocation26_spill]]  ;;  %s9298_s1 = smov [#allocation6]  }
  0x19   : > { %8968 = dma.hbm_to_vmem [thread:$0]  (!%p9421_p5), %s517_s26, 128, %s519_s3, [#allocation15], %s9295_s0, %s9295_s0, %s9296_s18  }
  0x1a   : > { %s9822_s4 = sld [smem:[#allocation28_spill]]  ;;  %s449_s22 = sshll.u32 %s9298_s1, 4  ;;  %s450_s22 = int_to_ptr.vmem [resolvable:$true] %s449_s22 }
  0x1b   : > { %s9299_s5 = smov [#allocation10]   ;;  %s499_s3 = sshll.u32 %s9799_s6, 4  ;;  %s500_s3 = int_to_ptr.hbm [resolvable:$true] %s499_s3 }
  0x1c   : > { %s476_s19 = sshll.u32 %s9299_s5, 4  ;;  %s537_s30 = sshll.u32 %s9804_s11, 4  ;;  %s477_s19 = int_to_ptr.vmem [resolvable:$true] %s476_s19  ;;  %s538_s30 = int_to_ptr.hbm [resolvable:$true] %s537_s30 }
  0x1d   : > { %s9300_s1 = smov [#allocation13]   ;;  %s9303_s26 = smov 128  }
  0x1e   : > { %s447_s23 = sshll.u32 %s9821_s2, 4  ;;  %s9301_s2 = smov [#allocation16]   ;;  %s448_s23 = int_to_ptr.hbm [resolvable:$true] %s447_s23 }
  0x1f   : > { %8953 = dma.hbm_to_vmem [thread:$0]  (!%p9421_p5), %s448_s23, 32768, %s450_s22, [#allocation7], %s9295_s0, %s9295_s0, %s9296_s18  }
  0x20   : > { %s474_s25 = sshll.u32 %s9822_s4, 4  ;;  %s501_s4 = sshll.u32 %s9300_s1, 4  ;;  %s475_s25 = int_to_ptr.hbm [resolvable:$true] %s474_s25  ;;  %s502_s4 = int_to_ptr.vmem [resolvable:$true] %s501_s4 }
  0x21   : > { %8959 = dma.hbm_to_vmem [thread:$0]  (!%p9421_p5), %s475_s25, 128, %s477_s19, [#allocation9]  }
  0x22   : > { %8965 = dma.hbm_to_vmem [thread:$0]  (!%p9421_p5), %s500_s3, 128, %s502_s4, [#allocation12], %s9295_s0, %s9295_s0, %s9296_s18  }
  0x23   : > { %s539_s23 = sshll.u32 %s9301_s2, 4  ;;  %s551_s25 = sshll.u32 %s9806_s13, 4  ;;  %s540_s23 = int_to_ptr.vmem [resolvable:$true] %s539_s23  ;;  %s552_s25 = int_to_ptr.hbm [resolvable:$true] %s551_s25 }
  0x24   : > { %8971 = dma.hbm_to_vmem [thread:$0]  (!%p9421_p5), %s538_s30, 64, %s540_s23, [#allocation15]  }
  0x25   : > { %s9302_s19 = smov [#allocation17]   ;;  %s9304_s27 = smov 8  }
  0x26   : > { %s553_s21 = sshll.u32 %s9302_s19, 4  ;;  %590 = sbr.rel (%p9410_p3) target bundleno = 1964 (0x7ac), region = 84  ;;  %s554_s21 = int_to_ptr.vmem [resolvable:$true] %s553_s21 }
  0x27   : > { %8974 = dma.hbm_to_vmem [thread:$0]  (!%p9421_p5), %s552_s25, 16384, %s554_s21, [#allocation18], %s9303_s26, %s9303_s26, %s9304_s27  }
  0x2b   : > { %9270 = dma.done.wait (%p8975_p2), [#allocation7], 32768  }
  0x2c   : > { %9272 = vsyncadd (%p8975_p2), [#allocation7], 4294934528 }
  0x2d   : > { %9274 = dma.done.wait (%p8975_p2), [#allocation9], 192  }
  0x2e   : > { %9276 = vsyncadd (%p8975_p2), [#allocation9], 4294967104 }
  0x2f   : > { %9278 = dma.done.wait (%p8975_p2), [#allocation12], 8320  }
  0x30   : > { %9280 = vsyncadd (%p8975_p2), [#allocation12], 4294958976 }
  0x31   : > { %9282 = dma.done.wait (%p8975_p2), [#allocation15], 192  }
  0x32   : > { %9284 = vsyncadd (%p8975_p2), [#allocation15], 4294967104 }
  0x33   : > { %9286 = dma.done.wait (%p8975_p2), [#allocation18], 16384  }
  0x34   : > { %9288 = vsyncadd (%p8975_p2), [#allocation18], 4294950912  ;;  %v8423_v0 = vld [vmem:[#allocation6 + $0x38] sm:$0xff]  ;;  %v8422_v4 = vld [vmem:[#allocation6 + $0x30] sm:$0xff]  ;;  %p687_p6 = scmp.lt.s32.totalorder %s9405_s28, 1  ;;  %s9823_s0 = sld [smem:[#allocation24_spill]] }
  0x35   : > { %v8431_v1 = vld [vmem:[#allocation6 + $0x78] sm:$0xff]  ;;  %844 = vmatpush.bf16.msra.mxu0 %v8423_v0  ;;  %v8430_v5 = vld [vmem:[#allocation6 + $0x70] sm:$0xff]  ;;  %v8421_v8 = vld [vmem:[#allocation6 + $0x28] sm:$0xff]  ;;  %vm1028_vm0 = vcmask 1043456   ;;  %vm1031_vm1 = vcmask 519168   ;;  %vm3284_vm2 = vcmask 523264  }
  0x36   : > { %v8439_v2 = vld [vmem:[#allocation6 + $0xb8] sm:$0xff]  ;;  %857 = vmatpush.bf16.msra.mxu1 %v8431_v1  ;;  %v8438_v6 = vld [vmem:[#allocation6 + $0xb0] sm:$0xff]  ;;  %v8429_v9 = vld [vmem:[#allocation6 + $0x68] sm:$0xff]  ;;  %s9826_s28 = smov (!%p687_p6, %s9405_s28), 1  ;;  %vm3352_vm3 = vcmask 125952   ;;  %vm4194_vm4 = vcmask 130048  }
  0x37   : > { %v8447_v3 = vld [vmem:[#allocation6 + $0xf8] sm:$0xff]  ;;  %999 = vmatpush.bf16.msra.mxu2 %v8439_v2  ;;  %v8446_v7 = vld [vmem:[#allocation6 + $0xf0] sm:$0xff]  ;;  %v8437_v10 = vld [vmem:[#allocation6 + $0xa8] sm:$0xff]  ;;  %s9498_s4 = sshll.u32 %s9826_s28, 3  ;;  %s8415_s23 = sshll.u32 %s9826_s28, 4 }
  0x38   : > { %1012 = vmatpush.bf16.msra.mxu3 %v8447_v3  ;;  %v8445_v11 = vld [vmem:[#allocation6 + $0xe8] sm:$0xff]  ;;  %v8420_v12 = vld [vmem:[#allocation6 + $0x20] sm:$0xff]  ;;  %v8419_v16 = vld [vmem:[#allocation6 + $0x18] sm:$0xff]  ;;  %s9824_s30 = sld [smem:[#allocation25_spill]]  ;;  %s700_s5 = scalar_lea.vmem %s9809_s16, %s9498_s4 }
  0x39   : > { %845 = vmatpush.bf16.msra.mxu0 %v8422_v4  ;;  %v8428_v13 = vld [vmem:[#allocation6 + $0x60] sm:$0xff]  ;;  %v8427_v17 = vld [vmem:[#allocation6 + $0x58] sm:$0xff]  ;;  %v8418_v21 = vld [vmem:[#allocation6 + $0x10] sm:$0xff] }
  0x3a   : > { %858 = vmatpush.bf16.msra.mxu1 %v8430_v5  ;;  %v8436_v14 = vld [vmem:[#allocation6 + $0xa0] sm:$0xff]  ;;  %s691_s18 = scalar_lea.vmem %s9823_s0, %s9498_s4  ;;  %v8435_v18 = vld [vmem:[#allocation6 + $0x98] sm:$0xff]  ;;  %v8426_v22 = vld [vmem:[#allocation6 + $0x50] sm:$0xff]  ;;  %s705_s0 = scalar_lea.vmem %s9810_s17, %s8415_s23 }
  0x3b   : > { %1000 = vmatpush.bf16.msra.mxu2 %v8438_v6  ;;  %v8444_v15 = vld [vmem:[#allocation6 + $0xe0] sm:$0xff]  ;;  %v8443_v19 = vld [vmem:[#allocation6 + $0xd8] sm:$0xff]  ;;  %v8434_v23 = vld [vmem:[#allocation6 + $0x90] sm:$0xff] }
  0x3c   : > { %1013 = vmatpush.bf16.msra.mxu3 %v8446_v7  ;;  %v707_v20 = vld [vmem:[%s691_s18] sm:$0xff]  ;;  %v8442_v24 = vld [vmem:[#allocation6 + $0xd0] sm:$0xff]  ;;  %v8417_v25 = vld [vmem:[#allocation6 + $0x8] sm:$0xff] }
  0x3d   : > { %846 = vmatpush.bf16.msra.mxu0 %v8421_v8  ;;  %709 = vst [vmem:[#allocation1] ss:$2 sm:$0xff] %v707_v20  ;;  %v8425_v26 = vld [vmem:[#allocation6 + $0x48] sm:$0xff]  ;;  %v8416_v29 = vld [vmem:[#allocation6] sm:$0xff]  ;;  %v8455_v35 = vld [vmem:[#allocation6 + $0x138] sm:$0xff] }
  0x3e   : > { %859 = vmatpush.bf16.msra.mxu1 %v8429_v9  ;;  %v8433_v27 = vld [vmem:[#allocation6 + $0x88] sm:$0xff]  ;;  %v8424_v30 = vld [vmem:[#allocation6 + $0x40] sm:$0xff]  ;;  %v8463_v36 = vld [vmem:[#allocation6 + $0x178] sm:$0xff]  ;;  %s695_s1 = scalar_lea.vmem %s9824_s30, %s9498_s4 }
  0x3f   : > { %1001 = vmatpush.bf16.msra.mxu2 %v8437_v10  ;;  %v8441_v28 = vld [vmem:[#allocation6 + $0xc8] sm:$0xff]  ;;  %v8432_v31 = vld [vmem:[#allocation6 + $0x80] sm:$0xff]  ;;  %v8471_v37 = vld [vmem:[#allocation6 + $0x1b8] sm:$0xff] }
  0x40   : > { %1014 = vmatpush.bf16.msra.mxu3 %v8445_v11  ;;  %v8440_v32 = vld [vmem:[#allocation6 + $0xc0] sm:$0xff]  ;;  %v8479_v38 = vld [vmem:[#allocation6 + $0x1f8] sm:$0xff]  ;;  %v8454_v41 = vld [vmem:[#allocation6 + $0x130] sm:$0xff] }
  0x41   : > { %847 = vmatpush.bf16.msra.mxu0 %v8420_v12  ;;  %v8462_v42 = vld [vmem:[#allocation6 + $0x170] sm:$0xff]  ;;  %v8453_v45 = vld [vmem:[#allocation6 + $0x128] sm:$0xff]  ;;  %v8452_v49 = vld [vmem:[#allocation6 + $0x120] sm:$0xff] }
  0x42   : > { %860 = vmatpush.bf16.msra.mxu1 %v8428_v13  ;;  %v8470_v43 = vld [vmem:[#allocation6 + $0x1b0] sm:$0xff]  ;;  %v8461_v46 = vld [vmem:[#allocation6 + $0x168] sm:$0xff]  ;;  %v8460_v50 = vld [vmem:[#allocation6 + $0x160] sm:$0xff] }
  0x43   : > { %1002 = vmatpush.bf16.msra.mxu2 %v8436_v14  ;;  %v8478_v44 = vld [vmem:[#allocation6 + $0x1f0] sm:$0xff]  ;;  %v8469_v47 = vld [vmem:[#allocation6 + $0x1a8] sm:$0xff]  ;;  %v8468_v51 = vld [vmem:[#allocation6 + $0x1a0] sm:$0xff] }
  0x44   : > { %1015 = vmatpush.bf16.msra.mxu3 %v8444_v15  ;;  %v710_v33 = vld.sshfl [vmem:[#allocation1] sm:$0xff pattern:$0x75316420]  ;;  %v711_v34 = vld.sshfl [vmem:[#allocation1 + $0x8] sm:$0xff pattern:$0x75316420] }
  0x45   : > { %848 = vmatpush.bf16.msra.mxu0 %v8419_v16  ;;  %v9504_v39 = vpack.c.bf16 %v710_v33, %v710_v33  ;;  %v9506_v40 = vpack.c.bf16 %v711_v34, %v711_v34  ;;  %v8477_v48 = vld [vmem:[#allocation6 + $0x1e8] sm:$0xff]  ;;  %v8476_v52 = vld [vmem:[#allocation6 + $0x1e0] sm:$0xff]  ;;  %v8451_v53 = vld [vmem:[#allocation6 + $0x118] sm:$0xff] }
  0x46   : > { %861 = vmatpush.bf16.msra.mxu1 %v8427_v17  ;;  %v8459_v54 = vld [vmem:[#allocation6 + $0x158] sm:$0xff]  ;;  %v8450_v57 = vld [vmem:[#allocation6 + $0x110] sm:$0xff]  ;;  %v8449_v61 = vld [vmem:[#allocation6 + $0x108] sm:$0xff] }
  0x47   : > { %1003 = vmatpush.bf16.msra.mxu2 %v8435_v18  ;;  %v8467_v55 = vld [vmem:[#allocation6 + $0x198] sm:$0xff]  ;;  %v8458_v58 = vld [vmem:[#allocation6 + $0x150] sm:$0xff]  ;;  %v8457_v62 = vld [vmem:[#allocation6 + $0x148] sm:$0xff] }
  0x48   : > { %1016 = vmatpush.bf16.msra.mxu3 %v8443_v19  ;;  %v8475_v56 = vld [vmem:[#allocation6 + $0x1d8] sm:$0xff]  ;;  %v8466_v59 = vld [vmem:[#allocation6 + $0x190] sm:$0xff]  ;;  %v8465_v63 = vld [vmem:[#allocation6 + $0x188] sm:$0xff] }
  0x49   : > { %849 = vmatpush.bf16.msra.mxu0 %v8418_v21  ;;  %v8474_v60 = vld [vmem:[#allocation6 + $0x1d0] sm:$0xff]  ;;  %v8473_v0 = vld [vmem:[#allocation6 + $0x1c8] sm:$0xff]  ;;  %v8448_v1 = vld [vmem:[#allocation6 + $0x100] sm:$0xff] }
  0x4a   : > { %862 = vmatpush.bf16.msra.mxu1 %v8426_v22  ;;  %v8456_v2 = vld [vmem:[#allocation6 + $0x140] sm:$0xff]  ;;  %v8487_v5 = vld [vmem:[#allocation6 + $0x238] sm:$0xff]  ;;  %v8486_v9 = vld [vmem:[#allocation6 + $0x230] sm:$0xff] }
  0x4b   : > { %1004 = vmatpush.bf16.msra.mxu2 %v8434_v23  ;;  %v8464_v3 = vld [vmem:[#allocation6 + $0x180] sm:$0xff]  ;;  %v8495_v6 = vld [vmem:[#allocation6 + $0x278] sm:$0xff]  ;;  %v8494_v10 = vld [vmem:[#allocation6 + $0x270] sm:$0xff] }
  0x4c   : > { %1017 = vmatpush.bf16.msra.mxu3 %v8442_v24  ;;  %v8472_v4 = vld [vmem:[#allocation6 + $0x1c0] sm:$0xff]  ;;  %v8503_v7 = vld [vmem:[#allocation6 + $0x2b8] sm:$0xff]  ;;  %v8502_v11 = vld [vmem:[#allocation6 + $0x2b0] sm:$0xff] }
  0x4d   : > { %850 = vmatpush.bf16.msra.mxu0 %v8417_v25  ;;  %v8511_v8 = vld [vmem:[#allocation6 + $0x2f8] sm:$0xff]  ;;  %v8510_v12 = vld [vmem:[#allocation6 + $0x2f0] sm:$0xff]  ;;  %v8485_v13 = vld [vmem:[#allocation6 + $0x228] sm:$0xff] }
  0x4e   : > { %863 = vmatpush.bf16.msra.mxu1 %v8425_v26  ;;  %v8493_v14 = vld [vmem:[#allocation6 + $0x268] sm:$0xff]  ;;  %v8484_v17 = vld [vmem:[#allocation6 + $0x220] sm:$0xff]  ;;  %v8483_v21 = vld [vmem:[#allocation6 + $0x218] sm:$0xff] }
  0x4f   : > { %1005 = vmatpush.bf16.msra.mxu2 %v8433_v27  ;;  %v8501_v15 = vld [vmem:[#allocation6 + $0x2a8] sm:$0xff]  ;;  %v8492_v18 = vld [vmem:[#allocation6 + $0x260] sm:$0xff]  ;;  %v8491_v22 = vld [vmem:[#allocation6 + $0x258] sm:$0xff] }
  0x50   : > { %1018 = vmatpush.bf16.msra.mxu3 %v8441_v28  ;;  %v8509_v16 = vld [vmem:[#allocation6 + $0x2e8] sm:$0xff]  ;;  %v8500_v19 = vld [vmem:[#allocation6 + $0x2a0] sm:$0xff]  ;;  %v8499_v23 = vld [vmem:[#allocation6 + $0x298] sm:$0xff] }
  0x51   : > { %851 = vmatpush.bf16.msra.mxu0 %v8416_v29  ;;  %v8508_v20 = vld [vmem:[#allocation6 + $0x2e0] sm:$0xff]  ;;  %v8507_v24 = vld [vmem:[#allocation6 + $0x2d8] sm:$0xff]  ;;  %v8482_v25 = vld [vmem:[#allocation6 + $0x210] sm:$0xff] }
  0x52   : > { %864 = vmatpush.bf16.msra.mxu1 %v8424_v30  ;;  %v8490_v26 = vld [vmem:[#allocation6 + $0x250] sm:$0xff]  ;;  %v8481_v29 = vld [vmem:[#allocation6 + $0x208] sm:$0xff]  ;;  %v8480_v33 = vld [vmem:[#allocation6 + $0x200] sm:$0xff] }
  0x53   : > { %1006 = vmatpush.bf16.msra.mxu2 %v8432_v31  ;;  %v8498_v27 = vld [vmem:[#allocation6 + $0x290] sm:$0xff]  ;;  %v8489_v30 = vld [vmem:[#allocation6 + $0x248] sm:$0xff]  ;;  %v8488_v34 = vld [vmem:[#allocation6 + $0x240] sm:$0xff] }
  0x54   : > { %1019 = vmatpush.bf16.msra.mxu3 %v8440_v32  ;;  %852 = vmatmul.bf16.vlgmr.msra.gmra.mxu0 %v9504_v39  ;;  %v8506_v28 = vld [vmem:[#allocation6 + $0x2d0] sm:$0xff]  ;;  %v8497_v31 = vld [vmem:[#allocation6 + $0x288] sm:$0xff] }
  0x55   : > { %1162 = vmatpush.bf16.msrb.mxu0 %v8455_v35  ;;  %865 = vmatmul.bf16.vlgmr.msra.gmra.mxu1 %v9506_v40  ;;  %v8505_v32 = vld [vmem:[#allocation6 + $0x2c8] sm:$0xff]  ;;  %v8496_v35 = vld [vmem:[#allocation6 + $0x280] sm:$0xff] }
  0x56   : > { %1175 = vmatpush.bf16.msrb.mxu1 %v8463_v36  ;;  %1007 = vmatmul.bf16.vlgmr.msra.gmra.mxu2 %v9504_v39  ;;  %v8504_v36 = vld [vmem:[#allocation6 + $0x2c0] sm:$0xff] }
  0x57   : > { %1317 = vmatpush.bf16.msrb.mxu2 %v8471_v37  ;;  %1020 = vmatmul.bf16.vlgmr.msra.gmra.mxu3 %v9506_v40  ;;  %v8519_v37 = vld [vmem:[#allocation6 + $0x338] sm:$0xff] }
  0x58   : > { %1330 = vmatpush.bf16.msrb.mxu3 %v8479_v38  ;;  %v8527_v38 = vld [vmem:[#allocation6 + $0x378] sm:$0xff] }
  0x59   : > { %1163 = vmatpush.bf16.msrb.mxu0 %v8454_v41  ;;  %v8535_v41 = vld [vmem:[#allocation6 + $0x3b8] sm:$0xff] }
  0x5a   : > { %1176 = vmatpush.bf16.msrb.mxu1 %v8462_v42  ;;  %v8543_v42 = vld [vmem:[#allocation6 + $0x3f8] sm:$0xff] }
  0x5b   : > { %1318 = vmatpush.bf16.msrb.mxu2 %v8470_v43  ;;  %v8518_v43 = vld [vmem:[#allocation6 + $0x330] sm:$0xff] }
  0x5c   : > { %1331 = vmatpush.bf16.msrb.mxu3 %v8478_v44  ;;  %v8526_v44 = vld [vmem:[#allocation6 + $0x370] sm:$0xff] }
  0x5d   : > { %1164 = vmatpush.bf16.msrb.mxu0 %v8453_v45  ;;  %v8534_v45 = vld [vmem:[#allocation6 + $0x3b0] sm:$0xff] }
  0x5e   : > { %1177 = vmatpush.bf16.msrb.mxu1 %v8461_v46  ;;  %v8542_v46 = vld [vmem:[#allocation6 + $0x3f0] sm:$0xff] }
  0x5f   : > { %1319 = vmatpush.bf16.msrb.mxu2 %v8469_v47  ;;  %v8517_v47 = vld [vmem:[#allocation6 + $0x328] sm:$0xff] }
  0x60   : > { %1332 = vmatpush.bf16.msrb.mxu3 %v8477_v48  ;;  %v8525_v48 = vld [vmem:[#allocation6 + $0x368] sm:$0xff] }
  0x61   : > { %1165 = vmatpush.bf16.msrb.mxu0 %v8452_v49  ;;  %v8533_v49 = vld [vmem:[#allocation6 + $0x3a8] sm:$0xff] }
  0x62   : > { %1178 = vmatpush.bf16.msrb.mxu1 %v8460_v50  ;;  %v8541_v50 = vld [vmem:[#allocation6 + $0x3e8] sm:$0xff] }
  0x63   : > { %1320 = vmatpush.bf16.msrb.mxu2 %v8468_v51  ;;  %v8516_v51 = vld [vmem:[#allocation6 + $0x320] sm:$0xff] }
  0x64   : > { %1333 = vmatpush.bf16.msrb.mxu3 %v8476_v52  ;;  %v8524_v52 = vld [vmem:[#allocation6 + $0x360] sm:$0xff] }
  0x65   : > { %1166 = vmatpush.bf16.msrb.mxu0 %v8451_v53  ;;  %v8532_v53 = vld [vmem:[#allocation6 + $0x3a0] sm:$0xff] }
  0x66   : > { %1179 = vmatpush.bf16.msrb.mxu1 %v8459_v54  ;;  %v8540_v54 = vld [vmem:[#allocation6 + $0x3e0] sm:$0xff] }
  0x67   : > { %1321 = vmatpush.bf16.msrb.mxu2 %v8467_v55  ;;  %v8515_v55 = vld [vmem:[#allocation6 + $0x318] sm:$0xff] }
  0x68   : > { %1334 = vmatpush.bf16.msrb.mxu3 %v8475_v56  ;;  %v8523_v56 = vld [vmem:[#allocation6 + $0x358] sm:$0xff] }
  0x69   : > { %1167 = vmatpush.bf16.msrb.mxu0 %v8450_v57  ;;  %v8531_v57 = vld [vmem:[#allocation6 + $0x398] sm:$0xff] }
  0x6a   : > { %1180 = vmatpush.bf16.msrb.mxu1 %v8458_v58  ;;  %v8539_v58 = vld [vmem:[#allocation6 + $0x3d8] sm:$0xff] }
  0x6b   : > { %1322 = vmatpush.bf16.msrb.mxu2 %v8466_v59  ;;  %v8514_v59 = vld [vmem:[#allocation6 + $0x310] sm:$0xff] }
  0x6c   : > { %1335 = vmatpush.bf16.msrb.mxu3 %v8474_v60  ;;  %v8522_v60 = vld [vmem:[#allocation6 + $0x350] sm:$0xff] }
  0x6d   : > { %1168 = vmatpush.bf16.msrb.mxu0 %v8449_v61  ;;  %v8530_v61 = vld [vmem:[#allocation6 + $0x390] sm:$0xff] }
  0x6e   : > { %1181 = vmatpush.bf16.msrb.mxu1 %v8457_v62  ;;  %v8538_v62 = vld [vmem:[#allocation6 + $0x3d0] sm:$0xff] }
  0x6f   : > { %1323 = vmatpush.bf16.msrb.mxu2 %v8465_v63  ;;  %v8513_v63 = vld [vmem:[#allocation6 + $0x308] sm:$0xff] }
  0x70   : > { %1336 = vmatpush.bf16.msrb.mxu3 %v8473_v0  ;;  %v8521_v0 = vld [vmem:[#allocation6 + $0x348] sm:$0xff] }
  0x71   : > { %1169 = vmatpush.bf16.msrb.mxu0 %v8448_v1  ;;  %v8529_v1 = vld [vmem:[#allocation6 + $0x388] sm:$0xff] }
  0x72   : > { %1182 = vmatpush.bf16.msrb.mxu1 %v8456_v2  ;;  %v8537_v2 = vld [vmem:[#allocation6 + $0x3c8] sm:$0xff] }
  0x73   : > { %1324 = vmatpush.bf16.msrb.mxu2 %v8464_v3  ;;  %v8512_v3 = vld [vmem:[#allocation6 + $0x300] sm:$0xff] }
  0x74   : > { %1337 = vmatpush.bf16.msrb.mxu3 %v8472_v4  ;;  %1170 = vmatmul.bf16.vlgmr.msrb.gmra.mxu0 %v9504_v39  ;;  %v8520_v4 = vld [vmem:[#allocation6 + $0x340] sm:$0xff] }
  0x75   : > { %1478 = vmatpush.bf16.msra.mxu0 %v8487_v5  ;;  %1183 = vmatmul.bf16.vlgmr.msrb.gmra.mxu1 %v9506_v40  ;;  %v8528_v5 = vld [vmem:[#allocation6 + $0x380] sm:$0xff] }
  0x76   : > { %1491 = vmatpush.bf16.msra.mxu1 %v8495_v6  ;;  %1325 = vmatmul.bf16.vlgmr.msrb.gmra.mxu2 %v9504_v39  ;;  %v8536_v6 = vld [vmem:[#allocation6 + $0x3c0] sm:$0xff] }
  0x77   : > { %1633 = vmatpush.bf16.msra.mxu2 %v8503_v7  ;;  %1338 = vmatmul.bf16.vlgmr.msrb.gmra.mxu3 %v9506_v40  ;;  %v8551_v7 = vld [vmem:[#allocation6 + $0x438] sm:$0xff] }
  0x78   : > { %1646 = vmatpush.bf16.msra.mxu3 %v8511_v8  ;;  %v8559_v8 = vld [vmem:[#allocation6 + $0x478] sm:$0xff] }
  0x79   : > { %1479 = vmatpush.bf16.msra.mxu0 %v8486_v9  ;;  %v8567_v9 = vld [vmem:[#allocation6 + $0x4b8] sm:$0xff] }
  0x7a   : > { %1492 = vmatpush.bf16.msra.mxu1 %v8494_v10  ;;  %v8575_v10 = vld [vmem:[#allocation6 + $0x4f8] sm:$0xff] }
  0x7b   : > { %1634 = vmatpush.bf16.msra.mxu2 %v8502_v11  ;;  %v8550_v11 = vld [vmem:[#allocation6 + $0x430] sm:$0xff] }
  0x7c   : > { %1647 = vmatpush.bf16.msra.mxu3 %v8510_v12  ;;  %v8558_v12 = vld [vmem:[#allocation6 + $0x470] sm:$0xff] }
  0x7d   : > { %1480 = vmatpush.bf16.msra.mxu0 %v8485_v13  ;;  %v8566_v13 = vld [vmem:[#allocation6 + $0x4b0] sm:$0xff] }
  0x7e   : > { %1493 = vmatpush.bf16.msra.mxu1 %v8493_v14  ;;  %v8574_v14 = vld [vmem:[#allocation6 + $0x4f0] sm:$0xff] }
  0x7f   : > { %1635 = vmatpush.bf16.msra.mxu2 %v8501_v15  ;;  %v8549_v15 = vld [vmem:[#allocation6 + $0x428] sm:$0xff] }
  0x80   : > { %1648 = vmatpush.bf16.msra.mxu3 %v8509_v16  ;;  %v8557_v16 = vld [vmem:[#allocation6 + $0x468] sm:$0xff] }
  0x81   : > { %1481 = vmatpush.bf16.msra.mxu0 %v8484_v17  ;;  %v8565_v17 = vld [vmem:[#allocation6 + $0x4a8] sm:$0xff] }
  0x82   : > { %1494 = vmatpush.bf16.msra.mxu1 %v8492_v18  ;;  %v8573_v18 = vld [vmem:[#allocation6 + $0x4e8] sm:$0xff] }
  0x83   : > { %1636 = vmatpush.bf16.msra.mxu2 %v8500_v19  ;;  %v8548_v19 = vld [vmem:[#allocation6 + $0x420] sm:$0xff] }
  0x84   : > { %1649 = vmatpush.bf16.msra.mxu3 %v8508_v20  ;;  %v8556_v20 = vld [vmem:[#allocation6 + $0x460] sm:$0xff] }
  0x85   : > { %1482 = vmatpush.bf16.msra.mxu0 %v8483_v21  ;;  %v8564_v21 = vld [vmem:[#allocation6 + $0x4a0] sm:$0xff] }
  0x86   : > { %1495 = vmatpush.bf16.msra.mxu1 %v8491_v22  ;;  %v8572_v22 = vld [vmem:[#allocation6 + $0x4e0] sm:$0xff] }
  0x87   : > { %1637 = vmatpush.bf16.msra.mxu2 %v8499_v23  ;;  %v8547_v23 = vld [vmem:[#allocation6 + $0x418] sm:$0xff] }
  0x88   : > { %1650 = vmatpush.bf16.msra.mxu3 %v8507_v24  ;;  %v8555_v24 = vld [vmem:[#allocation6 + $0x458] sm:$0xff] }
  0x89   : > { %1483 = vmatpush.bf16.msra.mxu0 %v8482_v25  ;;  %v8563_v25 = vld [vmem:[#allocation6 + $0x498] sm:$0xff] }
  0x8a   : > { %1496 = vmatpush.bf16.msra.mxu1 %v8490_v26  ;;  %v8571_v26 = vld [vmem:[#allocation6 + $0x4d8] sm:$0xff] }
  0x8b   : > { %1638 = vmatpush.bf16.msra.mxu2 %v8498_v27  ;;  %v8546_v27 = vld [vmem:[#allocation6 + $0x410] sm:$0xff] }
  0x8c   : > { %1651 = vmatpush.bf16.msra.mxu3 %v8506_v28  ;;  %v8554_v28 = vld [vmem:[#allocation6 + $0x450] sm:$0xff] }
  0x8d   : > { %1484 = vmatpush.bf16.msra.mxu0 %v8481_v29  ;;  %v8562_v29 = vld [vmem:[#allocation6 + $0x490] sm:$0xff] }
  0x8e   : > { %1497 = vmatpush.bf16.msra.mxu1 %v8489_v30  ;;  %v8570_v30 = vld [vmem:[#allocation6 + $0x4d0] sm:$0xff] }
  0x8f   : > { %1639 = vmatpush.bf16.msra.mxu2 %v8497_v31  ;;  %v8545_v31 = vld [vmem:[#allocation6 + $0x408] sm:$0xff] }
  0x90   : > { %1652 = vmatpush.bf16.msra.mxu3 %v8505_v32  ;;  %v8553_v32 = vld [vmem:[#allocation6 + $0x448] sm:$0xff] }
  0x91   : > { %1485 = vmatpush.bf16.msra.mxu0 %v8480_v33  ;;  %v8561_v33 = vld [vmem:[#allocation6 + $0x488] sm:$0xff] }
  0x92   : > { %1498 = vmatpush.bf16.msra.mxu1 %v8488_v34  ;;  %v8569_v34 = vld [vmem:[#allocation6 + $0x4c8] sm:$0xff] }
  0x93   : > { %1640 = vmatpush.bf16.msra.mxu2 %v8496_v35  ;;  %v8544_v35 = vld [vmem:[#allocation6 + $0x400] sm:$0xff] }
  0x94   : > { %1653 = vmatpush.bf16.msra.mxu3 %v8504_v36  ;;  %1486 = vmatmul.bf16.vlgmr.msra.gmra.mxu0 %v9504_v39  ;;  %v8552_v36 = vld [vmem:[#allocation6 + $0x440] sm:$0xff] }
  0x95   : > { %1794 = vmatpush.bf16.msrb.mxu0 %v8519_v37  ;;  %1499 = vmatmul.bf16.vlgmr.msra.gmra.mxu1 %v9506_v40  ;;  %v8560_v37 = vld [vmem:[#allocation6 + $0x480] sm:$0xff] }
  0x96   : > { %1807 = vmatpush.bf16.msrb.mxu1 %v8527_v38  ;;  %1641 = vmatmul.bf16.vlgmr.msra.gmra.mxu2 %v9504_v39  ;;  %v8568_v38 = vld [vmem:[#allocation6 + $0x4c0] sm:$0xff] }
  0x97   : > { %1949 = vmatpush.bf16.msrb.mxu2 %v8535_v41  ;;  %1654 = vmatmul.bf16.vlgmr.msra.gmra.mxu3 %v9506_v40  ;;  %v8583_v41 = vld [vmem:[#allocation6 + $0x538] sm:$0xff] }
  0x98   : > { %1962 = vmatpush.bf16.msrb.mxu3 %v8543_v42  ;;  %v8591_v42 = vld [vmem:[#allocation6 + $0x578] sm:$0xff] }
  0x99   : > { %1795 = vmatpush.bf16.msrb.mxu0 %v8518_v43  ;;  %v8599_v43 = vld [vmem:[#allocation6 + $0x5b8] sm:$0xff] }
  0x9a   : > { %1808 = vmatpush.bf16.msrb.mxu1 %v8526_v44  ;;  %v8607_v44 = vld [vmem:[#allocation6 + $0x5f8] sm:$0xff] }
  0x9b   : > { %1950 = vmatpush.bf16.msrb.mxu2 %v8534_v45  ;;  %v8582_v45 = vld [vmem:[#allocation6 + $0x530] sm:$0xff] }
  0x9c   : > { %1963 = vmatpush.bf16.msrb.mxu3 %v8542_v46  ;;  %v8590_v46 = vld [vmem:[#allocation6 + $0x570] sm:$0xff] }
  0x9d   : > { %1796 = vmatpush.bf16.msrb.mxu0 %v8517_v47  ;;  %v8598_v47 = vld [vmem:[#allocation6 + $0x5b0] sm:$0xff] }
  0x9e   : > { %1809 = vmatpush.bf16.msrb.mxu1 %v8525_v48  ;;  %v8606_v48 = vld [vmem:[#allocation6 + $0x5f0] sm:$0xff] }
  0x9f   : > { %1951 = vmatpush.bf16.msrb.mxu2 %v8533_v49  ;;  %v8581_v49 = vld [vmem:[#allocation6 + $0x528] sm:$0xff] }
  0xa0   : > { %1964 = vmatpush.bf16.msrb.mxu3 %v8541_v50  ;;  %v8589_v50 = vld [vmem:[#allocation6 + $0x568] sm:$0xff] }
  0xa1   : > { %1797 = vmatpush.bf16.msrb.mxu0 %v8516_v51  ;;  %v8597_v51 = vld [vmem:[#allocation6 + $0x5a8] sm:$0xff] }
  0xa2   : > { %1810 = vmatpush.bf16.msrb.mxu1 %v8524_v52  ;;  %v8605_v52 = vld [vmem:[#allocation6 + $0x5e8] sm:$0xff] }
  0xa3   : > { %1952 = vmatpush.bf16.msrb.mxu2 %v8532_v53  ;;  %v8580_v53 = vld [vmem:[#allocation6 + $0x520] sm:$0xff] }
  0xa4   : > { %1965 = vmatpush.bf16.msrb.mxu3 %v8540_v54  ;;  %v8588_v54 = vld [vmem:[#allocation6 + $0x560] sm:$0xff] }
  0xa5   : > { %1798 = vmatpush.bf16.msrb.mxu0 %v8515_v55 }
  0xa6   : > { %1811 = vmatpush.bf16.msrb.mxu1 %v8523_v56 }
  0xa7   : > { %1953 = vmatpush.bf16.msrb.mxu2 %v8531_v57  ;;  %v8596_v57 = vld [vmem:[#allocation6 + $0x5a0] sm:$0xff] }
  0xa8   : > { %1966 = vmatpush.bf16.msrb.mxu3 %v8539_v58  ;;  %v8604_v58 = vld [vmem:[#allocation6 + $0x5e0] sm:$0xff] }
  0xa9   : > { %1799 = vmatpush.bf16.msrb.mxu0 %v8514_v59  ;;  %v8579_v59 = vld [vmem:[#allocation6 + $0x518] sm:$0xff] }
  0xaa   : > { %1812 = vmatpush.bf16.msrb.mxu1 %v8522_v60  ;;  %v8587_v60 = vld [vmem:[#allocation6 + $0x558] sm:$0xff] }
  0xab   : > { %1954 = vmatpush.bf16.msrb.mxu2 %v8530_v61  ;;  %v8595_v61 = vld [vmem:[#allocation6 + $0x598] sm:$0xff] }
  0xac   : > { %1967 = vmatpush.bf16.msrb.mxu3 %v8538_v62  ;;  %v8603_v62 = vld [vmem:[#allocation6 + $0x5d8] sm:$0xff] }
  0xad   : > { %1800 = vmatpush.bf16.msrb.mxu0 %v8513_v63 }
  0xae   : > { %1813 = vmatpush.bf16.msrb.mxu1 %v8521_v0 }
  0xaf   : > { %1955 = vmatpush.bf16.msrb.mxu2 %v8529_v1 }
  0xb0   : > { %1968 = vmatpush.bf16.msrb.mxu3 %v8537_v2 }
  0xb1   : > { %1801 = vmatpush.bf16.msrb.mxu0 %v8512_v3  ;;  %v8578_v3 = vld [vmem:[#allocation6 + $0x510] sm:$0xff] }
  0xb2   : > { %1814 = vmatpush.bf16.msrb.mxu1 %v8520_v4  ;;  %v8586_v4 = vld [vmem:[#allocation6 + $0x550] sm:$0xff] }
  0xb3   : > { %1956 = vmatpush.bf16.msrb.mxu2 %v8528_v5 }
  0xb4   : > { %1969 = vmatpush.bf16.msrb.mxu3 %v8536_v6  ;;  %1802 = vmatmul.bf16.vlgmr.msrb.gmra.mxu0 %v9504_v39 }
  0xb5   : > { %2110 = vmatpush.bf16.msra.mxu0 %v8551_v7  ;;  %1815 = vmatmul.bf16.vlgmr.msrb.gmra.mxu1 %v9506_v40 }
  0xb6   : > { %2123 = vmatpush.bf16.msra.mxu1 %v8559_v8  ;;  %1957 = vmatmul.bf16.vlgmr.msrb.gmra.mxu2 %v9504_v39  ;;  %v8594_v8 = vld [vmem:[#allocation6 + $0x590] sm:$0xff] }
  0xb7   : > { %2265 = vmatpush.bf16.msra.mxu2 %v8567_v9  ;;  %1970 = vmatmul.bf16.vlgmr.msrb.gmra.mxu3 %v9506_v40  ;;  %v8602_v9 = vld [vmem:[#allocation6 + $0x5d0] sm:$0xff] }
  0xb8   : > { %2278 = vmatpush.bf16.msra.mxu3 %v8575_v10 }
  0xb9   : > { %2111 = vmatpush.bf16.msra.mxu0 %v8550_v11 }
  0xba   : > { %2124 = vmatpush.bf16.msra.mxu1 %v8558_v12  ;;  %v8577_v12 = vld [vmem:[#allocation6 + $0x508] sm:$0xff] }
  0xbb   : > { %2266 = vmatpush.bf16.msra.mxu2 %v8566_v13  ;;  %v8585_v13 = vld [vmem:[#allocation6 + $0x548] sm:$0xff] }
  0xbc   : > { %2279 = vmatpush.bf16.msra.mxu3 %v8574_v14  ;;  %v8593_v14 = vld [vmem:[#allocation6 + $0x588] sm:$0xff] }
  0xbd   : > { %2112 = vmatpush.bf16.msra.mxu0 %v8549_v15  ;;  %v8601_v15 = vld [vmem:[#allocation6 + $0x5c8] sm:$0xff] }
  0xbe   : > { %2125 = vmatpush.bf16.msra.mxu1 %v8557_v16 }
  0xbf   : > { %2267 = vmatpush.bf16.msra.mxu2 %v8565_v17 }
  0xc0   : > { %2280 = vmatpush.bf16.msra.mxu3 %v8573_v18  ;;  %v8576_v18 = vld [vmem:[#allocation6 + $0x500] sm:$0xff] }
  0xc1   : > { %2113 = vmatpush.bf16.msra.mxu0 %v8548_v19  ;;  %v8584_v19 = vld [vmem:[#allocation6 + $0x540] sm:$0xff] }
  0xc2   : > { %2126 = vmatpush.bf16.msra.mxu1 %v8556_v20  ;;  %v8592_v20 = vld [vmem:[#allocation6 + $0x580] sm:$0xff] }
  0xc3   : > { %2268 = vmatpush.bf16.msra.mxu2 %v8564_v21  ;;  %v8600_v21 = vld [vmem:[#allocation6 + $0x5c0] sm:$0xff] }
  0xc4   : > { %2281 = vmatpush.bf16.msra.mxu3 %v8572_v22  ;;  %v8615_v22 = vld [vmem:[#allocation6 + $0x638] sm:$0xff] }
  0xc5   : > { %2114 = vmatpush.bf16.msra.mxu0 %v8547_v23  ;;  %v8623_v23 = vld [vmem:[#allocation6 + $0x678] sm:$0xff] }
  0xc6   : > { %2127 = vmatpush.bf16.msra.mxu1 %v8555_v24  ;;  %v8631_v24 = vld [vmem:[#allocation6 + $0x6b8] sm:$0xff] }
  0xc7   : > { %2269 = vmatpush.bf16.msra.mxu2 %v8563_v25  ;;  %v8639_v25 = vld [vmem:[#allocation6 + $0x6f8] sm:$0xff] }
  0xc8   : > { %2282 = vmatpush.bf16.msra.mxu3 %v8571_v26  ;;  %v8614_v26 = vld [vmem:[#allocation6 + $0x630] sm:$0xff] }
  0xc9   : > { %2115 = vmatpush.bf16.msra.mxu0 %v8546_v27  ;;  %v8622_v27 = vld [vmem:[#allocation6 + $0x670] sm:$0xff] }
  0xca   : > { %2128 = vmatpush.bf16.msra.mxu1 %v8554_v28  ;;  %v8630_v28 = vld [vmem:[#allocation6 + $0x6b0] sm:$0xff] }
  0xcb   : > { %2270 = vmatpush.bf16.msra.mxu2 %v8562_v29  ;;  %v8638_v29 = vld [vmem:[#allocation6 + $0x6f0] sm:$0xff] }
  0xcc   : > { %2283 = vmatpush.bf16.msra.mxu3 %v8570_v30  ;;  %v8613_v30 = vld [vmem:[#allocation6 + $0x628] sm:$0xff] }
  0xcd   : > { %2116 = vmatpush.bf16.msra.mxu0 %v8545_v31  ;;  %v8621_v31 = vld [vmem:[#allocation6 + $0x668] sm:$0xff] }
  0xce   : > { %2129 = vmatpush.bf16.msra.mxu1 %v8553_v32  ;;  %v8629_v32 = vld [vmem:[#allocation6 + $0x6a8] sm:$0xff] }
  0xcf   : > { %2271 = vmatpush.bf16.msra.mxu2 %v8561_v33  ;;  %v8637_v33 = vld [vmem:[#allocation6 + $0x6e8] sm:$0xff] }
  0xd0   : > { %2284 = vmatpush.bf16.msra.mxu3 %v8569_v34  ;;  %v8612_v34 = vld [vmem:[#allocation6 + $0x620] sm:$0xff] }
  0xd1   : > { %2117 = vmatpush.bf16.msra.mxu0 %v8544_v35  ;;  %v853_v55 = vpop.f32.mrf.mxu0  ;;  %v8620_v35 = vld [vmem:[#allocation6 + $0x660] sm:$0xff] }
  0xd2   : > { %2130 = vmatpush.bf16.msra.mxu1 %v8552_v36  ;;  %v866_v56 = vpop.f32.mrf.mxu1 }
  0xd3   : > { %2272 = vmatpush.bf16.msra.mxu2 %v8560_v37  ;;  %v867_v2 = vadd.f32 %v866_v56, %v853_v55  ;;  %v8626_v55 = vld [vmem:[#allocation6 + $0x690] sm:$0xff] }
  0xd4   : > { %2285 = vmatpush.bf16.msra.mxu3 %v8568_v38  ;;  %2118 = vmatmul.bf16.vlgmr.msra.gmra.mxu0 %v9504_v39  ;;  %v8628_v38 = vld [vmem:[#allocation6 + $0x6a0] sm:$0xff]  ;;  %v8634_v56 = vld [vmem:[#allocation6 + $0x6d0] sm:$0xff] }
  0xd5   : > { %2426 = vmatpush.bf16.msrb.mxu0 %v8583_v41  ;;  %2131 = vmatmul.bf16.vlgmr.msra.gmra.mxu1 %v9506_v40  ;;  %v8636_v41 = vld [vmem:[#allocation6 + $0x6e0] sm:$0xff] }
  0xd6   : > { %2439 = vmatpush.bf16.msrb.mxu1 %v8591_v42  ;;  %2273 = vmatmul.bf16.vlgmr.msra.gmra.mxu2 %v9504_v39  ;;  %v8611_v42 = vld [vmem:[#allocation6 + $0x618] sm:$0xff] }
  0xd7   : > { %2581 = vmatpush.bf16.msrb.mxu2 %v8599_v43  ;;  %2286 = vmatmul.bf16.vlgmr.msra.gmra.mxu3 %v9506_v40  ;;  %v8619_v43 = vld [vmem:[#allocation6 + $0x658] sm:$0xff] }
  0xd8   : > { %2594 = vmatpush.bf16.msrb.mxu3 %v8607_v44  ;;  %v8627_v44 = vld [vmem:[#allocation6 + $0x698] sm:$0xff] }
  0xd9   : > { %2427 = vmatpush.bf16.msrb.mxu0 %v8582_v45  ;;  %v1008_v63 = vpop.f32.mrf.mxu2  ;;  %v855_v6 = vpop.f32.mrf.mxu0  ;;  %v8635_v45 = vld [vmem:[#allocation6 + $0x6d8] sm:$0xff] }
  0xda   : > { %2440 = vmatpush.bf16.msrb.mxu1 %v8590_v46  ;;  %v1021_v0 = vpop.f32.mrf.mxu3  ;;  %v868_v7 = vpop.f32.mrf.mxu1  ;;  %v8655_v6 = vld [vmem:[#allocation6 + $0x778] sm:$0xff] }
  0xdb   : > { %2582 = vmatpush.bf16.msrb.mxu2 %v8598_v47  ;;  %v1022_v1 = vadd.f32 %v1021_v0, %v1008_v63  ;;  %v8663_v7 = vld [vmem:[#allocation6 + $0x7b8] sm:$0xff] }
  0xdc   : > { %2595 = vmatpush.bf16.msrb.mxu3 %v8606_v48 }
  0xdd   : > { %2428 = vmatpush.bf16.msrb.mxu0 %v8581_v49  ;;  %v1026_v5 = vrot.slane %v1022_v1, 4  ;;  %v8608_v1 = vld [vmem:[#allocation6 + $0x600] sm:$0xff] }
  0xde   : > { %2441 = vmatpush.bf16.msrb.mxu1 %v8589_v50 }
  0xdf   : > { %2583 = vmatpush.bf16.msrb.mxu2 %v8597_v51  ;;  %v1029_v10 = vsel %vm1028_vm0, %v867_v2, %v1026_v5  ;;  %v8610_v51 = vld [vmem:[#allocation6 + $0x610] sm:$0xff]  ;;  %v8616_v2 = vld [vmem:[#allocation6 + $0x640] sm:$0xff]  ;;  %v8647_v5 = vld [vmem:[#allocation6 + $0x738] sm:$0xff] }
  0xe0   : > { %2596 = vmatpush.bf16.msrb.mxu3 %v8605_v52  ;;  %v1030_v11 = vpack.c.bf16 %v1029_v10, %v1029_v10  ;;  %v8618_v52 = vld [vmem:[#allocation6 + $0x650] sm:$0xff] }
  0xe1   : > { %2429 = vmatpush.bf16.msrb.mxu0 %v8580_v53  ;;  %v1010_v16 = vpop.f32.mrf.mxu2  ;;  %v8654_v10 = vld [vmem:[#allocation6 + $0x770] sm:$0xff] }
  0xe2   : > { %2442 = vmatpush.bf16.msrb.mxu1 %v8588_v54  ;;  %1032 = vst.msk [vmem:[#allocation2] sm:$0xf] %vm1031_vm1, %v1030_v11  ;;  %v1023_v17 = vpop.f32.mrf.mxu3  ;;  %v8662_v11 = vld [vmem:[#allocation6 + $0x7b0] sm:$0xff]  ;;  %v8669_v16 = vld [vmem:[#allocation6 + $0x7e8] sm:$0xff] }
  0xe3   : > { %2584 = vmatpush.bf16.msrb.mxu2 %v8596_v57  ;;  %v8644_v17 = vld [vmem:[#allocation6 + $0x720] sm:$0xff] }
  0xe4   : > { %2597 = vmatpush.bf16.msrb.mxu3 %v8604_v58 }
  0xe5   : > { %2430 = vmatpush.bf16.msrb.mxu0 %v8579_v59  ;;  %v8609_v59 = vld [vmem:[#allocation6 + $0x608] sm:$0xff] }
  0xe6   : > { %2443 = vmatpush.bf16.msrb.mxu1 %v8587_v60  ;;  %v8617_v60 = vld [vmem:[#allocation6 + $0x648] sm:$0xff] }
  0xe7   : > { %2585 = vmatpush.bf16.msrb.mxu2 %v8595_v61  ;;  %v8625_v61 = vld [vmem:[#allocation6 + $0x688] sm:$0xff] }
  0xe8   : > { %2598 = vmatpush.bf16.msrb.mxu3 %v8603_v62  ;;  %v8633_v62 = vld [vmem:[#allocation6 + $0x6c8] sm:$0xff] }
  0xe9   : > { %2431 = vmatpush.bf16.msrb.mxu0 %v8578_v3  ;;  %v8624_v3 = vld [vmem:[#allocation6 + $0x680] sm:$0xff] }
  0xea   : > { %2444 = vmatpush.bf16.msrb.mxu1 %v8586_v4  ;;  %v8632_v4 = vld [vmem:[#allocation6 + $0x6c0] sm:$0xff] }
  0xeb   : > { %2586 = vmatpush.bf16.msrb.mxu2 %v8594_v8  ;;  %v8671_v8 = vld [vmem:[#allocation6 + $0x7f8] sm:$0xff] }
  0xec   : > { %2599 = vmatpush.bf16.msrb.mxu3 %v8602_v9  ;;  %v8646_v9 = vld [vmem:[#allocation6 + $0x730] sm:$0xff] }
  0xed   : > { %2432 = vmatpush.bf16.msrb.mxu0 %v8577_v12  ;;  %v8670_v12 = vld [vmem:[#allocation6 + $0x7f0] sm:$0xff] }
  0xee   : > { %2445 = vmatpush.bf16.msrb.mxu1 %v8585_v13  ;;  %v8645_v13 = vld [vmem:[#allocation6 + $0x728] sm:$0xff] }
  0xef   : > { %2587 = vmatpush.bf16.msrb.mxu2 %v8593_v14  ;;  %v8653_v14 = vld [vmem:[#allocation6 + $0x768] sm:$0xff] }
  0xf0   : > { %2600 = vmatpush.bf16.msrb.mxu3 %v8601_v15  ;;  %v8661_v15 = vld [vmem:[#allocation6 + $0x7a8] sm:$0xff] }
  0xf1   : > { %2433 = vmatpush.bf16.msrb.mxu0 %v8576_v18  ;;  %v1171_v36 = vpop.f32.mrf.mxu0  ;;  %v8652_v18 = vld [vmem:[#allocation6 + $0x760] sm:$0xff] }
  0xf2   : > { %2446 = vmatpush.bf16.msrb.mxu1 %v8584_v19  ;;  %v1184_v37 = vpop.f32.mrf.mxu1 }
  0xf3   : > { %2588 = vmatpush.bf16.msrb.mxu2 %v8592_v20  ;;  %v1185_v49 = vadd.f32 %v1184_v37, %v1171_v36  ;;  %v8658_v36 = vld [vmem:[#allocation6 + $0x790] sm:$0xff] }
  0xf4   : > { %2601 = vmatpush.bf16.msrb.mxu3 %v8600_v21  ;;  %2434 = vmatmul.bf16.vlgmr.msrb.gmra.mxu0 %v9504_v39  ;;  %v8660_v21 = vld [vmem:[#allocation6 + $0x7a0] sm:$0xff]  ;;  %v8666_v37 = vld [vmem:[#allocation6 + $0x7d0] sm:$0xff] }
  0xf5   : > { %2742 = vmatpush.bf16.msra.mxu0 %v8615_v22  ;;  %2447 = vmatmul.bf16.vlgmr.msrb.gmra.mxu1 %v9506_v40  ;;  %v8668_v22 = vld [vmem:[#allocation6 + $0x7e0] sm:$0xff] }
  0xf6   : > { %2755 = vmatpush.bf16.msra.mxu1 %v8623_v23  ;;  %2589 = vmatmul.bf16.vlgmr.msrb.gmra.mxu2 %v9504_v39  ;;  %v8643_v23 = vld [vmem:[#allocation6 + $0x718] sm:$0xff] }
  0xf7   : > { %2897 = vmatpush.bf16.msra.mxu2 %v8631_v24  ;;  %2602 = vmatmul.bf16.vlgmr.msrb.gmra.mxu3 %v9506_v40  ;;  %v8651_v24 = vld [vmem:[#allocation6 + $0x758] sm:$0xff] }
  0xf8   : > { %2910 = vmatpush.bf16.msra.mxu3 %v8639_v25  ;;  %v8659_v25 = vld [vmem:[#allocation6 + $0x798] sm:$0xff] }
  0xf9   : > { %2743 = vmatpush.bf16.msra.mxu0 %v8614_v26  ;;  %v1326_v46 = vpop.f32.mrf.mxu2  ;;  %v1173_v53 = vpop.f32.mrf.mxu0  ;;  %v8667_v26 = vld [vmem:[#allocation6 + $0x7d8] sm:$0xff] }
  0xfa   : > { %2756 = vmatpush.bf16.msra.mxu1 %v8622_v27  ;;  %v1339_v47 = vpop.f32.mrf.mxu3  ;;  %v1186_v54 = vpop.f32.mrf.mxu1 }
  0xfb   : > { %2898 = vmatpush.bf16.msra.mxu2 %v8630_v28  ;;  %v1340_v48 = vadd.f32 %v1339_v47, %v1326_v46 }
  0xfc   : > { %2911 = vmatpush.bf16.msra.mxu3 %v8638_v29 }
  0xfd   : > { %2744 = vmatpush.bf16.msra.mxu0 %v8613_v30  ;;  %v1344_v50 = vrot.slane %v1340_v48, 4  ;;  %v8640_v48 = vld [vmem:[#allocation6 + $0x700] sm:$0xff] }
  0xfe   : > { %2757 = vmatpush.bf16.msra.mxu1 %v8621_v31  ;;  %v8642_v31 = vld [vmem:[#allocation6 + $0x710] sm:$0xff] }
  0xff   : > { %2899 = vmatpush.bf16.msra.mxu2 %v8629_v32  ;;  %v1346_v57 = vsel %vm1028_vm0, %v1185_v49, %v1344_v50  ;;  %v8650_v32 = vld [vmem:[#allocation6 + $0x750] sm:$0xff]  ;;  %v8648_v49 = vld [vmem:[#allocation6 + $0x740] sm:$0xff] }
 0x100   : > { %2912 = vmatpush.bf16.msra.mxu3 %v8637_v33  ;;  %v1347_v58 = vpack.c.bf16 %v1346_v57, %v1346_v57  ;;  %v8656_v50 = vld [vmem:[#allocation6 + $0x780] sm:$0xff] }
 0x101   : > { %2745 = vmatpush.bf16.msra.mxu0 %v8612_v34  ;;  %v1328_v63 = vpop.f32.mrf.mxu2 }
 0x102   : > { %2758 = vmatpush.bf16.msra.mxu1 %v8620_v35  ;;  %1348 = vst.msk [vmem:[#allocation2 + $0x4] sm:$0xf] %vm1031_vm1, %v1347_v58  ;;  %v1341_v0 = vpop.f32.mrf.mxu3 }
 0x103   : > { %2900 = vmatpush.bf16.msra.mxu2 %v8628_v38 }
 0x104   : > { %2913 = vmatpush.bf16.msra.mxu3 %v8636_v41 }
 0x105   : > { %2746 = vmatpush.bf16.msra.mxu0 %v8611_v42  ;;  %v8641_v42 = vld [vmem:[#allocation6 + $0x708] sm:$0xff] }
 0x106   : > { %2759 = vmatpush.bf16.msra.mxu1 %v8619_v43  ;;  %v8649_v43 = vld [vmem:[#allocation6 + $0x748] sm:$0xff] }
 0x107   : > { %2901 = vmatpush.bf16.msra.mxu2 %v8627_v44  ;;  %v8657_v44 = vld [vmem:[#allocation6 + $0x788] sm:$0xff] }
 0x108   : > { %2914 = vmatpush.bf16.msra.mxu3 %v8635_v45  ;;  %v8665_v45 = vld [vmem:[#allocation6 + $0x7c8] sm:$0xff] }
 0x109   : > { %2747 = vmatpush.bf16.msra.mxu0 %v8610_v51  ;;  %v8664_v51 = vld [vmem:[#allocation6 + $0x7c0] sm:$0xff] }
 0x10a   : > { %2760 = vmatpush.bf16.msra.mxu1 %v8618_v52 }
 0x10b   : > { %2902 = vmatpush.bf16.msra.mxu2 %v8626_v55 }
 0x10c   : > { %2915 = vmatpush.bf16.msra.mxu3 %v8634_v56 }
 0x10d   : > { %2748 = vmatpush.bf16.msra.mxu0 %v8609_v59 }
 0x10e   : > { %2761 = vmatpush.bf16.msra.mxu1 %v8617_v60 }
 0x10f   : > { %2903 = vmatpush.bf16.msra.mxu2 %v8625_v61 }
 0x110   : > { %2916 = vmatpush.bf16.msra.mxu3 %v8633_v62 }
 0x111   : > { %2749 = vmatpush.bf16.msra.mxu0 %v8608_v1  ;;  %v1487_v19 = vpop.f32.mrf.mxu0 }
 0x112   : > { %2762 = vmatpush.bf16.msra.mxu1 %v8616_v2  ;;  %v1500_v20 = vpop.f32.mrf.mxu1 }
 0x113   : > { %2904 = vmatpush.bf16.msra.mxu2 %v8624_v3  ;;  %v1501_v30 = vadd.f32 %v1500_v20, %v1487_v19 }
 0x114   : > { %2917 = vmatpush.bf16.msra.mxu3 %v8632_v4  ;;  %2750 = vmatmul.bf16.vlgmr.msra.gmra.mxu0 %v9504_v39 }
 0x115   : > { %3058 = vmatpush.bf16.msrb.mxu0 %v8647_v5  ;;  %2763 = vmatmul.bf16.vlgmr.msra.gmra.mxu1 %v9506_v40 }
 0x116   : > { %3071 = vmatpush.bf16.msrb.mxu1 %v8655_v6  ;;  %2905 = vmatmul.bf16.vlgmr.msra.gmra.mxu2 %v9504_v39 }
 0x117   : > { %3213 = vmatpush.bf16.msrb.mxu2 %v8663_v7  ;;  %2918 = vmatmul.bf16.vlgmr.msra.gmra.mxu3 %v9506_v40 }
 0x118   : > { %3226 = vmatpush.bf16.msrb.mxu3 %v8671_v8 }
 0x119   : > { %3059 = vmatpush.bf16.msrb.mxu0 %v8646_v9  ;;  %v1642_v27 = vpop.f32.mrf.mxu2  ;;  %v1489_v34 = vpop.f32.mrf.mxu0 }
 0x11a   : > { %3072 = vmatpush.bf16.msrb.mxu1 %v8654_v10  ;;  %v1655_v28 = vpop.f32.mrf.mxu3  ;;  %v1502_v35 = vpop.f32.mrf.mxu1 }
 0x11b   : > { %3214 = vmatpush.bf16.msrb.mxu2 %v8662_v11  ;;  %v1656_v29 = vadd.f32 %v1655_v28, %v1642_v27 }
 0x11c   : > { %3227 = vmatpush.bf16.msrb.mxu3 %v8670_v12 }
 0x11d   : > { %3060 = vmatpush.bf16.msrb.mxu0 %v8645_v13  ;;  %v1660_v33 = vrot.slane %v1656_v29, 4 }
 0x11e   : > { %3073 = vmatpush.bf16.msrb.mxu1 %v8653_v14 }
 0x11f   : > { %3215 = vmatpush.bf16.msrb.mxu2 %v8661_v15  ;;  %v1662_v38 = vsel %vm1028_vm0, %v1501_v30, %v1660_v33 }
 0x120   : > { %3228 = vmatpush.bf16.msrb.mxu3 %v8669_v16  ;;  %v1663_v41 = vpack.c.bf16 %v1662_v38, %v1662_v38 }
 0x121   : > { %3061 = vmatpush.bf16.msrb.mxu0 %v8644_v17  ;;  %v1644_v46 = vpop.f32.mrf.mxu2 }
 0x122   : > { %3074 = vmatpush.bf16.msrb.mxu1 %v8652_v18  ;;  %1664 = vst.msk [vmem:[#allocation2 + $0x8] sm:$0xf] %vm1031_vm1, %v1663_v41  ;;  %v1657_v47 = vpop.f32.mrf.mxu3  ;;  %v4092_v46 = vld [vmem:[%s9800_s7] sm:$0xff] }
 0x123   : > { %3216 = vmatpush.bf16.msrb.mxu2 %v8660_v21 }
 0x124   : > { %3229 = vmatpush.bf16.msrb.mxu3 %v8668_v22 }
 0x125   : > { %3062 = vmatpush.bf16.msrb.mxu0 %v8643_v23 }
 0x126   : > { %3075 = vmatpush.bf16.msrb.mxu1 %v8651_v24 }
 0x127   : > { %3217 = vmatpush.bf16.msrb.mxu2 %v8659_v25 }
 0x128   : > { %3230 = vmatpush.bf16.msrb.mxu3 %v8667_v26 }
 0x129   : > { %3063 = vmatpush.bf16.msrb.mxu0 %v8642_v31 }
 0x12a   : > { %3076 = vmatpush.bf16.msrb.mxu1 %v8650_v32 }
 0x12b   : > { %3218 = vmatpush.bf16.msrb.mxu2 %v8658_v36 }
 0x12c   : > { %3231 = vmatpush.bf16.msrb.mxu3 %v8666_v37 }
 0x12d   : > { %3064 = vmatpush.bf16.msrb.mxu0 %v8641_v42  ;;  %v3254_v42 = vld [vmem:[#allocation10] sm:$0xff] }
 0x12e   : > { %3077 = vmatpush.bf16.msrb.mxu1 %v8649_v43  ;;  %v9305_v43 = vmov 0  }
 0x12f   : > { %3219 = vmatpush.bf16.msrb.mxu2 %v8657_v44  ;;  %9012 = vset.pattern.permute.xlu0 %v9305_v43 }
 0x130   : > { %3232 = vmatpush.bf16.msrb.mxu3 %v8665_v45  ;;  %9013 = vset.pattern.permute.xlu1 %v9305_v43 }
 0x131   : > { %3065 = vmatpush.bf16.msrb.mxu0 %v8640_v48  ;;  %v1803_v52 = vpop.f32.mrf.mxu0  ;;  %3257 = vperm.xlu0 %9012, %v3254_v42   ;;  %v8718_v42 = vld [vmem:[#allocation11 + $0x150] sm:$0xff] }
 0x132   : > { %3078 = vmatpush.bf16.msrb.mxu1 %v8648_v49  ;;  %v1816_v53 = vpop.f32.mrf.mxu1  ;;  %9014 = vset.pattern.permute.xlu2 %v9305_v43  ;;  %v8722_v43 = vld [vmem:[#allocation11 + $0x170] sm:$0xff] }
 0x133   : > { %3220 = vmatpush.bf16.msrb.mxu2 %v8656_v50  ;;  %v1817_v57 = vadd.f32 %v1816_v53, %v1803_v52 }
 0x134   : > { %3233 = vmatpush.bf16.msrb.mxu3 %v8664_v51  ;;  %3066 = vmatmul.bf16.vlgmr.msrb.gmra.mxu0 %v9504_v39 }
 0x135   : > { %3079 = vmatmul.bf16.vlgmr.msrb.gmra.mxu1 %v9506_v40 }
 0x136   : > { %3221 = vmatmul.bf16.vlgmr.msrb.gmra.mxu2 %v9504_v39 }
 0x137   : > { %3234 = vmatmul.bf16.vlgmr.msrb.gmra.mxu3 %v9506_v40 }
 0x139   : > { %v1958_v54 = vpop.f32.mrf.mxu2  ;;  %v1805_v59 = vpop.f32.mrf.mxu0  ;;  %4096 = vperm.xlu0 %9012, %v4092_v46   ;;  %v8717_v46 = vld [vmem:[#allocation11 + $0x148] sm:$0xff] }
 0x13a   : > { %v1971_v55 = vpop.f32.mrf.mxu3  ;;  %v1818_v60 = vpop.f32.mrf.mxu1 }
 0x13b   : > { %v1972_v56 = vadd.f32 %v1971_v55, %v1958_v54  ;;  %v8672_v60 = vld [vmem:[#allocation2] sm:$0xff] }
 0x13d   : > { %v1976_v58 = vrot.slane %v1972_v56, 4  ;;  %v5944_v56 = vld [vmem:[%s9808_s15] sm:$0xf] }
 0x13f   : > { %v1978_v61 = vsel %vm1028_vm0, %v1817_v57, %v1976_v58 }
 0x140   : > { %v1979_v62 = vpack.c.bf16 %v1978_v61, %v1978_v61  ;;  %v3245_v61 = vld [vmem:[#allocation8] sm:$0xf] }
 0x141   : > { %v1960_v63 = vpop.f32.mrf.mxu2  ;;  %5947 = vperm.xlu0 %9012, %v5944_v56   ;;  %v8726_v56 = vld [vmem:[#allocation11 + $0x190] sm:$0xff] }
 0x142   : > { %1980 = vst.msk [vmem:[#allocation2 + $0xc] sm:$0xf] %vm1031_vm1, %v1979_v62  ;;  %v1973_v0 = vpop.f32.mrf.mxu3  ;;  %v8679_v62 = vld [vmem:[#allocation11 + $0x18] sm:$0xff] }
 0x143   : > { %v8683_v63 = vld [vmem:[#allocation11 + $0x38] sm:$0xff]  ;;  %3342 = vmatpush.bf16.msra.mxu1 %v8679_v62  ;;  %v8733_v62 = vld [vmem:[#allocation11 + $0x1c8] sm:$0xff] }
 0x144   : > { %v8687_v0 = vld [vmem:[#allocation11 + $0x58] sm:$0xff]  ;;  %3391 = vmatpush.bf16.msra.mxu2 %v8683_v63  ;;  %v8737_v63 = vld [vmem:[#allocation11 + $0x1e8] sm:$0xff] }
 0x145   : > { %3439 = vmatpush.bf16.msra.mxu3 %v8687_v0  ;;  %v8724_v0 = vld [vmem:[#allocation11 + $0x180] sm:$0xff] }
 0x149   : > { %v8673_v59 = vld [vmem:[#allocation2 + $0x8] sm:$0xff] }
 0x151   : > { %v2119_v1 = vpop.f32.mrf.mxu0 }
 0x152   : > { %v2132_v39 = vpop.f32.mrf.mxu1 }
 0x153   : > { %v2133_v4 = vadd.f32 %v2132_v39, %v2119_v1  ;;  %v8691_v1 = vld [vmem:[#allocation11 + $0x78] sm:$0xff]  ;;  %v8678_v39 = vld [vmem:[#allocation11 + $0x10] sm:$0xff] }
 0x154   : > { %3343 = vmatpush.bf16.msra.mxu1 %v8678_v39  ;;  %v8732_v39 = vld [vmem:[#allocation11 + $0x1c0] sm:$0xff] }
 0x159   : > { %v2274_v2 = vpop.f32.mrf.mxu2  ;;  %v2121_v6 = vpop.f32.mrf.mxu0 }
 0x15a   : > { %v2287_v40 = vpop.f32.mrf.mxu3  ;;  %v2134_v7 = vpop.f32.mrf.mxu1  ;;  %v8685_v6 = vld [vmem:[#allocation11 + $0x48] sm:$0xff] }
 0x15b   : > { %v2288_v3 = vadd.f32 %v2287_v40, %v2274_v2  ;;  %v8682_v2 = vld [vmem:[#allocation11 + $0x30] sm:$0xff]  ;;  %v8689_v7 = vld [vmem:[#allocation11 + $0x68] sm:$0xff] }
 0x15c   : > { %v8686_v40 = vld [vmem:[#allocation11 + $0x50] sm:$0xff]  ;;  %3392 = vmatpush.bf16.msra.mxu2 %v8682_v2  ;;  %v8736_v2 = vld [vmem:[#allocation11 + $0x1e0] sm:$0xff] }
 0x15d   : > { %v2292_v5 = vrot.slane %v2288_v3, 4  ;;  %v8690_v3 = vld [vmem:[#allocation11 + $0x70] sm:$0xff]  ;;  %3440 = vmatpush.bf16.msra.mxu3 %v8686_v40 }
 0x15f   : > { %v2294_v8 = vsel %vm1028_vm0, %v2133_v4, %v2292_v5  ;;  %v8677_v4 = vld [vmem:[#allocation11 + $0x8] sm:$0xff] }
 0x160   : > { %v2295_v9 = vpack.c.bf16 %v2294_v8, %v2294_v8  ;;  %v8681_v5 = vld [vmem:[#allocation11 + $0x28] sm:$0xff]  ;;  %3344 = vmatpush.bf16.msra.mxu1 %v8677_v4  ;;  %v8676_v8 = vld [vmem:[#allocation11] sm:$0xff] }
 0x161   : > { %v2276_v10 = vpop.f32.mrf.mxu2  ;;  %3393 = vmatpush.bf16.msra.mxu2 %v8681_v5  ;;  %3441 = vmatpush.bf16.msra.mxu3 %v8685_v6 }
 0x162   : > { %2296 = vst.msk [vmem:[#allocation2 + $0x10] sm:$0xf] %vm1031_vm1, %v2295_v9  ;;  %v2289_v11 = vpop.f32.mrf.mxu3  ;;  %v8680_v9 = vld [vmem:[#allocation11 + $0x20] sm:$0xff] }
 0x163   : > { %v8684_v10 = vld [vmem:[#allocation11 + $0x40] sm:$0xff] }
 0x164   : > { %v8688_v11 = vld [vmem:[#allocation11 + $0x60] sm:$0xff]  ;;  %3345 = vmatpush.bf16.msra.mxu1 %v8676_v8 }
 0x165   : > { %3394 = vmatpush.bf16.msra.mxu2 %v8680_v9  ;;  %3442 = vmatpush.bf16.msra.mxu3 %v8684_v10 }
 0x171   : > { %v2435_v12 = vpop.f32.mrf.mxu0 }
 0x172   : > { %v2448_v13 = vpop.f32.mrf.mxu1 }
 0x173   : > { %v2449_v17 = vadd.f32 %v2448_v13, %v2435_v12  ;;  %v8695_v12 = vld [vmem:[#allocation11 + $0x98] sm:$0xff] }
 0x174   : > { %v8699_v13 = vld [vmem:[#allocation11 + $0xb8] sm:$0xff]  ;;  %3535 = vmatpush.bf16.msrb.mxu1 %v8695_v12 }
 0x175   : > { %3583 = vmatpush.bf16.msrb.mxu2 %v8699_v13 }
 0x179   : > { %v2590_v14 = vpop.f32.mrf.mxu2  ;;  %v2437_v19 = vpop.f32.mrf.mxu0 }
 0x17a   : > { %v2603_v15 = vpop.f32.mrf.mxu3  ;;  %v2450_v20 = vpop.f32.mrf.mxu1  ;;  %v8706_v19 = vld [vmem:[#allocation11 + $0xf0] sm:$0xff] }
 0x17b   : > { %v2604_v16 = vadd.f32 %v2603_v15, %v2590_v14  ;;  %v8703_v14 = vld [vmem:[#allocation11 + $0xd8] sm:$0xff]  ;;  %v8693_v20 = vld [vmem:[#allocation11 + $0x88] sm:$0xff] }
 0x17c   : > { %v8707_v15 = vld [vmem:[#allocation11 + $0xf8] sm:$0xff]  ;;  %3631 = vmatpush.bf16.msrb.mxu3 %v8703_v14 }
 0x17d   : > { %v2608_v18 = vrot.slane %v2604_v16, 4  ;;  %v8694_v16 = vld [vmem:[#allocation11 + $0x90] sm:$0xff] }
 0x17e   : > { %3536 = vmatpush.bf16.msrb.mxu1 %v8694_v16 }
 0x17f   : > { %v2610_v21 = vsel %vm1028_vm0, %v2449_v17, %v2608_v18  ;;  %v8698_v17 = vld [vmem:[#allocation11 + $0xb0] sm:$0xff] }
 0x180   : > { %v2611_v22 = vpack.c.bf16 %v2610_v21, %v2610_v21  ;;  %v8702_v18 = vld [vmem:[#allocation11 + $0xd0] sm:$0xff]  ;;  %3584 = vmatpush.bf16.msrb.mxu2 %v8698_v17  ;;  %v8697_v21 = vld [vmem:[#allocation11 + $0xa8] sm:$0xff] }
 0x181   : > { %v2592_v23 = vpop.f32.mrf.mxu2  ;;  %3632 = vmatpush.bf16.msrb.mxu3 %v8702_v18 }
 0x182   : > { %2612 = vst.msk [vmem:[#allocation2 + $0x14] sm:$0xf] %vm1031_vm1, %v2611_v22  ;;  %v2605_v24 = vpop.f32.mrf.mxu3  ;;  %v8701_v22 = vld [vmem:[#allocation11 + $0xc8] sm:$0xff]  ;;  %3537 = vmatpush.bf16.msrb.mxu1 %v8693_v20 }
 0x183   : > { %v8705_v23 = vld [vmem:[#allocation11 + $0xe8] sm:$0xff]  ;;  %v8692_v24 = vld [vmem:[#allocation11 + $0x80] sm:$0xff] }
 0x184   : > { %3585 = vmatpush.bf16.msrb.mxu2 %v8697_v21 }
 0x185   : > { %3633 = vmatpush.bf16.msrb.mxu3 %v8701_v22 }
 0x186   : > { %3538 = vmatpush.bf16.msrb.mxu1 %v8692_v24 }
 0x189   : > { %v8674_v58 = vld [vmem:[#allocation2 + $0x10] sm:$0xff] }
 0x191   : > { %v2751_v25 = vpop.f32.mrf.mxu0 }
 0x192   : > { %v2764_v26 = vpop.f32.mrf.mxu1 }
 0x193   : > { %v2765_v30 = vadd.f32 %v2764_v26, %v2751_v25  ;;  %v8696_v25 = vld [vmem:[#allocation11 + $0xa0] sm:$0xff] }
 0x194   : > { %v8700_v26 = vld [vmem:[#allocation11 + $0xc0] sm:$0xff]  ;;  %3586 = vmatpush.bf16.msrb.mxu2 %v8696_v25 }
 0x195   : > { %3634 = vmatpush.bf16.msrb.mxu3 %v8700_v26 }
 0x199   : > { %v2906_v27 = vpop.f32.mrf.mxu2  ;;  %v2753_v32 = vpop.f32.mrf.mxu0 }
 0x19a   : > { %v2919_v28 = vpop.f32.mrf.mxu3  ;;  %v2766_v33 = vpop.f32.mrf.mxu1 }
 0x19b   : > { %v2920_v29 = vadd.f32 %v2919_v28, %v2906_v27  ;;  %v8704_v27 = vld [vmem:[#allocation11 + $0xe0] sm:$0xff]  ;;  %v8711_v33 = vld [vmem:[#allocation11 + $0x118] sm:$0xff] }
 0x19d   : > { %v2924_v31 = vrot.slane %v2920_v29, 4 }
 0x19f   : > { %v2926_v34 = vsel %vm1028_vm0, %v2765_v30, %v2924_v31 }
 0x1a0   : > { %v2927_v35 = vpack.c.bf16 %v2926_v34, %v2926_v34  ;;  %v8715_v34 = vld [vmem:[#allocation11 + $0x138] sm:$0xff] }
 0x1a1   : > { %v2908_v36 = vpop.f32.mrf.mxu2 }
 0x1a2   : > { %2928 = vst.msk [vmem:[#allocation2 + $0x18] sm:$0xf] %vm1031_vm1, %v2927_v35  ;;  %v2921_v37 = vpop.f32.mrf.mxu3  ;;  %v8719_v35 = vld [vmem:[#allocation11 + $0x158] sm:$0xff] }
 0x1a3   : > { %v3258_v28 = vpop.permute.xlu0 %3257  ;;  %v8723_v36 = vld [vmem:[#allocation11 + $0x178] sm:$0xff] }
 0x1b1   : > { %v3067_v38 = vpop.f32.mrf.mxu0 }
 0x1b2   : > { %v3080_v41 = vpop.f32.mrf.mxu1 }
 0x1b3   : > { %v3081_v47 = vadd.f32 %v3080_v41, %v3067_v38  ;;  %v8710_v38 = vld [vmem:[#allocation11 + $0x110] sm:$0xff] }
 0x1b4   : > { %v8714_v41 = vld [vmem:[#allocation11 + $0x130] sm:$0xff] }
 0x1b9   : > { %v3222_v44 = vpop.f32.mrf.mxu2  ;;  %v3069_v49 = vpop.f32.mrf.mxu0 }
 0x1ba   : > { %v3235_v45 = vpop.f32.mrf.mxu3  ;;  %v3082_v50 = vpop.f32.mrf.mxu1  ;;  %v8712_v49 = vld [vmem:[#allocation11 + $0x120] sm:$0xff] }
 0x1bb   : > { %v3236_v48 = vadd.f32 %v3235_v45, %v3222_v44  ;;  %v8709_v44 = vld [vmem:[#allocation11 + $0x108] sm:$0xff]  ;;  %v8716_v50 = vld [vmem:[#allocation11 + $0x140] sm:$0xff] }
 0x1bc   : > { %v8713_v45 = vld [vmem:[#allocation11 + $0x128] sm:$0xff] }
 0x1bd   : > { %v3240_v51 = vrot.slane %v3236_v48, 4  ;;  %v8708_v48 = vld [vmem:[#allocation11 + $0x100] sm:$0xff] }
 0x1bf   : > { %v3242_v52 = vsel %vm1028_vm0, %v3081_v47, %v3240_v51  ;;  %v8721_v47 = vld [vmem:[#allocation11 + $0x168] sm:$0xff]  ;;  %v8720_v51 = vld [vmem:[#allocation11 + $0x160] sm:$0xff] }
 0x1c0   : > { %v3243_v53 = vpack.c.bf16 %v3242_v52, %v3242_v52  ;;  %v8727_v52 = vld [vmem:[#allocation11 + $0x198] sm:$0xff] }
 0x1c1   : > { %v3224_v54 = vpop.f32.mrf.mxu2 }
 0x1c2   : > { %3244 = vst.msk [vmem:[#allocation2 + $0x1c] sm:$0xf] %vm1031_vm1, %v3243_v53  ;;  %v3237_v55 = vpop.f32.mrf.mxu3  ;;  %v8731_v53 = vld [vmem:[#allocation11 + $0x1b8] sm:$0xff] }
 0x1c3   : > { %v8735_v54 = vld [vmem:[#allocation11 + $0x1d8] sm:$0xff] }
 0x1c4   : > { %v8739_v55 = vld [vmem:[#allocation11 + $0x1f8] sm:$0xff] }
 0x1c9   : > { %v8675_v57 = vld [vmem:[#allocation2 + $0x18] sm:$0xff] }
 0x1ca   : > { %3292 = vmatpush.bf16.msra.mxu0 %v8675_v57  ;;  %v8730_v57 = vld [vmem:[#allocation11 + $0x1b0] sm:$0xff] }
 0x1ce   : > { %3293 = vmatpush.bf16.msra.mxu0 %v8674_v58  ;;  %v8734_v58 = vld [vmem:[#allocation11 + $0x1d0] sm:$0xff] }
 0x1d2   : > { %3294 = vmatpush.bf16.msra.mxu0 %v8673_v59  ;;  %v8738_v59 = vld [vmem:[#allocation11 + $0x1f0] sm:$0xff] }
 0x1d6   : > { %3295 = vmatpush.bf16.msra.mxu0 %v8672_v60  ;;  %v8725_v60 = vld [vmem:[#allocation11 + $0x188] sm:$0xff] }
 0x1d9   : > { %7347 = vmatmul.msk.bf16.vlgmr.msra.gmra.mxu0 %vm3284_vm2, %v3245_v61  ;;  %v8729_v61 = vld [vmem:[#allocation11 + $0x1a8] sm:$0xff] }
 0x1da   : > { %3487 = vmatpush.bf16.msrb.mxu0 %v8691_v1  ;;  %v8728_v1 = vld [vmem:[#allocation11 + $0x1a0] sm:$0xff] }
 0x1de   : > { %3488 = vmatpush.bf16.msrb.mxu0 %v8690_v3 }
 0x1e2   : > { %3489 = vmatpush.bf16.msrb.mxu0 %v8689_v7 }
 0x1e6   : > { %3490 = vmatpush.bf16.msrb.mxu0 %v8688_v11 }
 0x1ea   : > { %3679 = vmatpush.bf16.msra.mxu0 %v8707_v15 }
 0x1ee   : > { %3680 = vmatpush.bf16.msra.mxu0 %v8706_v19 }
 0x1f2   : > { %3681 = vmatpush.bf16.msra.mxu0 %v8705_v23 }
 0x1f6   : > { %3682 = vmatpush.bf16.msra.mxu0 %v8704_v27 }
 0x256   : > { %v3297_v29 = vpop.f32.mrf.mxu0 }
 0x257   : > { %v3298_v30 = vadd.f32 %v3297_v29, %v3258_v28 }
 0x259   : > { %v3301_v31 = vmax.f32 %v3298_v30, 0.0 }
 0x25b   : > { %v9563_v32 = vpack.c.bf16 %v3301_v31, %v3301_v31 }
 0x25d   : > { %7364 = vmatmul.msk.bf16.vlgmr.msra.gmra.mxu1 %vm3284_vm2, %v9563_v32  ;;  %7381 = vmatmul.msk.bf16.vlgmr.msra.gmra.mxu2 %vm3284_vm2, %v9563_v32 }
 0x25e   : > { %7398 = vmatmul.msk.bf16.vlgmr.msra.gmra.mxu3 %vm3284_vm2, %v9563_v32  ;;  %7415 = vmatmul.msk.bf16.vlgmr.msrb.gmra.mxu0 %vm3284_vm2, %v9563_v32  ;;  %v3299_v37 = vpop.f32.mrf.mxu0 }
 0x25f   : > { %3727 = vmatpush.bf16.msra.mxu1 %v8711_v33  ;;  %3775 = vmatpush.bf16.msra.mxu2 %v8715_v34 }
 0x260   : > { %3823 = vmatpush.bf16.msra.mxu3 %v8719_v35  ;;  %3871 = vmatpush.bf16.msrb.mxu0 %v8723_v36 }
 0x263   : > { %3728 = vmatpush.bf16.msra.mxu1 %v8710_v38  ;;  %3776 = vmatpush.bf16.msra.mxu2 %v8714_v41 }
 0x264   : > { %3824 = vmatpush.bf16.msra.mxu3 %v8718_v42  ;;  %3872 = vmatpush.bf16.msrb.mxu0 %v8722_v43 }
 0x267   : > { %3729 = vmatpush.bf16.msra.mxu1 %v8709_v44  ;;  %3777 = vmatpush.bf16.msra.mxu2 %v8713_v45 }
 0x268   : > { %3825 = vmatpush.bf16.msra.mxu3 %v8717_v46  ;;  %3873 = vmatpush.bf16.msrb.mxu0 %v8721_v47 }
 0x26b   : > { %3730 = vmatpush.bf16.msra.mxu1 %v8708_v48  ;;  %3778 = vmatpush.bf16.msra.mxu2 %v8712_v49 }
 0x26c   : > { %3826 = vmatpush.bf16.msra.mxu3 %v8716_v50  ;;  %3874 = vmatpush.bf16.msrb.mxu0 %v8720_v51 }
 0x26d   : > { %7432 = vmatmul.msk.bf16.vlgmr.msrb.gmra.mxu1 %vm3284_vm2, %v9563_v32  ;;  %7449 = vmatmul.msk.bf16.vlgmr.msrb.gmra.mxu2 %vm3284_vm2, %v9563_v32 }
 0x26e   : > { %7466 = vmatmul.msk.bf16.vlgmr.msrb.gmra.mxu3 %vm3284_vm2, %v9563_v32  ;;  %7483 = vmatmul.msk.bf16.vlgmr.msra.gmra.mxu0 %vm3284_vm2, %v9563_v32 }
 0x26f   : > { %3919 = vmatpush.bf16.msrb.mxu1 %v8727_v52  ;;  %3967 = vmatpush.bf16.msrb.mxu2 %v8731_v53  ;;  %v4093_v53 = vld [vmem:[%s9800_s7 + $0x8] sm:$0xff] }
 0x270   : > { %4015 = vmatpush.bf16.msrb.mxu3 %v8735_v54  ;;  %4063 = vmatpush.bf16.msra.mxu0 %v8739_v55  ;;  %v4178_v55 = vld [vmem:[%s9802_s9 + $0x8] sm:$0xff] }
 0x271   : > { %4101 = vperm.xlu1 %9013, %v4093_v53  }
 0x273   : > { %3920 = vmatpush.bf16.msrb.mxu1 %v8726_v56  ;;  %3968 = vmatpush.bf16.msrb.mxu2 %v8730_v57 }
 0x274   : > { %4016 = vmatpush.bf16.msrb.mxu3 %v8734_v58  ;;  %4064 = vmatpush.bf16.msra.mxu0 %v8738_v59 }
 0x277   : > { %3921 = vmatpush.bf16.msrb.mxu1 %v8725_v60  ;;  %3969 = vmatpush.bf16.msrb.mxu2 %v8729_v61 }
 0x278   : > { %4017 = vmatpush.bf16.msrb.mxu3 %v8733_v62  ;;  %4065 = vmatpush.bf16.msra.mxu0 %v8737_v63  ;;  %v8740_v62 = vld [vmem:[#allocation13] sm:$0xff]  ;;  %v4177_v63 = vld [vmem:[%s9802_s9] sm:$0xff] }
 0x279   : > { %4186 = vperm.xlu1 %9013, %v4178_v55   ;;  %4181 = vperm.xlu2 %9014, %v4177_v63  }
 0x27b   : > { %3922 = vmatpush.bf16.msrb.mxu1 %v8724_v0  ;;  %3970 = vmatpush.bf16.msrb.mxu2 %v8728_v1  ;;  %v4624_v0 = vld [vmem:[%s9805_s12] sm:$0xff] }
 0x27c   : > { %4018 = vmatpush.bf16.msrb.mxu3 %v8732_v39  ;;  %4066 = vmatpush.bf16.msra.mxu0 %v8736_v2  ;;  %v4097_v39 = vpop.permute.xlu0 %4096 }
 0x27d   : > { %7500 = vmatmul.msk.bf16.vlgmr.msra.gmra.mxu1 %vm3284_vm2, %v9563_v32  ;;  %7517 = vmatmul.msk.bf16.vlgmr.msra.gmra.mxu2 %vm3284_vm2, %v9563_v32 }
 0x27e   : > { %7534 = vmatmul.msk.bf16.vlgmr.msra.gmra.mxu3 %vm3284_vm2, %v9563_v32  ;;  %7551 = vmatmul.msk.bf16.vlgmr.msrb.gmra.mxu0 %vm3284_vm2, %v9563_v32 }
 0x281   : > { %4627 = vperm.xlu2 %9014, %v4624_v0  }
 0x28d   : > { %7568 = vmatmul.msk.bf16.vlgmr.msrb.gmra.mxu1 %vm3284_vm2, %v9563_v32  ;;  %7585 = vmatmul.msk.bf16.vlgmr.msrb.gmra.mxu2 %vm3284_vm2, %v9563_v32 }
 0x28e   : > { %7602 = vmatmul.msk.bf16.vlgmr.msrb.gmra.mxu3 %vm3284_vm2, %v9563_v32  ;;  %7619 = vmatmul.msk.bf16.vlgmr.msra.gmra.mxu0 %vm3284_vm2, %v9563_v32 }
 0x2da   : > { %v3347_v40 = vpop.f32.mrf.mxu1 }
 0x2db   : > { %v3351_v3 = vpack.c.bf16 %v3347_v40, %v3347_v40  ;;  %v3492_v4 = vpop.f32.mrf.mxu0 }
 0x2dc   : > { %v3496_v5 = vpack.c.bf16 %v3492_v4, %v3492_v4 }
 0x2dd   : > { %3353 = vst.msk [vmem:[#allocation3] sm:$0xf] %vm3352_vm3, %v3351_v3 }
 0x2de   : > { %3497 = vst.msk [vmem:[#allocation3 + $0xc] sm:$0xf] %vm3352_vm3, %v3496_v5 }
 0x2e0   : > { %v3396_v6 = vpop.f32.mrf.mxu2 }
 0x2e1   : > { %v3400_v7 = vpack.c.bf16 %v3396_v6, %v3396_v6  ;;  %v3444_v8 = vpop.f32.mrf.mxu3 }
 0x2e2   : > { %v3448_v9 = vpack.c.bf16 %v3444_v8, %v3444_v8  ;;  %v3349_v10 = vpop.f32.mrf.mxu1  ;;  %v8749_v8 = vld [vmem:[#allocation14] sm:$0xff] }
 0x2e3   : > { %3401 = vst.msk [vmem:[#allocation3 + $0x4] sm:$0xf] %vm3352_vm3, %v3400_v7  ;;  %v3494_v11 = vpop.f32.mrf.mxu0  ;;  %v4102_v40 = vpop.permute.xlu1 %4101  ;;  %v8751_v10 = vld [vmem:[%s9803_s10 + $0x8] sm:$0xff] }
 0x2e4   : > { %3449 = vst.msk [vmem:[#allocation3 + $0x8] sm:$0xf] %vm3352_vm3, %v3448_v9  ;;  %v8750_v9 = vld [vmem:[%s9803_s10] sm:$0xff]  ;;  %v8752_v11 = vld [vmem:[%s9803_s10 + $0x10] sm:$0xff]  ;;  %4263 = vmatpush.bf16.msrb.mxu0 %v8751_v10 }
 0x2e5   : > { %4239 = vmatpush.bf16.msra.mxu3 %v8750_v9 }
 0x2e8   : > { %v3398_v12 = vpop.f32.mrf.mxu2 }
 0x2e9   : > { %v3446_v13 = vpop.f32.mrf.mxu3  ;;  %v8755_v12 = vld [vmem:[%s9803_s10 + $0x28] sm:$0xff] }
 0x2ea   : > { %v3540_v14 = vpop.f32.mrf.mxu1  ;;  %v8741_v61 = vld [vmem:[#allocation3] sm:$0xff]  ;;  %v8753_v13 = vld [vmem:[%s9803_s10 + $0x18] sm:$0xff] }
 0x2eb   : > { %v3544_v15 = vpack.c.bf16 %v3540_v14, %v3540_v14  ;;  %v3684_v16 = vpop.f32.mrf.mxu0  ;;  %v8742_v60 = vld [vmem:[#allocation3 + $0x8] sm:$0xff]  ;;  %v8754_v14 = vld [vmem:[%s9803_s10 + $0x20] sm:$0xff]  ;;  %4311 = vmatpush.bf16.msrb.mxu3 %v8753_v13 }
 0x2ec   : > { %v3688_v17 = vpack.c.bf16 %v3684_v16, %v3684_v16  ;;  %v4182_v16 = vpop.permute.xlu2 %4181  ;;  %4335 = vmatpush.bf16.msra.mxu0 %v8754_v14 }
 0x2ed   : > { %3545 = vst.msk [vmem:[#allocation3 + $0x10] sm:$0xf] %vm3352_vm3, %v3544_v15  ;;  %v8756_v15 = vld [vmem:[%s9803_s10 + $0x30] sm:$0xff] }
 0x2ee   : > { %3689 = vst.msk [vmem:[#allocation3 + $0x1c] sm:$0xf] %vm3352_vm3, %v3688_v17  ;;  %v8759_v17 = vld [vmem:[%s9803_s10 + $0x48] sm:$0xff] }
 0x2f0   : > { %v3588_v18 = vpop.f32.mrf.mxu2 }
 0x2f1   : > { %v3592_v19 = vpack.c.bf16 %v3588_v18, %v3588_v18  ;;  %v3636_v20 = vpop.f32.mrf.mxu3 }
 0x2f2   : > { %v3640_v21 = vpack.c.bf16 %v3636_v20, %v3636_v20  ;;  %v3542_v22 = vpop.f32.mrf.mxu1  ;;  %v4187_v20 = vpop.permute.xlu1 %4186 }
 0x2f3   : > { %3593 = vst.msk [vmem:[#allocation3 + $0x14] sm:$0xf] %vm3352_vm3, %v3592_v19  ;;  %v3686_v23 = vpop.f32.mrf.mxu0 }
 0x2f4   : > { %3641 = vst.msk [vmem:[#allocation3 + $0x18] sm:$0xf] %vm3352_vm3, %v3640_v21 }
 0x2f8   : > { %v3590_v24 = vpop.f32.mrf.mxu2 }
 0x2f9   : > { %v3638_v25 = vpop.f32.mrf.mxu3 }
 0x2fa   : > { %v3732_v26 = vpop.f32.mrf.mxu1  ;;  %v8743_v59 = vld [vmem:[#allocation3 + $0x10] sm:$0xff]  ;;  %v4214_v25 = vld [vmem:[%s695_s1] sm:$0xff] }
 0x2fb   : > { %v3736_v27 = vpack.c.bf16 %v3732_v26, %v3732_v26  ;;  %v3876_v28 = vpop.f32.mrf.mxu0  ;;  %v8744_v58 = vld [vmem:[#allocation3 + $0x18] sm:$0xff] }
 0x2fc   : > { %v3880_v29 = vpack.c.bf16 %v3876_v28, %v3876_v28 }
 0x2fd   : > { %3737 = vst.msk [vmem:[#allocation3 + $0x20] sm:$0xf] %vm3352_vm3, %v3736_v27 }
 0x2fe   : > { %3881 = vst.msk [vmem:[#allocation3 + $0x2c] sm:$0xf] %vm3352_vm3, %v3880_v29 }
 0x300   : > { %v3780_v30 = vpop.f32.mrf.mxu2 }
 0x301   : > { %v3784_v31 = vpack.c.bf16 %v3780_v30, %v3780_v30  ;;  %v3828_v32 = vpop.f32.mrf.mxu3  ;;  %v8757_v30 = vld [vmem:[%s9803_s10 + $0x38] sm:$0xff] }
 0x302   : > { %v3832_v33 = vpack.c.bf16 %v3828_v32, %v3828_v32  ;;  %v3734_v34 = vpop.f32.mrf.mxu1  ;;  %v8760_v32 = vld [vmem:[%s9803_s10 + $0x50] sm:$0xff] }
 0x303   : > { %3785 = vst.msk [vmem:[#allocation3 + $0x24] sm:$0xf] %vm3352_vm3, %v3784_v31  ;;  %v3878_v35 = vpop.f32.mrf.mxu0  ;;  %v8758_v31 = vld [vmem:[%s9803_s10 + $0x40] sm:$0xff]  ;;  %v8761_v34 = vld [vmem:[%s9803_s10 + $0x58] sm:$0xff] }
 0x304   : > { %3833 = vst.msk [vmem:[#allocation3 + $0x28] sm:$0xf] %vm3352_vm3, %v3832_v33  ;;  %v8763_v33 = vld [vmem:[%s9803_s10 + $0x68] sm:$0xff]  ;;  %v8762_v35 = vld [vmem:[%s9803_s10 + $0x60] sm:$0xff] }
 0x308   : > { %v3782_v36 = vpop.f32.mrf.mxu2 }
 0x309   : > { %v3830_v37 = vpop.f32.mrf.mxu3  ;;  %v8764_v36 = vld [vmem:[%s9803_s10 + $0x70] sm:$0xff] }
 0x30a   : > { %v3924_v38 = vpop.f32.mrf.mxu1  ;;  %v8745_v57 = vld [vmem:[#allocation3 + $0x20] sm:$0xff]  ;;  %v8765_v37 = vld [vmem:[%s9803_s10 + $0x78] sm:$0xff] }
 0x30b   : > { %v3928_v41 = vpack.c.bf16 %v3924_v38, %v3924_v38  ;;  %v4068_v42 = vpop.f32.mrf.mxu0  ;;  %v8746_v56 = vld [vmem:[#allocation3 + $0x28] sm:$0xff] }
 0x30c   : > { %v4072_v43 = vpack.c.bf16 %v4068_v42, %v4068_v42 }
 0x30d   : > { %3929 = vst.msk [vmem:[#allocation3 + $0x30] sm:$0xf] %vm3352_vm3, %v3928_v41 }
 0x30e   : > { %4073 = vst.msk [vmem:[#allocation3 + $0x3c] sm:$0xf] %vm3352_vm3, %v4072_v43 }
 0x310   : > { %v3972_v44 = vpop.f32.mrf.mxu2 }
 0x311   : > { %v3976_v45 = vpack.c.bf16 %v3972_v44, %v3972_v44  ;;  %v4020_v46 = vpop.f32.mrf.mxu3 }
 0x312   : > { %v4024_v47 = vpack.c.bf16 %v4020_v46, %v4020_v46  ;;  %v3926_v48 = vpop.f32.mrf.mxu1 }
 0x313   : > { %3977 = vst.msk [vmem:[#allocation3 + $0x34] sm:$0xf] %vm3352_vm3, %v3976_v45  ;;  %v4070_v49 = vpop.f32.mrf.mxu0 }
 0x314   : > { %4025 = vst.msk [vmem:[#allocation3 + $0x38] sm:$0xf] %vm3352_vm3, %v4024_v47 }
 0x318   : > { %v3974_v50 = vpop.f32.mrf.mxu2 }
 0x319   : > { %v4022_v51 = vpop.f32.mrf.mxu3 }
 0x31a   : > { %v8747_v54 = vld [vmem:[#allocation3 + $0x30] sm:$0xff] }
 0x31b   : > { %v8748_v52 = vld [vmem:[#allocation3 + $0x38] sm:$0xff] }
 0x31c   : > { %4158 = vmatpush.bf16.msra.mxu1 %v8748_v52 }
 0x320   : > { %4159 = vmatpush.bf16.msra.mxu1 %v8747_v54 }
 0x324   : > { %4160 = vmatpush.bf16.msra.mxu1 %v8746_v56 }
 0x328   : > { %4161 = vmatpush.bf16.msra.mxu1 %v8745_v57 }
 0x32c   : > { %4162 = vmatpush.bf16.msra.mxu1 %v8744_v58 }
 0x330   : > { %4163 = vmatpush.bf16.msra.mxu1 %v8743_v59 }
 0x334   : > { %4164 = vmatpush.bf16.msra.mxu1 %v8742_v60 }
 0x338   : > { %4165 = vmatpush.bf16.msra.mxu1 %v8741_v61 }
 0x33b   : > { %4166 = vmatmul.bf16.vlgmr.msra.gmra.mxu1 %v8740_v62 }
 0x33c   : > { %4359 = vmatpush.bf16.msrb.mxu1 %v8755_v12 }
 0x340   : > { %4455 = vmatpush.bf16.msra.mxu1 %v8759_v17 }
 0x3b8   : > { %v4167_v1 = vpop.f32.mrf.mxu1 }
 0x3b9   : > { %v4168_v2 = vadd.f32 %v4167_v1, %v4097_v39 }
 0x3bb   : > { %v4172_v5 = vmax.f32 %v4168_v2, 0.0 }
 0x3c0   : > { %v4169_v3 = vpop.f32.mrf.mxu1 }
 0x3c1   : > { %v4170_v4 = vadd.f32 %v4169_v3, %v4102_v40 }
 0x3c3   : > { %v4173_v6 = vmax.f32 %v4170_v4, 0.0 }
 0x3c5   : > { %v4176_v7 = vpack.c.bf16 %v4173_v6, %v4172_v5 }
 0x3c7   : > { %4205 = vmatpush.bf16.msra.mxu2 %v4176_v7 }
 0x3ca   : > { %7660 = vmatmul.msk.bf16.vlgmr.msra.gmra.mxu2 %vm4194_vm4, %v8749_v8 }
 0x3cb   : > { %4287 = vmatpush.bf16.msrb.mxu2 %v8752_v11 }
 0x3cf   : > { %4383 = vmatpush.bf16.msra.mxu2 %v8756_v15 }
 0x44d   : > { %v4207_v18 = vpop.f32.mrf.mxu2 }
 0x44e   : > { %v4208_v19 = vadd.f32 %v4207_v18, %v4182_v16 }
 0x450   : > { %4212 = vst.msk [vmem:[%s705_s0] sm:$0xff] %vm4194_vm4, %v4208_v19 }
 0x455   : > { %v4209_v21 = vpop.f32.mrf.mxu2 }
 0x456   : > { %v4210_v22 = vadd.f32 %v4209_v21, %v4187_v20 }
 0x458   : > { %4213 = vst.msk [vmem:[%s705_s0 + $0x8] sm:$0xff] %vm4194_vm4, %v4210_v22  ;;  %v4215_v23 = vmul.f32 0.5, %v4210_v22 }
 0x45a   : > { %v4216_v24 = vmul.f32 1.442695, %v4215_v23  ;;  %v7829_v23 = vld [vmem:[#allocation17 + $0x30] sm:$0xf] }
 0x45c   : > { %9015 = vpow2.f32 %v4216_v24  ;;  %v8781_v24 = vld [vmem:[#allocation17 + $0x34] sm:$0xf0] }
 0x462   : > { %v9016_v26 = vpop.eup %9015 }
 0x463   : > { %v4218_v27 = vmul.f32 %v9016_v26, %v4214_v25  ;;  %v8780_v25 = vld [vmem:[#allocation17 + $0x34] sm:$0xf]  ;;  %v7830_v26 = vor.u32 %v8781_v24, %v7829_v23  ;;  %v7999_v24 = vld [vmem:[#allocation17 + $0x170] sm:$0xf] }
 0x465   : > { %v4219_v28 = vadd.f32 %v4218_v27, %v4208_v19  ;;  %v7831_v27 = vld [vmem:[#allocation17 + $0x38] sm:$0xf0] }
 0x467   : > { %v4220_v29 = vpack.c.bf16 %v4219_v28, %v4219_v28  ;;  %v7863_v28 = vld [vmem:[#allocation17 + $0x70] sm:$0xf] }
 0x469   : > { %7665 = vmatmul.msk.bf16.vlgmr.msra.gmra.mxu3 %vm4194_vm4, %v4220_v29  ;;  %7672 = vmatmul.msk.bf16.vlgmr.msrb.gmra.mxu0 %vm4194_vm4, %v4220_v29 }
 0x46a   : > { %7679 = vmatmul.msk.bf16.vlgmr.msrb.gmra.mxu2 %vm4194_vm4, %v4220_v29  ;;  %7700 = vmatmul.msk.bf16.vlgmr.msrb.gmra.mxu1 %vm4194_vm4, %v4220_v29 }
 0x46b   : > { %4407 = vmatpush.bf16.msra.mxu3 %v8757_v30  ;;  %4431 = vmatpush.bf16.msrb.mxu0 %v8758_v31  ;;  %v7834_v31 = vor.u32 %v8780_v25, %v7831_v27  ;;  %v8821_v25 = vld [vmem:[#allocation17 + $0x174] sm:$0xf0] }
 0x46c   : > { %4479 = vmatpush.bf16.msrb.mxu2 %v8760_v32  ;;  %4551 = vmatpush.bf16.msrb.mxu1 %v8763_v33  ;;  %v7821_v33 = vld [vmem:[#allocation17 + $0x20] sm:$0xf]  ;;  %v8000_v27 = vor.u32 %v8821_v25, %v7999_v24 }
 0x479   : > { %7686 = vmatmul.msk.bf16.vlgmr.msrb.gmra.mxu3 %vm4194_vm4, %v4220_v29  ;;  %7693 = vmatmul.msk.bf16.vlgmr.msra.gmra.mxu0 %vm4194_vm4, %v4220_v29 }
 0x47a   : > { %7707 = vmatmul.msk.bf16.vlgmr.msra.gmra.mxu2 %vm4194_vm4, %v4220_v29  ;;  %7728 = vmatmul.msk.bf16.vlgmr.msra.gmra.mxu1 %vm4194_vm4, %v4220_v29 }
 0x47b   : > { %4503 = vmatpush.bf16.msrb.mxu3 %v8761_v34  ;;  %4527 = vmatpush.bf16.msra.mxu0 %v8762_v35  ;;  %v8779_v34 = vld [vmem:[#allocation17 + $0x24] sm:$0xf0]  ;;  %v8778_v35 = vld [vmem:[#allocation17 + $0x24] sm:$0xf] }
 0x47c   : > { %4575 = vmatpush.bf16.msra.mxu2 %v8764_v36  ;;  %4748 = vmatpush.bf16.msra.mxu1 %v7830_v26  ;;  %v7823_v36 = vld [vmem:[#allocation17 + $0x28] sm:$0xf0]  ;;  %v8786_v26 = vld [vmem:[#allocation17 + $0x64] sm:$0xf] }
 0x489   : > { %7714 = vmatmul.msk.bf16.vlgmr.msra.gmra.mxu3 %vm4194_vm4, %v4220_v29  ;;  %7721 = vmatmul.msk.bf16.vlgmr.msrb.gmra.mxu0 %vm4194_vm4, %v4220_v29 }
 0x48a   : > { %7735 = vmatmul.msk.bf16.vlgmr.msrb.gmra.mxu2 %vm4194_vm4, %v4220_v29  ;;  %7756 = vmatmul.msk.bf16.vlgmr.msrb.gmra.mxu1 %vm4194_vm4, %v4220_v29 }
 0x48b   : > { %4599 = vmatpush.bf16.msra.mxu3 %v8765_v37  ;;  %4761 = vmatpush.bf16.msrb.mxu2 %v7834_v31  ;;  %v7822_v37 = vor.u32 %v8779_v34, %v7821_v33  ;;  %v8794_v33 = vld [vmem:[#allocation17 + $0xa4] sm:$0xf]  ;;  %v7891_v34 = vld [vmem:[#allocation17 + $0xa8] sm:$0xf0] }
 0x48d   : > { %4749 = vmatpush.bf16.msra.mxu1 %v7822_v37  ;;  %v8819_v37 = vld [vmem:[#allocation17 + $0x164] sm:$0xf0] }
 0x499   : > { %7742 = vmatmul.msk.bf16.vlgmr.msrb.gmra.mxu3 %vm4194_vm4, %v4220_v29  ;;  %7749 = vmatmul.msk.bf16.vlgmr.msra.gmra.mxu0 %vm4194_vm4, %v4220_v29 }
 0x49a   : > { %7763 = vmatmul.msk.bf16.vlgmr.msra.gmra.mxu2 %vm4194_vm4, %v4220_v29 }
 0x4a9   : > { %7770 = vmatmul.msk.bf16.vlgmr.msra.gmra.mxu3 %vm4194_vm4, %v4220_v29  ;;  %v8789_v29 = vld [vmem:[#allocation17 + $0x74] sm:$0xf0] }
 0x4aa   : > { %v7864_v32 = vor.u32 %v8789_v29, %v7863_v28  ;;  %v7857_v28 = vld [vmem:[#allocation17 + $0x68] sm:$0xf0]  ;;  %v7889_v29 = vld [vmem:[#allocation17 + $0xa0] sm:$0xf] }
 0x4ab   : > { %v7860_v31 = vor.u32 %v8786_v26, %v7857_v28  ;;  %v7917_v28 = vld [vmem:[#allocation17 + $0xd8] sm:$0xf0] }
 0x4ac   : > { %4825 = vmatpush.bf16.msrb.mxu3 %v7864_v32 }
 0x4e6   : > { %v4265_v38 = vpop.f32.mrf.mxu0 }
 0x4e7   : > { %v4269_v41 = vpack.c.bf16 %v4265_v38, %v4265_v38  ;;  %v4361_v42 = vpop.f32.mrf.mxu1  ;;  %v7826_v38 = vor.u32 %v8778_v35, %v7823_v36  ;;  %v7991_v35 = vld [vmem:[#allocation17 + $0x160] sm:$0xf]  ;;  %v7894_v36 = vor.u32 %v8794_v33, %v7891_v34  ;;  %v8808_v33 = vld [vmem:[#allocation17 + $0x114] sm:$0xf]  ;;  %v7951_v34 = vld [vmem:[#allocation17 + $0x118] sm:$0xf0] }
 0x4e8   : > { %v4365_v43 = vpack.c.bf16 %v4361_v42, %v4361_v42  ;;  %v8787_v42 = vld [vmem:[#allocation17 + $0x64] sm:$0xf0] }
 0x4e9   : > { %4270 = vst.msk [vmem:[#allocation4 + $0x4] sm:$0xf] %vm1031_vm1, %v4269_v41  ;;  %v7855_v41 = vld [vmem:[#allocation17 + $0x60] sm:$0xf]  ;;  %4762 = vmatpush.bf16.msrb.mxu2 %v7826_v38  ;;  %v8784_v38 = vld [vmem:[#allocation17 + $0x54] sm:$0xf] }
 0x4ea   : > { %4366 = vst.msk [vmem:[#allocation4 + $0x14] sm:$0xf] %vm1031_vm1, %v4365_v43  ;;  %v7856_v43 = vor.u32 %v8787_v42, %v7855_v41  ;;  %v7849_v41 = vld [vmem:[#allocation17 + $0x58] sm:$0xf0]  ;;  %v7992_v42 = vor.u32 %v8819_v37, %v7991_v35  ;;  %v8051_v35 = vld [vmem:[#allocation17 + $0x1d0] sm:$0xf] }
 0x4ec   : > { %v4241_v44 = vpop.f32.mrf.mxu3  ;;  %4826 = vmatpush.bf16.msrb.mxu3 %v7856_v43  ;;  %v7881_v43 = vld [vmem:[#allocation17 + $0x90] sm:$0xf] }
 0x4ed   : > { %v4245_v45 = vpack.c.bf16 %v4241_v44, %v4241_v44  ;;  %v4289_v46 = vpop.f32.mrf.mxu2 }
 0x4ee   : > { %v4293_v47 = vpack.c.bf16 %v4289_v46, %v4289_v46  ;;  %v4267_v48 = vpop.f32.mrf.mxu0 }
 0x4ef   : > { %4246 = vst.msk [vmem:[#allocation4] sm:$0xf] %vm1031_vm1, %v4245_v45  ;;  %v4363_v49 = vpop.f32.mrf.mxu1 }
 0x4f0   : > { %4294 = vst.msk [vmem:[#allocation4 + $0x8] sm:$0xf] %vm1031_vm1, %v4293_v47  ;;  %v7931_v49 = vld [vmem:[#allocation17 + $0xf0] sm:$0xf] }
 0x4f4   : > { %v4243_v50 = vpop.f32.mrf.mxu3 }
 0x4f5   : > { %v4291_v51 = vpop.f32.mrf.mxu2  ;;  %v8805_v50 = vld [vmem:[#allocation17 + $0xf4] sm:$0xf0] }
 0x4f6   : > { %v4337_v52 = vpop.f32.mrf.mxu0  ;;  %v7932_v51 = vor.u32 %v8805_v50, %v7931_v49  ;;  %v8817_v49 = vld [vmem:[#allocation17 + $0x154] sm:$0xf0] }
 0x4f7   : > { %v4341_v53 = vpack.c.bf16 %v4337_v52, %v4337_v52  ;;  %v4457_v54 = vpop.f32.mrf.mxu1  ;;  %v8766_v52 = vld [vmem:[#allocation4] sm:$0xff] }
 0x4f8   : > { %v4461_v55 = vpack.c.bf16 %v4457_v54, %v4457_v54  ;;  %v8803_v54 = vld [vmem:[#allocation17 + $0xe4] sm:$0xf0] }
 0x4f9   : > { %4342 = vst.msk [vmem:[#allocation4 + $0x10] sm:$0xf] %vm1031_vm1, %v4341_v53  ;;  %v7923_v53 = vld [vmem:[#allocation17 + $0xe0] sm:$0xf] }
 0x4fa   : > { %4462 = vst.msk [vmem:[#allocation4 + $0x24] sm:$0xf] %vm1031_vm1, %v4461_v55  ;;  %v4607_v55 = vld [vmem:[#allocation16] sm:$0xf] }
 0x4fc   : > { %v4313_v56 = vpop.f32.mrf.mxu3 }
 0x4fd   : > { %v4317_v57 = vpack.c.bf16 %v4313_v56, %v4313_v56  ;;  %v4385_v58 = vpop.f32.mrf.mxu2  ;;  %v7924_v56 = vor.u32 %v8803_v54, %v7923_v53  ;;  %v7841_v53 = vld [vmem:[#allocation17 + $0x48] sm:$0xf0]  ;;  %v7873_v54 = vld [vmem:[#allocation17 + $0x80] sm:$0xf] }
 0x4fe   : > { %v4389_v59 = vpack.c.bf16 %v4385_v58, %v4385_v58  ;;  %v4339_v60 = vpop.f32.mrf.mxu0  ;;  %v8777_v58 = vld [vmem:[#allocation17 + $0x14] sm:$0xf0] }
 0x4ff   : > { %4318 = vst.msk [vmem:[#allocation4 + $0xc] sm:$0xf] %vm1031_vm1, %v4317_v57  ;;  %v4459_v61 = vpop.f32.mrf.mxu1  ;;  %v7813_v57 = vld [vmem:[#allocation17 + $0x10] sm:$0xf] }
 0x500   : > { %4390 = vst.msk [vmem:[#allocation4 + $0x18] sm:$0xf] %vm1031_vm1, %v4389_v59  ;;  %v8768_v47 = vld [vmem:[#allocation4 + $0x10] sm:$0xff]  ;;  %v7814_v60 = vor.u32 %v8777_v58, %v7813_v57  ;;  %v7815_v61 = vld [vmem:[#allocation17 + $0x18] sm:$0xf0] }
 0x501   : > { %v8776_v59 = vld [vmem:[#allocation17 + $0x14] sm:$0xf]  ;;  %v8790_v57 = vld [vmem:[#allocation17 + $0x84] sm:$0xf]  ;;  %v7875_v58 = vld [vmem:[#allocation17 + $0x88] sm:$0xf0] }
 0x502   : > { %4750 = vmatpush.bf16.msra.mxu1 %v7814_v60  ;;  %v8815_v60 = vld [vmem:[#allocation17 + $0x144] sm:$0xf0] }
 0x504   : > { %v4315_v62 = vpop.f32.mrf.mxu3 }
 0x505   : > { %v4387_v63 = vpop.f32.mrf.mxu2  ;;  %v7847_v62 = vld [vmem:[#allocation17 + $0x50] sm:$0xf] }
 0x506   : > { %v4433_v0 = vpop.f32.mrf.mxu0  ;;  %v8767_v48 = vld [vmem:[#allocation4 + $0x8] sm:$0xff]  ;;  %v8785_v63 = vld [vmem:[#allocation17 + $0x54] sm:$0xf0] }
 0x507   : > { %v4437_v1 = vpack.c.bf16 %v4433_v0, %v4433_v0  ;;  %v4553_v39 = vpop.f32.mrf.mxu1  ;;  %v7818_v0 = vor.u32 %v8776_v59, %v7815_v61  ;;  %v7975_v59 = vld [vmem:[#allocation17 + $0x140] sm:$0xf] }
 0x508   : > { %v4557_v2 = vpack.c.bf16 %v4553_v39, %v4553_v39  ;;  %v7915_v39 = vld [vmem:[#allocation17 + $0xd0] sm:$0xf] }
 0x509   : > { %4438 = vst.msk [vmem:[#allocation4 + $0x20] sm:$0xf] %vm1031_vm1, %v4437_v1  ;;  %v7848_v1 = vor.u32 %v8785_v63, %v7847_v62  ;;  %4763 = vmatpush.bf16.msrb.mxu2 %v7818_v0  ;;  %v7878_v63 = vor.u32 %v8790_v57, %v7875_v58  ;;  %v7976_v0 = vor.u32 %v8815_v60, %v7975_v59  ;;  %v8033_v57 = vld [vmem:[#allocation17 + $0x1b0] sm:$0xf]  ;;  %v8829_v58 = vld [vmem:[#allocation17 + $0x1b4] sm:$0xf0] }
 0x50a   : > { %4558 = vst.msk [vmem:[#allocation4 + $0x34] sm:$0xf] %vm1031_vm1, %v4557_v2  ;;  %v8801_v2 = vld [vmem:[#allocation17 + $0xd4] sm:$0xf0]  ;;  %v8828_v59 = vld [vmem:[#allocation17 + $0x1b4] sm:$0xf] }
 0x50b   : > { %4827 = vmatpush.bf16.msrb.mxu3 %v7848_v1  ;;  %v4628_v1 = vpop.permute.xlu2 %4627  ;;  %v8035_v60 = vld [vmem:[#allocation17 + $0x1b8] sm:$0xf0] }
 0x50c   : > { %v4409_v40 = vpop.f32.mrf.mxu3 }
 0x50d   : > { %v4413_v3 = vpack.c.bf16 %v4409_v40, %v4409_v40  ;;  %v4481_v4 = vpop.f32.mrf.mxu2  ;;  %v7916_v40 = vor.u32 %v8801_v2, %v7915_v39 }
 0x50e   : > { %v4485_v5 = vpack.c.bf16 %v4481_v4, %v4481_v4  ;;  %v4435_v6 = vpop.f32.mrf.mxu0  ;;  %v8775_v4 = vld [vmem:[#allocation17 + $0x4] sm:$0xf0] }
 0x50f   : > { %4414 = vst.msk [vmem:[#allocation4 + $0x1c] sm:$0xf] %vm1031_vm1, %v4413_v3  ;;  %v4555_v7 = vpop.f32.mrf.mxu1  ;;  %v7805_v3 = vld [vmem:[#allocation17] sm:$0xf] }
 0x510   : > { %4486 = vst.msk [vmem:[#allocation4 + $0x28] sm:$0xf] %vm1031_vm1, %v4485_v5  ;;  %v8770_v45 = vld [vmem:[#allocation4 + $0x20] sm:$0xff]  ;;  %v7806_v6 = vor.u32 %v8775_v4, %v7805_v3  ;;  %v7807_v7 = vld [vmem:[#allocation17 + $0x8] sm:$0xf0] }
 0x511   : > { %v8774_v5 = vld [vmem:[#allocation17 + $0x4] sm:$0xf]  ;;  %v7933_v3 = vld [vmem:[#allocation17 + $0xf8] sm:$0xf0]  ;;  %v7965_v4 = vld [vmem:[#allocation17 + $0x130] sm:$0xf] }
 0x512   : > { %4751 = vmatpush.bf16.msra.mxu1 %v7806_v6  ;;  %v8812_v6 = vld [vmem:[#allocation17 + $0x134] sm:$0xf] }
 0x514   : > { %v4411_v8 = vpop.f32.mrf.mxu3 }
 0x515   : > { %v4483_v9 = vpop.f32.mrf.mxu2  ;;  %v7839_v8 = vld [vmem:[#allocation17 + $0x40] sm:$0xf] }
 0x516   : > { %v4529_v10 = vpop.f32.mrf.mxu0  ;;  %v8769_v46 = vld [vmem:[#allocation4 + $0x18] sm:$0xff]  ;;  %v8783_v9 = vld [vmem:[#allocation17 + $0x44] sm:$0xf0] }
 0x517   : > { %v4533_v11 = vpack.c.bf16 %v4529_v10, %v4529_v10  ;;  %v7810_v10 = vor.u32 %v8774_v5, %v7807_v7  ;;  %v8813_v5 = vld [vmem:[#allocation17 + $0x134] sm:$0xf0]  ;;  %v7967_v7 = vld [vmem:[#allocation17 + $0x138] sm:$0xf0] }
 0x519   : > { %4534 = vst.msk [vmem:[#allocation4 + $0x30] sm:$0xf] %vm1031_vm1, %v4533_v11  ;;  %v7840_v11 = vor.u32 %v8783_v9, %v7839_v8  ;;  %4764 = vmatpush.bf16.msrb.mxu2 %v7810_v10  ;;  %v8067_v9 = vld [vmem:[#allocation17 + $0x1f0] sm:$0xf]  ;;  %v8837_v10 = vld [vmem:[#allocation17 + $0x1f4] sm:$0xf0] }
 0x51b   : > { %4828 = vmatpush.bf16.msrb.mxu3 %v7840_v11 }
 0x51c   : > { %v4505_v12 = vpop.f32.mrf.mxu3 }
 0x51d   : > { %v4509_v13 = vpack.c.bf16 %v4505_v12, %v4505_v12  ;;  %v4577_v14 = vpop.f32.mrf.mxu2  ;;  %v7907_v12 = vld [vmem:[#allocation17 + $0xc0] sm:$0xf] }
 0x51e   : > { %v4581_v15 = vpack.c.bf16 %v4577_v14, %v4577_v14  ;;  %v4531_v16 = vpop.f32.mrf.mxu0 }
 0x51f   : > { %4510 = vst.msk [vmem:[#allocation4 + $0x2c] sm:$0xf] %vm1031_vm1, %v4509_v13  ;;  %v8799_v13 = vld [vmem:[#allocation17 + $0xc4] sm:$0xf0]  ;;  %v7865_v16 = vld [vmem:[#allocation17 + $0x78] sm:$0xf0] }
 0x520   : > { %4582 = vst.msk [vmem:[#allocation4 + $0x38] sm:$0xf] %vm1031_vm1, %v4581_v15  ;;  %v8772_v30 = vld [vmem:[#allocation4 + $0x30] sm:$0xff]  ;;  %v7908_v14 = vor.u32 %v8799_v13, %v7907_v12  ;;  %v7966_v13 = vor.u32 %v8813_v5, %v7965_v4  ;;  %v8827_v4 = vld [vmem:[#allocation17 + $0x1a4] sm:$0xf0] }
 0x521   : > { %v8788_v15 = vld [vmem:[#allocation17 + $0x74] sm:$0xf]  ;;  %v8826_v5 = vld [vmem:[#allocation17 + $0x1a4] sm:$0xf] }
 0x524   : > { %v4507_v17 = vpop.f32.mrf.mxu3 }
 0x525   : > { %v4579_v18 = vpop.f32.mrf.mxu2  ;;  %v7897_v17 = vld [vmem:[#allocation17 + $0xb0] sm:$0xf] }
 0x526   : > { %v8771_v44 = vld [vmem:[#allocation4 + $0x28] sm:$0xff]  ;;  %v7868_v18 = vor.u32 %v8788_v15, %v7865_v16  ;;  %v7970_v16 = vor.u32 %v8812_v6, %v7967_v7  ;;  %v8127_v7 = vld [vmem:[#allocation17 + $0x260] sm:$0xf] }
 0x527   : > { %v7925_v15 = vld [vmem:[#allocation17 + $0xe8] sm:$0xf0] }
 0x528   : > { %4838 = vmatpush.bf16.msrb.mxu1 %v7868_v18  ;;  %v7957_v18 = vld [vmem:[#allocation17 + $0x120] sm:$0xf]  ;;  %v8027_v6 = vld [vmem:[#allocation17 + $0x1a8] sm:$0xf0] }
 0x52c   : > { %v4601_v19 = vpop.f32.mrf.mxu3  ;;  %4839 = vmatpush.bf16.msrb.mxu1 %v7860_v31  ;;  %v7949_v31 = vld [vmem:[#allocation17 + $0x110] sm:$0xf] }
 0x52d   : > { %v4605_v20 = vpack.c.bf16 %v4601_v19, %v4601_v19  ;;  %v8797_v19 = vld [vmem:[#allocation17 + $0xb4] sm:$0xf0] }
 0x52f   : > { %4606 = vst.msk [vmem:[#allocation4 + $0x3c] sm:$0xf] %vm1031_vm1, %v4605_v20  ;;  %v8796_v20 = vld [vmem:[#allocation17 + $0xb4] sm:$0xf] }
 0x534   : > { %v4603_v21 = vpop.f32.mrf.mxu3 }
 0x535   : > { %v7899_v21 = vld [vmem:[#allocation17 + $0xb8] sm:$0xf0] }
 0x536   : > { %v8773_v22 = vld [vmem:[#allocation4 + $0x38] sm:$0xff]  ;;  %v7902_v23 = vor.u32 %v8796_v20, %v7899_v21  ;;  %v8810_v20 = vld [vmem:[#allocation17 + $0x124] sm:$0xf]  ;;  %v7959_v21 = vld [vmem:[#allocation17 + $0x128] sm:$0xf0] }
 0x537   : > { %4678 = vmatpush.bf16.msrb.mxu0 %v8773_v22  ;;  %v7898_v22 = vor.u32 %v8797_v19, %v7897_v17  ;;  %v8068_v17 = vor.u32 %v8837_v10, %v8067_v9  ;;  %v8811_v19 = vld [vmem:[#allocation17 + $0x124] sm:$0xf0] }
 0x538   : > { %4915 = vmatpush.bf16.msra.mxu3 %v7902_v23  ;;  %v8835_v23 = vld [vmem:[#allocation17 + $0x1e4] sm:$0xf0]  ;;  %v7958_v26 = vor.u32 %v8811_v19, %v7957_v18  ;;  %v8824_v18 = vld [vmem:[#allocation17 + $0x194] sm:$0xf]  ;;  %v8019_v19 = vld [vmem:[#allocation17 + $0x198] sm:$0xf0] }
 0x539   : > { %4902 = vmatpush.bf16.msra.mxu2 %v7898_v22  ;;  %v8059_v22 = vld [vmem:[#allocation17 + $0x1e0] sm:$0xf] }
 0x53b   : > { %4679 = vmatpush.bf16.msrb.mxu0 %v8772_v30  ;;  %v8795_v30 = vld [vmem:[#allocation17 + $0xa4] sm:$0xf0] }
 0x53c   : > { %v7890_v32 = vor.u32 %v8795_v30, %v7889_v29  ;;  %4916 = vmatpush.bf16.msra.mxu3 %v7894_v36  ;;  %v7962_v29 = vor.u32 %v8810_v20, %v7959_v21  ;;  %v8060_v30 = vor.u32 %v8835_v23, %v8059_v22  ;;  %v8833_v36 = vld [vmem:[#allocation17 + $0x1d4] sm:$0xf0]  ;;  %v8119_v20 = vld [vmem:[#allocation17 + $0x250] sm:$0xf] }
 0x53d   : > { %v8849_v21 = vld [vmem:[#allocation17 + $0x254] sm:$0xf0] }
 0x53e   : > { %4903 = vmatpush.bf16.msra.mxu2 %v7890_v32  ;;  %v8809_v32 = vld [vmem:[#allocation17 + $0x114] sm:$0xf0] }
 0x53f   : > { %4680 = vmatpush.bf16.msrb.mxu0 %v8771_v44  ;;  %v8793_v44 = vld [vmem:[#allocation17 + $0x94] sm:$0xf0] }
 0x540   : > { %v7882_v50 = vor.u32 %v8793_v44, %v7881_v43  ;;  %v7954_v43 = vor.u32 %v8808_v33, %v7951_v34  ;;  %v8052_v44 = vor.u32 %v8833_v36, %v8051_v35  ;;  %v8847_v33 = vld [vmem:[#allocation17 + $0x244] sm:$0xf0]  ;;  %v8836_v36 = vld [vmem:[#allocation17 + $0x1f4] sm:$0xf] }
 0x542   : > { %4904 = vmatpush.bf16.msra.mxu2 %v7882_v50  ;;  %v8831_v50 = vld [vmem:[#allocation17 + $0x1c4] sm:$0xf0] }
 0x543   : > { %4681 = vmatpush.bf16.msrb.mxu0 %v8770_v45  ;;  %v8792_v45 = vld [vmem:[#allocation17 + $0x94] sm:$0xf] }
 0x547   : > { %4682 = vmatpush.bf16.msrb.mxu0 %v8769_v46  ;;  %v7852_v46 = vor.u32 %v8784_v38, %v7849_v41  ;;  %v7950_v38 = vor.u32 %v8809_v32, %v7949_v31  ;;  %v8798_v41 = vld [vmem:[#allocation17 + $0xc4] sm:$0xf]  ;;  %v8011_v31 = vld [vmem:[#allocation17 + $0x188] sm:$0xf0]  ;;  %v8111_v32 = vld [vmem:[#allocation17 + $0x240] sm:$0xf] }
 0x549   : > { %4840 = vmatpush.bf16.msrb.mxu1 %v7852_v46  ;;  %v8807_v46 = vld [vmem:[#allocation17 + $0x104] sm:$0xf0] }
 0x54b   : > { %4683 = vmatpush.bf16.msrb.mxu0 %v8768_v47  ;;  %v7883_v47 = vld [vmem:[#allocation17 + $0x98] sm:$0xf0] }
 0x54f   : > { %4684 = vmatpush.bf16.msrb.mxu0 %v8767_v48  ;;  %v7983_v48 = vld [vmem:[#allocation17 + $0x150] sm:$0xf] }
 0x553   : > { %4685 = vmatpush.bf16.msrb.mxu0 %v8766_v52  ;;  %v8782_v52 = vld [vmem:[#allocation17 + $0x44] sm:$0xf] }
 0x554   : > { %v7844_v61 = vor.u32 %v8782_v52, %v7841_v53  ;;  %v8820_v53 = vld [vmem:[#allocation17 + $0x174] sm:$0xf] }
 0x556   : > { %4686 = vmatmul.bf16.vlgmr.msrb.gmra.mxu0 %v4607_v55  ;;  %v7984_v55 = vor.u32 %v8817_v49, %v7983_v48  ;;  %4841 = vmatpush.bf16.msrb.mxu1 %v7844_v61  ;;  %v7943_v48 = vld [vmem:[#allocation17 + $0x108] sm:$0xf0]  ;;  %v8043_v49 = vld [vmem:[#allocation17 + $0x1c0] sm:$0xf]  ;;  %v8135_v61 = vld [vmem:[#allocation17 + $0x270] sm:$0xf] }
 0x557   : > { %4979 = vmatpush.bf16.msra.mxu0 %v7932_v51  ;;  %v7886_v51 = vor.u32 %v8792_v45, %v7883_v47  ;;  %v7941_v45 = vld [vmem:[#allocation17 + $0x100] sm:$0xf]  ;;  %v8806_v47 = vld [vmem:[#allocation17 + $0x104] sm:$0xf] }
 0x558   : > { %v7942_v52 = vor.u32 %v8807_v46, %v7941_v45  ;;  %v8103_v45 = vld [vmem:[#allocation17 + $0x238] sm:$0xf0]  ;;  %v8203_v46 = vld [vmem:[#allocation17 + $0x2f0] sm:$0xf] }
 0x559   : > { %4917 = vmatpush.bf16.msra.mxu3 %v7886_v51 }
 0x55b   : > { %4980 = vmatpush.bf16.msra.mxu0 %v7924_v56  ;;  %v8791_v56 = vld [vmem:[#allocation17 + $0x84] sm:$0xf0] }
 0x55c   : > { %v7874_v62 = vor.u32 %v8791_v56, %v7873_v54  ;;  %v8001_v54 = vld [vmem:[#allocation17 + $0x178] sm:$0xf0]  ;;  %v8044_v56 = vor.u32 %v8831_v50, %v8043_v49  ;;  %v8834_v50 = vld [vmem:[#allocation17 + $0x1e4] sm:$0xf] }
 0x55d   : > { %4918 = vmatpush.bf16.msra.mxu3 %v7878_v63  ;;  %v8004_v63 = vor.u32 %v8820_v53, %v8001_v54  ;;  %v8093_v54 = vld [vmem:[#allocation17 + $0x220] sm:$0xf] }
 0x55e   : > { %4905 = vmatpush.bf16.msra.mxu2 %v7874_v62  ;;  %v8853_v62 = vld [vmem:[#allocation17 + $0x274] sm:$0xf0] }
 0x55f   : > { %4981 = vmatpush.bf16.msra.mxu0 %v7916_v40  ;;  %v8804_v40 = vld [vmem:[#allocation17 + $0xf4] sm:$0xf] }
 0x560   : > { %v7936_v12 = vor.u32 %v8804_v40, %v7933_v3  ;;  %v8136_v40 = vor.u32 %v8853_v62, %v8135_v61  ;;  %v8025_v3 = vld [vmem:[#allocation17 + $0x1a0] sm:$0xf]  ;;  %v8832_v62 = vld [vmem:[#allocation17 + $0x1d4] sm:$0xf] }
 0x561   : > { %v8026_v10 = vor.u32 %v8827_v4, %v8025_v3  ;;  %v8087_v3 = vld [vmem:[#allocation17 + $0x218] sm:$0xf0]  ;;  %v8187_v4 = vld [vmem:[#allocation17 + $0x2d0] sm:$0xf] }
 0x563   : > { %4982 = vmatpush.bf16.msra.mxu0 %v7908_v14  ;;  %v8802_v14 = vld [vmem:[#allocation17 + $0xe4] sm:$0xf] }
 0x564   : > { %v7928_v25 = vor.u32 %v8802_v14, %v7925_v15  ;;  %v8030_v14 = vor.u32 %v8826_v5, %v8027_v6  ;;  %v8865_v5 = vld [vmem:[#allocation17 + $0x2d4] sm:$0xf0] }
 0x567   : > { %5133 = vmatpush.bf16.msrb.mxu0 %v8000_v27  ;;  %v8800_v27 = vld [vmem:[#allocation17 + $0xd4] sm:$0xf] }
 0x568   : > { %v7920_v37 = vor.u32 %v8800_v27, %v7917_v28  ;;  %v8120_v27 = vor.u32 %v8849_v21, %v8119_v20  ;;  %v8009_v28 = vld [vmem:[#allocation17 + $0x180] sm:$0xf]  ;;  %v8852_v21 = vld [vmem:[#allocation17 + $0x274] sm:$0xf] }
 0x56b   : > { %5134 = vmatpush.bf16.msrb.mxu0 %v7992_v42  ;;  %v7909_v42 = vld [vmem:[#allocation17 + $0xc8] sm:$0xf0] }
 0x56c   : > { %v7912_v51 = vor.u32 %v8798_v41, %v7909_v42  ;;  %v8112_v41 = vor.u32 %v8847_v33, %v8111_v32  ;;  %v8101_v42 = vld [vmem:[#allocation17 + $0x230] sm:$0xf]  ;;  %v8850_v33 = vld [vmem:[#allocation17 + $0x264] sm:$0xf] }
 0x56f   : > { %5135 = vmatpush.bf16.msrb.mxu0 %v7984_v55  ;;  %v7946_v55 = vor.u32 %v8806_v47, %v7943_v48  ;;  %v8869_v47 = vld [vmem:[#allocation17 + $0x2f4] sm:$0xf0] }
 0x570   : > { %v8204_v53 = vor.u32 %v8869_v47, %v8203_v46  ;;  %v8848_v47 = vld [vmem:[#allocation17 + $0x254] sm:$0xf] }
 0x573   : > { %5136 = vmatpush.bf16.msrb.mxu0 %v7976_v0  ;;  %v8034_v0 = vor.u32 %v8829_v58, %v8033_v57  ;;  %v8095_v57 = vld [vmem:[#allocation17 + $0x228] sm:$0xf0]  ;;  %v8195_v58 = vld [vmem:[#allocation17 + $0x2e0] sm:$0xf] }
 0x5d3   : > { %v4687_v39 = vpop.f32.mrf.mxu0 }
 0x5d4   : > { %v4688_v2 = vadd.f32 %v4687_v39, %v4628_v1  ;;  %v8818_v1 = vld [vmem:[#allocation17 + $0x164] sm:$0xf]  ;;  %v7993_v39 = vld [vmem:[#allocation17 + $0x168] sm:$0xf0] }
 0x5d5   : > { %v7996_v9 = vor.u32 %v8818_v1, %v7993_v39  ;;  %v8085_v39 = vld [vmem:[#allocation17 + $0x210] sm:$0xf] }
 0x5d6   : > { %v4691_v8 = vmax.f32 %v4688_v2, 0.0  ;;  %v8038_v2 = vor.u32 %v8828_v59, %v8035_v60  ;;  %v8867_v59 = vld [vmem:[#allocation17 + $0x2e4] sm:$0xf0] }
 0x5d7   : > { %v8196_v1 = vor.u32 %v8867_v59, %v8195_v58  ;;  %v8846_v59 = vld [vmem:[#allocation17 + $0x244] sm:$0xf] }
 0x5d8   : > { %v9716_v11 = vpack.c.bf16 %v4691_v8, %v4691_v8  ;;  %v8851_v8 = vld [vmem:[#allocation17 + $0x264] sm:$0xf0] }
 0x5d9   : > { %v8128_v15 = vor.u32 %v8851_v8, %v8127_v7  ;;  %v8830_v8 = vld [vmem:[#allocation17 + $0x1c4] sm:$0xf] }
 0x5da   : > { %7835 = vmatmul.msk.bf16.vlgmr.msra.gmra.mxu1 %vm3284_vm2, %v9716_v11  ;;  %7836 = vmatmul.msk.bf16.vlgmr.msrb.gmra.mxu2 %vm3284_vm2, %v9716_v11 }
 0x5db   : > { %7869 = vmatmul.msk.bf16.vlgmr.msrb.gmra.mxu3 %vm3284_vm2, %v9716_v11  ;;  %7937 = vmatmul.msk.bf16.vlgmr.msra.gmra.mxu0 %vm3284_vm2, %v9716_v11  ;;  %v4689_v24 = vpop.f32.mrf.mxu0 }
 0x5dc   : > { %4992 = vmatpush.bf16.msra.mxu1 %v7936_v12  ;;  %5056 = vmatpush.bf16.msrb.mxu2 %v7966_v13  ;;  %v8816_v12 = vld [vmem:[#allocation17 + $0x154] sm:$0xf]  ;;  %v7985_v13 = vld [vmem:[#allocation17 + $0x158] sm:$0xf0]  ;;  %v8814_v24 = vld [vmem:[#allocation17 + $0x144] sm:$0xf] }
 0x5dd   : > { %5069 = vmatpush.bf16.msrb.mxu3 %v7970_v16  ;;  %5287 = vmatpush.bf16.msra.mxu0 %v8068_v17  ;;  %v8017_v16 = vld [vmem:[#allocation17 + $0x190] sm:$0xf]  ;;  %v8825_v17 = vld [vmem:[#allocation17 + $0x194] sm:$0xf0]  ;;  %v7988_v22 = vor.u32 %v8816_v12, %v7985_v13  ;;  %v8188_v12 = vor.u32 %v8865_v5, %v8187_v4  ;;  %v8077_v13 = vld [vmem:[#allocation17 + $0x200] sm:$0xf] }
 0x5de   : > { %v8018_v23 = vor.u32 %v8825_v17, %v8017_v16  ;;  %v8079_v16 = vld [vmem:[#allocation17 + $0x208] sm:$0xf0]  ;;  %v8179_v17 = vld [vmem:[#allocation17 + $0x2c0] sm:$0xf]  ;;  %v8868_v5 = vld [vmem:[#allocation17 + $0x2f4] sm:$0xf] }
 0x5e0   : > { %4993 = vmatpush.bf16.msra.mxu1 %v7928_v25  ;;  %5057 = vmatpush.bf16.msrb.mxu2 %v7958_v26  ;;  %v7977_v25 = vld [vmem:[#allocation17 + $0x148] sm:$0xf0]  ;;  %v8022_v26 = vor.u32 %v8824_v18, %v8019_v19  ;;  %v8863_v18 = vld [vmem:[#allocation17 + $0x2c4] sm:$0xf0] }
 0x5e1   : > { %5070 = vmatpush.bf16.msrb.mxu3 %v7962_v29  ;;  %5288 = vmatpush.bf16.msra.mxu0 %v8060_v30  ;;  %v8823_v29 = vld [vmem:[#allocation17 + $0x184] sm:$0xf0]  ;;  %v8822_v30 = vld [vmem:[#allocation17 + $0x184] sm:$0xf]  ;;  %v7980_v34 = vor.u32 %v8814_v24, %v7977_v25  ;;  %v8180_v24 = vor.u32 %v8863_v18, %v8179_v17  ;;  %v8169_v25 = vld [vmem:[#allocation17 + $0x2b0] sm:$0xf] }
 0x5e2   : > { %v8010_v35 = vor.u32 %v8823_v29, %v8009_v28  ;;  %v8171_v28 = vld [vmem:[#allocation17 + $0x2b8] sm:$0xf0]  ;;  %v8271_v29 = vld [vmem:[#allocation17 + $0x370] sm:$0xf]  ;;  %v8866_v18 = vld [vmem:[#allocation17 + $0x2e4] sm:$0xf] }
 0x5e4   : > { %4994 = vmatpush.bf16.msra.mxu1 %v7920_v37  ;;  %5058 = vmatpush.bf16.msrb.mxu2 %v7950_v38  ;;  %v8069_v37 = vld [vmem:[#allocation17 + $0x1f8] sm:$0xf0]  ;;  %v8014_v38 = vor.u32 %v8822_v30, %v8011_v31  ;;  %v8885_v30 = vld [vmem:[#allocation17 + $0x374] sm:$0xf0] }
 0x5e5   : > { %5071 = vmatpush.bf16.msrb.mxu3 %v7954_v43  ;;  %5289 = vmatpush.bf16.msra.mxu0 %v8052_v44  ;;  %v8845_v43 = vld [vmem:[#allocation17 + $0x234] sm:$0xf0]  ;;  %v8844_v44 = vld [vmem:[#allocation17 + $0x234] sm:$0xf]  ;;  %v8072_v48 = vor.u32 %v8836_v36, %v8069_v37  ;;  %v8272_v36 = vor.u32 %v8885_v30, %v8271_v29  ;;  %v8161_v37 = vld [vmem:[#allocation17 + $0x2a0] sm:$0xf] }
 0x5e6   : > { %v8102_v49 = vor.u32 %v8845_v43, %v8101_v42  ;;  %v8163_v42 = vld [vmem:[#allocation17 + $0x2a8] sm:$0xf0]  ;;  %v8263_v43 = vld [vmem:[#allocation17 + $0x360] sm:$0xf]  ;;  %v8864_v30 = vld [vmem:[#allocation17 + $0x2d4] sm:$0xf] }
 0x5e8   : > { %4995 = vmatpush.bf16.msra.mxu1 %v7912_v51  ;;  %5059 = vmatpush.bf16.msrb.mxu2 %v7942_v52  ;;  %v8061_v51 = vld [vmem:[#allocation17 + $0x1e8] sm:$0xf0]  ;;  %v8106_v52 = vor.u32 %v8844_v44, %v8103_v45  ;;  %v8883_v44 = vld [vmem:[#allocation17 + $0x364] sm:$0xf0] }
 0x5e9   : > { %5072 = vmatpush.bf16.msrb.mxu3 %v7946_v55  ;;  %5290 = vmatpush.bf16.msra.mxu0 %v8044_v56  ;;  %v8843_v55 = vld [vmem:[#allocation17 + $0x224] sm:$0xf0]  ;;  %v8842_v56 = vld [vmem:[#allocation17 + $0x224] sm:$0xf]  ;;  %v8064_v60 = vor.u32 %v8834_v50, %v8061_v51  ;;  %v8264_v50 = vor.u32 %v8883_v44, %v8263_v43  ;;  %v8153_v51 = vld [vmem:[#allocation17 + $0x290] sm:$0xf] }
 0x5ea   : > { %7870 = vmatmul.msk.bf16.vlgmr.msrb.gmra.mxu1 %vm3284_vm2, %v9716_v11  ;;  %7903 = vmatmul.msk.bf16.vlgmr.msra.gmra.mxu2 %vm3284_vm2, %v9716_v11  ;;  %v8094_v61 = vor.u32 %v8843_v55, %v8093_v54  ;;  %v8155_v54 = vld [vmem:[#allocation17 + $0x298] sm:$0xf0]  ;;  %v8255_v55 = vld [vmem:[#allocation17 + $0x350] sm:$0xf]  ;;  %v8862_v44 = vld [vmem:[#allocation17 + $0x2c4] sm:$0xf] }
 0x5eb   : > { %7904 = vmatmul.msk.bf16.vlgmr.msra.gmra.mxu3 %vm3284_vm2, %v9716_v11  ;;  %8005 = vmatmul.msk.bf16.vlgmr.msrb.gmra.mxu0 %vm3284_vm2, %v9716_v11 }
 0x5ec   : > { %5146 = vmatpush.bf16.msrb.mxu1 %v8004_v63  ;;  %5210 = vmatpush.bf16.msra.mxu2 %v8034_v0  ;;  %v8053_v63 = vld [vmem:[#allocation17 + $0x1d8] sm:$0xf0]  ;;  %v8098_v0 = vor.u32 %v8842_v56, %v8095_v57  ;;  %v8881_v56 = vld [vmem:[#allocation17 + $0x354] sm:$0xf0] }
 0x5ed   : > { %5223 = vmatpush.bf16.msra.mxu3 %v8038_v2  ;;  %5441 = vmatpush.bf16.msrb.mxu0 %v8136_v40  ;;  %v8841_v2 = vld [vmem:[#allocation17 + $0x214] sm:$0xf0]  ;;  %v8840_v40 = vld [vmem:[#allocation17 + $0x214] sm:$0xf]  ;;  %v8056_v6 = vor.u32 %v8832_v62, %v8053_v63  ;;  %v8256_v62 = vor.u32 %v8881_v56, %v8255_v55  ;;  %v8145_v63 = vld [vmem:[#allocation17 + $0x280] sm:$0xf] }
 0x5ee   : > { %v8086_v7 = vor.u32 %v8841_v2, %v8085_v39  ;;  %v8147_v39 = vld [vmem:[#allocation17 + $0x288] sm:$0xf0]  ;;  %v8247_v2 = vld [vmem:[#allocation17 + $0x340] sm:$0xf]  ;;  %v8884_v56 = vld [vmem:[#allocation17 + $0x374] sm:$0xf] }
 0x5f0   : > { %5147 = vmatpush.bf16.msrb.mxu1 %v7996_v9  ;;  %5211 = vmatpush.bf16.msra.mxu2 %v8026_v10  ;;  %v8045_v9 = vld [vmem:[#allocation17 + $0x1c8] sm:$0xf0]  ;;  %v8090_v10 = vor.u32 %v8840_v40, %v8087_v3  ;;  %v8879_v40 = vld [vmem:[#allocation17 + $0x344] sm:$0xf0] }
 0x5f1   : > { %5224 = vmatpush.bf16.msra.mxu3 %v8030_v14  ;;  %5442 = vmatpush.bf16.msrb.mxu0 %v8128_v15  ;;  %v8839_v14 = vld [vmem:[#allocation17 + $0x204] sm:$0xf0]  ;;  %v8838_v15 = vld [vmem:[#allocation17 + $0x204] sm:$0xf]  ;;  %v8048_v19 = vor.u32 %v8830_v8, %v8045_v9  ;;  %v8248_v8 = vor.u32 %v8879_v40, %v8247_v2  ;;  %v8237_v9 = vld [vmem:[#allocation17 + $0x330] sm:$0xf] }
 0x5f2   : > { %v8078_v20 = vor.u32 %v8839_v14, %v8077_v13  ;;  %v8239_v13 = vld [vmem:[#allocation17 + $0x338] sm:$0xf0]  ;;  %v8339_v14 = vld [vmem:[#allocation17 + $0x3f0] sm:$0xf]  ;;  %v8265_v40 = vld [vmem:[#allocation17 + $0x368] sm:$0xf0] }
 0x5f4   : > { %5148 = vmatpush.bf16.msrb.mxu1 %v7988_v22  ;;  %5212 = vmatpush.bf16.msra.mxu2 %v8018_v23  ;;  %v8137_v22 = vld [vmem:[#allocation17 + $0x278] sm:$0xf0]  ;;  %v8082_v23 = vor.u32 %v8838_v15, %v8079_v16  ;;  %v8901_v15 = vld [vmem:[#allocation17 + $0x3f4] sm:$0xf0] }
 0x5f5   : > { %5225 = vmatpush.bf16.msra.mxu3 %v8022_v26  ;;  %5443 = vmatpush.bf16.msrb.mxu0 %v8120_v27  ;;  %v8861_v26 = vld [vmem:[#allocation17 + $0x2b4] sm:$0xf0]  ;;  %v8860_v27 = vld [vmem:[#allocation17 + $0x2b4] sm:$0xf]  ;;  %v8140_v31 = vor.u32 %v8852_v21, %v8137_v22  ;;  %v8340_v21 = vor.u32 %v8901_v15, %v8339_v14  ;;  %v8229_v22 = vld [vmem:[#allocation17 + $0x320] sm:$0xf] }
 0x5f6   : > { %v8170_v32 = vor.u32 %v8861_v26, %v8169_v25  ;;  %v8231_v25 = vld [vmem:[#allocation17 + $0x328] sm:$0xf0]  ;;  %v8331_v26 = vld [vmem:[#allocation17 + $0x3e0] sm:$0xf]  ;;  %v8889_v14 = vld [vmem:[#allocation17 + $0x394] sm:$0xf0] }
 0x5f7   : > { %v8888_v15 = vld [vmem:[#allocation17 + $0x394] sm:$0xf] }
 0x5f8   : > { %5149 = vmatpush.bf16.msrb.mxu1 %v7980_v34  ;;  %5213 = vmatpush.bf16.msra.mxu2 %v8010_v35  ;;  %v8129_v34 = vld [vmem:[#allocation17 + $0x268] sm:$0xf0]  ;;  %v8174_v35 = vor.u32 %v8860_v27, %v8171_v28  ;;  %v8899_v27 = vld [vmem:[#allocation17 + $0x3e4] sm:$0xf0] }
 0x5f9   : > { %5226 = vmatpush.bf16.msra.mxu3 %v8014_v38  ;;  %5444 = vmatpush.bf16.msrb.mxu0 %v8112_v41  ;;  %v8859_v38 = vld [vmem:[#allocation17 + $0x2a4] sm:$0xf0]  ;;  %v8858_v41 = vld [vmem:[#allocation17 + $0x2a4] sm:$0xf]  ;;  %v8132_v45 = vor.u32 %v8850_v33, %v8129_v34  ;;  %v8332_v33 = vor.u32 %v8899_v27, %v8331_v26  ;;  %v8221_v34 = vld [vmem:[#allocation17 + $0x310] sm:$0xf] }
 0x5fa   : > { %7938 = vmatmul.msk.bf16.vlgmr.msra.gmra.mxu1 %vm3284_vm2, %v9716_v11  ;;  %7971 = vmatmul.msk.bf16.vlgmr.msrb.gmra.mxu2 %vm3284_vm2, %v9716_v11  ;;  %v8162_v46 = vor.u32 %v8859_v38, %v8161_v37  ;;  %v8223_v37 = vld [vmem:[#allocation17 + $0x318] sm:$0xf0]  ;;  %v8323_v38 = vld [vmem:[#allocation17 + $0x3d0] sm:$0xf] }
 0x5fb   : > { %7972 = vmatmul.msk.bf16.vlgmr.msrb.gmra.mxu3 %vm3284_vm2, %v9716_v11  ;;  %8073 = vmatmul.msk.bf16.vlgmr.msra.gmra.mxu0 %vm3284_vm2, %v9716_v11 }
 0x5fc   : > { %5300 = vmatpush.bf16.msra.mxu1 %v8072_v48  ;;  %5364 = vmatpush.bf16.msrb.mxu2 %v8102_v49  ;;  %v8121_v48 = vld [vmem:[#allocation17 + $0x258] sm:$0xf0]  ;;  %v8166_v49 = vor.u32 %v8858_v41, %v8163_v42  ;;  %v8897_v41 = vld [vmem:[#allocation17 + $0x3d4] sm:$0xf0] }
 0x5fd   : > { %5377 = vmatpush.bf16.msrb.mxu3 %v8106_v52  ;;  %5595 = vmatpush.bf16.msra.mxu0 %v8204_v53  ;;  %v8857_v52 = vld [vmem:[#allocation17 + $0x294] sm:$0xf0]  ;;  %v8856_v53 = vld [vmem:[#allocation17 + $0x294] sm:$0xf]  ;;  %v8124_v57 = vor.u32 %v8848_v47, %v8121_v48  ;;  %v8324_v47 = vor.u32 %v8897_v41, %v8323_v38  ;;  %v8213_v48 = vld [vmem:[#allocation17 + $0x300] sm:$0xf] }
 0x5fe   : > { %v8154_v58 = vor.u32 %v8857_v52, %v8153_v51  ;;  %v8215_v51 = vld [vmem:[#allocation17 + $0x308] sm:$0xf0]  ;;  %v8315_v52 = vld [vmem:[#allocation17 + $0x3c0] sm:$0xf]  ;;  %v8894_v38 = vld [vmem:[#allocation17 + $0x3c4] sm:$0xf] }
 0x5ff   : > { %v8317_v41 = vld [vmem:[#allocation17 + $0x3c8] sm:$0xf0] }
 0x600   : > { %5301 = vmatpush.bf16.msra.mxu1 %v8064_v60  ;;  %5365 = vmatpush.bf16.msrb.mxu2 %v8094_v61  ;;  %v8113_v60 = vld [vmem:[#allocation17 + $0x248] sm:$0xf0]  ;;  %v8158_v61 = vor.u32 %v8856_v53, %v8155_v54  ;;  %v8895_v53 = vld [vmem:[#allocation17 + $0x3c4] sm:$0xf0] }
 0x601   : > { %5378 = vmatpush.bf16.msrb.mxu3 %v8098_v0  ;;  %5596 = vmatpush.bf16.msra.mxu0 %v8196_v1  ;;  %v8855_v0 = vld [vmem:[#allocation17 + $0x284] sm:$0xf0]  ;;  %v8854_v1 = vld [vmem:[#allocation17 + $0x284] sm:$0xf]  ;;  %v8116_v3 = vor.u32 %v8846_v59, %v8113_v60  ;;  %v8273_v59 = vld [vmem:[#allocation17 + $0x378] sm:$0xf0] }
 0x602   : > { %v8146_v4 = vor.u32 %v8855_v0, %v8145_v63  ;;  %v8305_v60 = vld [vmem:[#allocation17 + $0x3b0] sm:$0xf]  ;;  %v8307_v63 = vld [vmem:[#allocation17 + $0x3b8] sm:$0xf0]  ;;  %v8276_v0 = vor.u32 %v8884_v56, %v8273_v59 }
 0x604   : > { %5302 = vmatpush.bf16.msra.mxu1 %v8056_v6  ;;  %5366 = vmatpush.bf16.msrb.mxu2 %v8086_v7  ;;  %v8205_v6 = vld [vmem:[#allocation17 + $0x2f8] sm:$0xf0]  ;;  %v8150_v7 = vor.u32 %v8854_v1, %v8147_v39  ;;  %v8882_v39 = vld [vmem:[#allocation17 + $0x364] sm:$0xf] }
 0x605   : > { %5379 = vmatpush.bf16.msrb.mxu3 %v8090_v10  ;;  %5597 = vmatpush.bf16.msra.mxu0 %v8188_v12  ;;  %v8877_v10 = vld [vmem:[#allocation17 + $0x334] sm:$0xf0]  ;;  %v8876_v12 = vld [vmem:[#allocation17 + $0x334] sm:$0xf]  ;;  %v8208_v16 = vor.u32 %v8868_v5, %v8205_v6  ;;  %v8890_v5 = vld [vmem:[#allocation17 + $0x3a4] sm:$0xf] }
 0x606   : > { %v8238_v17 = vor.u32 %v8877_v10, %v8237_v9  ;;  %v8299_v6 = vld [vmem:[#allocation17 + $0x3a8] sm:$0xf0]  ;;  %v8880_v9 = vld [vmem:[#allocation17 + $0x354] sm:$0xf] }
 0x607   : > { %v8302_v10 = vor.u32 %v8890_v5, %v8299_v6 }
 0x608   : > { %5303 = vmatpush.bf16.msra.mxu1 %v8048_v19  ;;  %5367 = vmatpush.bf16.msrb.mxu2 %v8078_v20  ;;  %v8197_v19 = vld [vmem:[#allocation17 + $0x2e8] sm:$0xf0]  ;;  %v8242_v20 = vor.u32 %v8876_v12, %v8239_v13  ;;  %v8257_v12 = vld [vmem:[#allocation17 + $0x358] sm:$0xf0]  ;;  %v8289_v13 = vld [vmem:[#allocation17 + $0x390] sm:$0xf] }
 0x609   : > { %5380 = vmatpush.bf16.msrb.mxu3 %v8082_v23  ;;  %5598 = vmatpush.bf16.msra.mxu0 %v8180_v24  ;;  %v8875_v23 = vld [vmem:[#allocation17 + $0x324] sm:$0xf0]  ;;  %v8874_v24 = vld [vmem:[#allocation17 + $0x324] sm:$0xf]  ;;  %v8200_v28 = vor.u32 %v8866_v18, %v8197_v19  ;;  %v8290_v18 = vor.u32 %v8889_v14, %v8289_v13 }
 0x60a   : > { %8006 = vmatmul.msk.bf16.vlgmr.msrb.gmra.mxu1 %vm3284_vm2, %v9716_v11  ;;  %8039 = vmatmul.msk.bf16.vlgmr.msra.gmra.mxu2 %vm3284_vm2, %v9716_v11  ;;  %v8230_v29 = vor.u32 %v8875_v23, %v8229_v22  ;;  %v8878_v19 = vld [vmem:[#allocation17 + $0x344] sm:$0xf]  ;;  %v8281_v22 = vld [vmem:[#allocation17 + $0x380] sm:$0xf]  ;;  %v8887_v23 = vld [vmem:[#allocation17 + $0x384] sm:$0xf0] }
 0x60b   : > { %8040 = vmatmul.msk.bf16.vlgmr.msra.gmra.mxu3 %vm3284_vm2, %v9716_v11  ;;  %8141 = vmatmul.msk.bf16.vlgmr.msrb.gmra.mxu0 %vm3284_vm2, %v9716_v11  ;;  %v8282_v27 = vor.u32 %v8887_v23, %v8281_v22 }
 0x60c   : > { %5454 = vmatpush.bf16.msrb.mxu1 %v8140_v31  ;;  %5518 = vmatpush.bf16.msra.mxu2 %v8170_v32  ;;  %v8189_v31 = vld [vmem:[#allocation17 + $0x2d8] sm:$0xf0]  ;;  %v8234_v32 = vor.u32 %v8874_v24, %v8231_v25  ;;  %v8886_v24 = vld [vmem:[#allocation17 + $0x384] sm:$0xf]  ;;  %v8283_v25 = vld [vmem:[#allocation17 + $0x388] sm:$0xf0] }
 0x60d   : > { %5531 = vmatpush.bf16.msra.mxu3 %v8174_v35  ;;  %5749 = vmatpush.bf16.msrb.mxu0 %v8272_v36  ;;  %v8873_v35 = vld [vmem:[#allocation17 + $0x314] sm:$0xf0]  ;;  %v8872_v36 = vld [vmem:[#allocation17 + $0x314] sm:$0xf]  ;;  %v8192_v42 = vor.u32 %v8864_v30, %v8189_v31  ;;  %v8341_v30 = vld [vmem:[#allocation17 + $0x3f8] sm:$0xf0] }
 0x60e   : > { %v8222_v43 = vor.u32 %v8873_v35, %v8221_v34  ;;  %v8896_v35 = vld [vmem:[#allocation17 + $0x3d4] sm:$0xf] }
 0x610   : > { %5455 = vmatpush.bf16.msrb.mxu1 %v8132_v45  ;;  %5519 = vmatpush.bf16.msra.mxu2 %v8162_v46  ;;  %v8181_v45 = vld [vmem:[#allocation17 + $0x2c8] sm:$0xf0]  ;;  %v8226_v46 = vor.u32 %v8872_v36, %v8223_v37  ;;  %v8325_v36 = vld [vmem:[#allocation17 + $0x3d8] sm:$0xf0] }
 0x611   : > { %5532 = vmatpush.bf16.msra.mxu3 %v8166_v49  ;;  %5750 = vmatpush.bf16.msrb.mxu0 %v8264_v50  ;;  %v8871_v49 = vld [vmem:[#allocation17 + $0x304] sm:$0xf0]  ;;  %v8870_v50 = vld [vmem:[#allocation17 + $0x304] sm:$0xf]  ;;  %v8184_v54 = vor.u32 %v8862_v44, %v8181_v45  ;;  %v8328_v37 = vor.u32 %v8896_v35, %v8325_v36 }
 0x612   : > { %v8214_v55 = vor.u32 %v8871_v49, %v8213_v48 }
 0x614   : > { %5456 = vmatpush.bf16.msrb.mxu1 %v8124_v57  ;;  %5520 = vmatpush.bf16.msra.mxu2 %v8154_v58  ;;  %v8218_v57 = vor.u32 %v8870_v50, %v8215_v51  ;;  %v8316_v58 = vor.u32 %v8895_v53, %v8315_v52 }
 0x615   : > { %5533 = vmatpush.bf16.msra.mxu3 %v8158_v61  ;;  %5751 = vmatpush.bf16.msrb.mxu0 %v8256_v62  ;;  %v8893_v61 = vld [vmem:[#allocation17 + $0x3b4] sm:$0xf0]  ;;  %v8892_v62 = vld [vmem:[#allocation17 + $0x3b4] sm:$0xf] }
 0x616   : > { %v8306_v1 = vor.u32 %v8893_v61, %v8305_v60  ;;  %v8310_v2 = vor.u32 %v8892_v62, %v8307_v63 }
 0x618   : > { %5457 = vmatpush.bf16.msrb.mxu1 %v8116_v3  ;;  %5521 = vmatpush.bf16.msra.mxu2 %v8146_v4  ;;  %v8297_v3 = vld [vmem:[#allocation17 + $0x3a0] sm:$0xf]  ;;  %v8891_v4 = vld [vmem:[#allocation17 + $0x3a4] sm:$0xf0] }
 0x619   : > { %5534 = vmatpush.bf16.msra.mxu3 %v8150_v7  ;;  %5752 = vmatpush.bf16.msrb.mxu0 %v8248_v8  ;;  %v8268_v7 = vor.u32 %v8882_v39, %v8265_v40  ;;  %v8298_v8 = vor.u32 %v8891_v4, %v8297_v3 }
 0x61a   : > { %8074 = vmatmul.msk.bf16.vlgmr.msra.gmra.mxu1 %vm3284_vm2, %v9716_v11  ;;  %8107 = vmatmul.msk.bf16.vlgmr.msrb.gmra.mxu2 %vm3284_vm2, %v9716_v11 }
 0x61b   : > { %8108 = vmatmul.msk.bf16.vlgmr.msrb.gmra.mxu3 %vm3284_vm2, %v9716_v11  ;;  %8209 = vmatmul.msk.bf16.vlgmr.msra.gmra.mxu0 %vm3284_vm2, %v9716_v11 }
 0x61c   : > { %5608 = vmatpush.bf16.msra.mxu1 %v8208_v16  ;;  %5672 = vmatpush.bf16.msrb.mxu2 %v8238_v17  ;;  %v8291_v16 = vld [vmem:[#allocation17 + $0x398] sm:$0xf0]  ;;  %v8260_v17 = vor.u32 %v8880_v9, %v8257_v12 }
 0x61d   : > { %5685 = vmatpush.bf16.msrb.mxu3 %v8242_v20  ;;  %5903 = vmatpush.bf16.msra.mxu0 %v8340_v21  ;;  %v8294_v20 = vor.u32 %v8888_v15, %v8291_v16  ;;  %v8249_v21 = vld [vmem:[#allocation17 + $0x348] sm:$0xf0] }
 0x61e   : > { %v8252_v26 = vor.u32 %v8878_v19, %v8249_v21 }
 0x620   : > { %5609 = vmatpush.bf16.msra.mxu1 %v8200_v28  ;;  %5673 = vmatpush.bf16.msrb.mxu2 %v8230_v29  ;;  %v8286_v28 = vor.u32 %v8886_v24, %v8283_v25  ;;  %v8900_v29 = vld [vmem:[#allocation17 + $0x3f4] sm:$0xf] }
 0x621   : > { %5686 = vmatpush.bf16.msrb.mxu3 %v8234_v32  ;;  %5904 = vmatpush.bf16.msra.mxu0 %v8332_v33  ;;  %v8344_v31 = vor.u32 %v8900_v29, %v8341_v30  ;;  %v8898_v32 = vld [vmem:[#allocation17 + $0x3e4] sm:$0xf]  ;;  %v8333_v33 = vld [vmem:[#allocation17 + $0x3e8] sm:$0xf0] }
 0x622   : > { %v8336_v34 = vor.u32 %v8898_v32, %v8333_v33 }
 0x624   : > { %5610 = vmatpush.bf16.msra.mxu1 %v8192_v42  ;;  %5674 = vmatpush.bf16.msrb.mxu2 %v8222_v43  ;;  %v8320_v42 = vor.u32 %v8894_v38, %v8317_v41 }
 0x625   : > { %5687 = vmatpush.bf16.msrb.mxu3 %v8226_v46  ;;  %5905 = vmatpush.bf16.msra.mxu0 %v8324_v47 }
 0x628   : > { %5611 = vmatpush.bf16.msra.mxu1 %v8184_v54  ;;  %5675 = vmatpush.bf16.msrb.mxu2 %v8214_v55 }
 0x629   : > { %5688 = vmatpush.bf16.msrb.mxu3 %v8218_v57  ;;  %5906 = vmatpush.bf16.msra.mxu0 %v8316_v58 }
 0x62a   : > { %8142 = vmatmul.msk.bf16.vlgmr.msrb.gmra.mxu1 %vm3284_vm2, %v9716_v11  ;;  %8175 = vmatmul.msk.bf16.vlgmr.msra.gmra.mxu2 %vm3284_vm2, %v9716_v11 }
 0x62b   : > { %8176 = vmatmul.msk.bf16.vlgmr.msra.gmra.mxu3 %vm3284_vm2, %v9716_v11  ;;  %8277 = vmatmul.msk.bf16.vlgmr.msrb.gmra.mxu0 %vm3284_vm2, %v9716_v11 }
 0x62c   : > { %5762 = vmatpush.bf16.msrb.mxu1 %v8276_v0  ;;  %5826 = vmatpush.bf16.msra.mxu2 %v8306_v1 }
 0x62d   : > { %5839 = vmatpush.bf16.msra.mxu3 %v8310_v2 }
 0x630   : > { %5763 = vmatpush.bf16.msrb.mxu1 %v8268_v7  ;;  %5827 = vmatpush.bf16.msra.mxu2 %v8298_v8 }
 0x631   : > { %5840 = vmatpush.bf16.msra.mxu3 %v8302_v10 }
 0x634   : > { %5764 = vmatpush.bf16.msrb.mxu1 %v8260_v17  ;;  %5828 = vmatpush.bf16.msra.mxu2 %v8290_v18 }
 0x635   : > { %5841 = vmatpush.bf16.msra.mxu3 %v8294_v20 }
 0x638   : > { %5765 = vmatpush.bf16.msrb.mxu1 %v8252_v26  ;;  %5829 = vmatpush.bf16.msra.mxu2 %v8282_v27 }
 0x639   : > { %5842 = vmatpush.bf16.msra.mxu3 %v8286_v28 }
 0x63a   : > { %8210 = vmatmul.msk.bf16.vlgmr.msra.gmra.mxu1 %vm3284_vm2, %v9716_v11  ;;  %8243 = vmatmul.msk.bf16.vlgmr.msrb.gmra.mxu2 %vm3284_vm2, %v9716_v11 }
 0x63b   : > { %8244 = vmatmul.msk.bf16.vlgmr.msrb.gmra.mxu3 %vm3284_vm2, %v9716_v11  ;;  %8345 = vmatmul.msk.bf16.vlgmr.msra.gmra.mxu0 %vm3284_vm2, %v9716_v11 }
 0x63c   : > { %5916 = vmatpush.bf16.msra.mxu1 %v8344_v31 }
 0x640   : > { %5917 = vmatpush.bf16.msra.mxu1 %v8336_v34 }
 0x644   : > { %5918 = vmatpush.bf16.msra.mxu1 %v8328_v37 }
 0x648   : > { %5919 = vmatpush.bf16.msra.mxu1 %v8320_v42 }
 0x64a   : > { %8278 = vmatmul.msk.bf16.vlgmr.msrb.gmra.mxu1 %vm3284_vm2, %v9716_v11  ;;  %8311 = vmatmul.msk.bf16.vlgmr.msra.gmra.mxu2 %vm3284_vm2, %v9716_v11 }
 0x64b   : > { %8312 = vmatmul.msk.bf16.vlgmr.msra.gmra.mxu3 %vm3284_vm2, %v9716_v11 }
 0x657   : > { %v4753_v43 = vpop.f32.mrf.mxu1 }
 0x658   : > { %v4984_v44 = vpop.f32.mrf.mxu0 }
 0x65a   : > { %8346 = vmatmul.msk.bf16.vlgmr.msra.gmra.mxu1 %vm3284_vm2, %v9716_v11 }
 0x65d   : > { %v4766_v45 = vpop.f32.mrf.mxu2 }
 0x65e   : > { %v4770_v46 = vpack.c.bf16 %v4766_v45, %v4753_v43  ;;  %v4830_v47 = vpop.f32.mrf.mxu3 }
 0x65f   : > { %v4755_v48 = vpop.f32.mrf.mxu1 }
 0x660   : > { %4771 = vst [vmem:[#allocation5] sm:$0xff] %v4770_v46  ;;  %v4986_v49 = vpop.f32.mrf.mxu0 }
 0x665   : > { %v4768_v50 = vpop.f32.mrf.mxu2 }
 0x666   : > { %v4832_v51 = vpop.f32.mrf.mxu3 }
 0x667   : > { %v4843_v52 = vpop.f32.mrf.mxu1 }
 0x668   : > { %v4847_v53 = vpack.c.bf16 %v4843_v52, %v4830_v47  ;;  %v5138_v54 = vpop.f32.mrf.mxu0 }
 0x66a   : > { %4848 = vst [vmem:[#allocation5 + $0x8] sm:$0xff] %v4847_v53 }
 0x66d   : > { %v4907_v55 = vpop.f32.mrf.mxu2 }
 0x66e   : > { %v4920_v56 = vpop.f32.mrf.mxu3 }
 0x66f   : > { %v4924_v57 = vpack.c.bf16 %v4920_v56, %v4907_v55  ;;  %v4845_v58 = vpop.f32.mrf.mxu1 }
 0x670   : > { %v5140_v59 = vpop.f32.mrf.mxu0 }
 0x671   : > { %4925 = vst [vmem:[#allocation5 + $0x10] sm:$0xff] %v4924_v57 }
 0x675   : > { %v4909_v60 = vpop.f32.mrf.mxu2 }
 0x676   : > { %v4922_v11 = vpop.f32.mrf.mxu3 }
 0x677   : > { %v4997_v61 = vpop.f32.mrf.mxu1 }
 0x678   : > { %v5001_v62 = vpack.c.bf16 %v4997_v61, %v4984_v44  ;;  %v5292_v63 = vpop.f32.mrf.mxu0 }
 0x67a   : > { %5002 = vst [vmem:[#allocation5 + $0x18] sm:$0xff] %v5001_v62 }
 0x67d   : > { %v5061_v0 = vpop.f32.mrf.mxu2 }
 0x67e   : > { %v5074_v1 = vpop.f32.mrf.mxu3 }
 0x67f   : > { %v5078_v39 = vpack.c.bf16 %v5074_v1, %v5061_v0  ;;  %v4999_v2 = vpop.f32.mrf.mxu1 }
 0x680   : > { %v5294_v40 = vpop.f32.mrf.mxu0 }
 0x681   : > { %5079 = vst [vmem:[#allocation5 + $0x20] sm:$0xff] %v5078_v39 }
 0x685   : > { %v5063_v3 = vpop.f32.mrf.mxu2 }
 0x686   : > { %v5076_v4 = vpop.f32.mrf.mxu3 }
 0x687   : > { %v5151_v5 = vpop.f32.mrf.mxu1 }
 0x688   : > { %v5155_v6 = vpack.c.bf16 %v5151_v5, %v5138_v54  ;;  %v5446_v7 = vpop.f32.mrf.mxu0 }
 0x68a   : > { %5156 = vst [vmem:[#allocation5 + $0x28] sm:$0xff] %v5155_v6 }
 0x68d   : > { %v5215_v8 = vpop.f32.mrf.mxu2 }
 0x68e   : > { %v5228_v9 = vpop.f32.mrf.mxu3 }
 0x68f   : > { %v5232_v10 = vpack.c.bf16 %v5228_v9, %v5215_v8  ;;  %v5153_v12 = vpop.f32.mrf.mxu1 }
 0x690   : > { %v5448_v13 = vpop.f32.mrf.mxu0 }
 0x691   : > { %5233 = vst [vmem:[#allocation5 + $0x30] sm:$0xff] %v5232_v10 }
 0x695   : > { %v5217_v14 = vpop.f32.mrf.mxu2 }
 0x696   : > { %v5230_v15 = vpop.f32.mrf.mxu3 }
 0x697   : > { %v5305_v16 = vpop.f32.mrf.mxu1 }
 0x698   : > { %v5309_v17 = vpack.c.bf16 %v5305_v16, %v5292_v63  ;;  %v5600_v18 = vpop.f32.mrf.mxu0 }
 0x69a   : > { %5310 = vst [vmem:[#allocation5 + $0x38] sm:$0xff] %v5309_v17 }
 0x69d   : > { %v5369_v19 = vpop.f32.mrf.mxu2 }
 0x69e   : > { %v5382_v20 = vpop.f32.mrf.mxu3 }
 0x69f   : > { %v5386_v21 = vpack.c.bf16 %v5382_v20, %v5369_v19  ;;  %v5307_v22 = vpop.f32.mrf.mxu1  ;;  %v8373_v19 = vld [vmem:[#allocation5 + $0x30] sm:$0xf]  ;;  %v8908_v20 = vld [vmem:[#allocation5 + $0x34] sm:$0xf] }
 0x6a0   : > { %v5602_v23 = vpop.f32.mrf.mxu0 }
 0x6a1   : > { %5387 = vst [vmem:[#allocation5 + $0x40] sm:$0xff] %v5386_v21  ;;  %v8909_v17 = vld [vmem:[#allocation5 + $0x34] sm:$0xf0]  ;;  %v8907_v23 = vld [vmem:[#allocation5 + $0x24] sm:$0xf0] }
 0x6a2   : > { %v8374_v21 = vor.u32 %v8909_v17, %v8373_v19 }
 0x6a5   : > { %v5371_v24 = vpop.f32.mrf.mxu2 }
 0x6a6   : > { %v5384_v25 = vpop.f32.mrf.mxu3  ;;  %v8367_v24 = vld [vmem:[#allocation5 + $0x28] sm:$0xf0] }
 0x6a7   : > { %v5459_v26 = vpop.f32.mrf.mxu1  ;;  %v8365_v25 = vld [vmem:[#allocation5 + $0x20] sm:$0xf] }
 0x6a8   : > { %v5463_v27 = vpack.c.bf16 %v5459_v26, %v5446_v7  ;;  %v5754_v28 = vpop.f32.mrf.mxu0  ;;  %v8381_v13 = vld [vmem:[#allocation5 + $0x40] sm:$0xf]  ;;  %v8910_v14 = vld [vmem:[#allocation5 + $0x44] sm:$0xf] }
 0x6a9   : > { %v8906_v26 = vld [vmem:[#allocation5 + $0x24] sm:$0xf] }
 0x6aa   : > { %5464 = vst [vmem:[#allocation5 + $0x48] sm:$0xff] %v5463_v27  ;;  %v8366_v27 = vor.u32 %v8907_v23, %v8365_v25 }
 0x6ad   : > { %v5523_v29 = vpop.f32.mrf.mxu2 }
 0x6ae   : > { %v5536_v30 = vpop.f32.mrf.mxu3 }
 0x6af   : > { %v5540_v31 = vpack.c.bf16 %v5536_v30, %v5523_v29  ;;  %v5461_v32 = vpop.f32.mrf.mxu1  ;;  %v8905_v29 = vld [vmem:[#allocation5 + $0x14] sm:$0xf0]  ;;  %v8359_v30 = vld [vmem:[#allocation5 + $0x18] sm:$0xf0] }
 0x6b0   : > { %v5756_v33 = vpop.f32.mrf.mxu0  ;;  %v8904_v32 = vld [vmem:[#allocation5 + $0x14] sm:$0xf] }
 0x6b1   : > { %5541 = vst [vmem:[#allocation5 + $0x50] sm:$0xff] %v5540_v31  ;;  %v8911_v10 = vld [vmem:[#allocation5 + $0x44] sm:$0xf0]  ;;  %v8383_v12 = vld [vmem:[#allocation5 + $0x48] sm:$0xf0] }
 0x6b2   : > { %v8382_v15 = vor.u32 %v8911_v10, %v8381_v13  ;;  %v8386_v16 = vor.u32 %v8910_v14, %v8383_v12  ;;  %v8357_v31 = vld [vmem:[#allocation5 + $0x10] sm:$0xf] }
 0x6b3   : > { %v8358_v33 = vor.u32 %v8905_v29, %v8357_v31 }
 0x6b5   : > { %v5525_v34 = vpop.f32.mrf.mxu2 }
 0x6b6   : > { %v5538_v35 = vpop.f32.mrf.mxu3  ;;  %v8362_v34 = vor.u32 %v8904_v32, %v8359_v30 }
 0x6b7   : > { %v5613_v36 = vpop.f32.mrf.mxu1  ;;  %v8903_v35 = vld [vmem:[#allocation5 + $0x4] sm:$0xf0] }
 0x6b8   : > { %v5617_v37 = vpack.c.bf16 %v5613_v36, %v5600_v18  ;;  %v5908_v38 = vpop.f32.mrf.mxu0  ;;  %v8389_v6 = vld [vmem:[#allocation5 + $0x50] sm:$0xf]  ;;  %v8912_v7 = vld [vmem:[#allocation5 + $0x54] sm:$0xf]  ;;  %v8375_v18 = vld [vmem:[#allocation5 + $0x38] sm:$0xf0] }
 0x6b9   : > { %v8378_v22 = vor.u32 %v8908_v20, %v8375_v18  ;;  %v8351_v36 = vld [vmem:[#allocation5 + $0x8] sm:$0xf0] }
 0x6ba   : > { %5618 = vst [vmem:[#allocation5 + $0x58] sm:$0xff] %v5617_v37  ;;  %v8349_v37 = vld [vmem:[#allocation5] sm:$0xf] }
 0x6bd   : > { %v5677_v41 = vpop.f32.mrf.mxu2 }
 0x6be   : > { %v5690_v42 = vpop.f32.mrf.mxu3 }
 0x6bf   : > { %v5694_v43 = vpack.c.bf16 %v5690_v42, %v5677_v41  ;;  %v5615_v44 = vpop.f32.mrf.mxu1  ;;  %v8350_v41 = vor.u32 %v8903_v35, %v8349_v37 }
 0x6c0   : > { %v5910_v45 = vpop.f32.mrf.mxu0  ;;  %v5948_v44 = vpop.permute.xlu0 %5947 }
 0x6c1   : > { %5695 = vst [vmem:[#allocation5 + $0x60] sm:$0xff] %v5694_v43  ;;  %v8913_v4 = vld [vmem:[#allocation5 + $0x54] sm:$0xf0]  ;;  %v8391_v5 = vld [vmem:[#allocation5 + $0x58] sm:$0xf0] }
 0x6c2   : > { %v8390_v8 = vor.u32 %v8913_v4, %v8389_v6  ;;  %v8394_v9 = vor.u32 %v8912_v7, %v8391_v5  ;;  %v5927_v43 = vld [vmem:[%s9807_s14] sm:$0x3] }
 0x6c5   : > { %v5679_v46 = vpop.f32.mrf.mxu2 }
 0x6c6   : > { %v5692_v47 = vpop.f32.mrf.mxu3 }
 0x6c7   : > { %v5767_v48 = vpop.f32.mrf.mxu1 }
 0x6c8   : > { %v5771_v49 = vpack.c.bf16 %v5767_v48, %v5754_v28  ;;  %v8397_v39 = vld [vmem:[#allocation5 + $0x60] sm:$0xf]  ;;  %v8914_v2 = vld [vmem:[#allocation5 + $0x64] sm:$0xf]  ;;  %v8370_v28 = vor.u32 %v8906_v26, %v8367_v24 }
 0x6ca   : > { %5772 = vst [vmem:[#allocation5 + $0x68] sm:$0xff] %v5771_v49 }
 0x6cd   : > { %v5831_v50 = vpop.f32.mrf.mxu2 }
 0x6ce   : > { %v5844_v51 = vpop.f32.mrf.mxu3 }
 0x6cf   : > { %v5848_v52 = vpack.c.bf16 %v5844_v51, %v5831_v50  ;;  %v5769_v53 = vpop.f32.mrf.mxu1 }
 0x6d1   : > { %5849 = vst [vmem:[#allocation5 + $0x70] sm:$0xff] %v5848_v52  ;;  %v8915_v0 = vld [vmem:[#allocation5 + $0x64] sm:$0xf0]  ;;  %v8399_v1 = vld [vmem:[#allocation5 + $0x68] sm:$0xf0] }
 0x6d2   : > { %v8398_v40 = vor.u32 %v8915_v0, %v8397_v39  ;;  %v8402_v3 = vor.u32 %v8914_v2, %v8399_v1 }
 0x6d5   : > { %v5833_v54 = vpop.f32.mrf.mxu2 }
 0x6d6   : > { %v5846_v55 = vpop.f32.mrf.mxu3 }
 0x6d7   : > { %v5921_v56 = vpop.f32.mrf.mxu1 }
 0x6d8   : > { %v5925_v57 = vpack.c.bf16 %v5921_v56, %v5908_v38  ;;  %v8405_v59 = vld [vmem:[#allocation5 + $0x70] sm:$0xf]  ;;  %v8916_v11 = vld [vmem:[#allocation5 + $0x74] sm:$0xf]  ;;  %v8902_v38 = vld [vmem:[#allocation5 + $0x4] sm:$0xf] }
 0x6d9   : > { %v8354_v42 = vor.u32 %v8902_v38, %v8351_v36 }
 0x6da   : > { %5926 = vst [vmem:[#allocation5 + $0x78] sm:$0xff] %v5925_v57 }
 0x6df   : > { %v5923_v58 = vpop.f32.mrf.mxu1 }
 0x6e1   : > { %v8917_v60 = vld [vmem:[#allocation5 + $0x74] sm:$0xf0]  ;;  %v8407_v61 = vld [vmem:[#allocation5 + $0x78] sm:$0xf0] }
 0x6e2   : > { %v8406_v62 = vor.u32 %v8917_v60, %v8405_v59  ;;  %v8410_v63 = vor.u32 %v8916_v11, %v8407_v61 }
 0x6e4   : > { %6030 = vmatpush.bf16.msrb.mxu2 %v8406_v62  ;;  %6043 = vmatpush.bf16.msrb.mxu3 %v8410_v63 }
 0x6e8   : > { %6031 = vmatpush.bf16.msrb.mxu2 %v8398_v40  ;;  %6044 = vmatpush.bf16.msrb.mxu3 %v8402_v3 }
 0x6ec   : > { %6032 = vmatpush.bf16.msrb.mxu2 %v8390_v8  ;;  %6045 = vmatpush.bf16.msrb.mxu3 %v8394_v9 }
 0x6f0   : > { %6033 = vmatpush.bf16.msrb.mxu2 %v8382_v15  ;;  %6046 = vmatpush.bf16.msrb.mxu3 %v8386_v16 }
 0x6f4   : > { %6034 = vmatpush.bf16.msrb.mxu2 %v8374_v21  ;;  %6047 = vmatpush.bf16.msrb.mxu3 %v8378_v22 }
 0x6f8   : > { %6035 = vmatpush.bf16.msrb.mxu2 %v8366_v27  ;;  %6048 = vmatpush.bf16.msrb.mxu3 %v8370_v28 }
 0x6fc   : > { %6036 = vmatpush.bf16.msrb.mxu2 %v8358_v33  ;;  %6049 = vmatpush.bf16.msrb.mxu3 %v8362_v34 }
 0x700   : > { %6037 = vmatpush.bf16.msrb.mxu2 %v8350_v41  ;;  %6050 = vmatpush.bf16.msrb.mxu3 %v8354_v42 }
 0x703   : > { %6038 = vmatmul.bf16.vlgmr.msrb.gmra.mxu2 %v5927_v43  ;;  %6051 = vmatmul.bf16.vlgmr.msrb.gmra.mxu3 %v5927_v43 }
 0x786   : > { %v6039_v45 = vpop.f32.mrf.mxu2  ;;  %v6052_v46 = vpop.f32.mrf.mxu3 }
 0x787   : > { %v6040_v47 = vadd.f32 %v6039_v45, %v5948_v44  ;;  %v6053_v48 = vadd.f32 %v6052_v46, %v5948_v44 }
 0x789   : > { %v6056_v49 = vsub.f32 0.0, %v6040_v47  ;;  %v6057_v50 = vsub.f32 0.0, %v6053_v48 }
 0x78b   : > { %v6058_v51 = vmul.f32 1.442695, %v6056_v49  ;;  %v6060_v52 = vmul.f32 1.442695, %v6057_v50 }
 0x78d   : > { %9017 = vpow2.f32 %v6058_v51 }
 0x78e   : > { %9019 = vpow2.f32 %v6060_v52  ;;  %v6054_v53 = vpop.f32.mrf.mxu3  ;;  %v6041_v54 = vpop.f32.mrf.mxu2 }
 0x793   : > { %v9018_v55 = vpop.eup %9017 }
 0x794   : > { %v9020_v56 = vpop.eup %9019  ;;  %v6062_v57 = vadd.f32 1.0, %v9018_v55 }
 0x795   : > { %v6063_v58 = vadd.f32 1.0, %v9020_v56 }
 0x796   : > { %9021 = vrcp.f32 %v6062_v57  ;;  %vm6069_vm7 = vweird.f32 %v6062_v57  ;;  %v6075_v3 = vand.u32 2147483648, %v6062_v57  ;;  %v6073_v4 = vand.u32 2147483647, %v6062_v57 }
 0x797   : > { %9023 = vrcp.f32 %v6063_v58  ;;  %v6090_v1 = vand.u32 2147483648, %v6063_v58  ;;  %v6088_v2 = vand.u32 2147483647, %v6063_v58  ;;  %vm6084_vm9 = vweird.f32 %v6063_v58 }
 0x798   : > { %v6076_v9 = vor.u32 1.1754944e-38, %v6075_v3  ;;  %vm6074_vm12 = vcmp.eq.f32.partialorder %v6073_v4, 8.507059e+37 }
 0x799   : > { %v6091_v6 = vor.u32 1.1754944e-38, %v6090_v1  ;;  %vm6089_vm11 = vcmp.eq.f32.partialorder %v6088_v2, 8.507059e+37 }
 0x79c   : > { %v9022_v59 = vpop.eup %9021 }
 0x79d   : > { %v9024_v60 = vpop.eup %9023  ;;  %v6065_v11 = vmul.f32 %v9022_v59, %v6062_v57  ;;  %vm6070_vm5 = vweird.f32 %v9022_v59 }
 0x79e   : > { %v6080_v61 = vmul.f32 %v9024_v60, %v6063_v58  ;;  %vm6085_vm6 = vweird.f32 %v9024_v60  ;;  %vm6071_vm8 = vmor %vm6069_vm7, %vm6070_vm5 }
 0x79f   : > { %v6066_v62 = vsub.f32 1.0, %v6065_v11  ;;  %vm6086_vm10 = vmor %vm6084_vm9, %vm6085_vm6 }
 0x7a0   : > { %v6081_v63 = vsub.f32 1.0, %v6080_v61 }
 0x7a1   : > { %v6067_v0 = vmul.f32 %v9022_v59, %v6066_v62 }
 0x7a2   : > { %v6082_v39 = vmul.f32 %v9024_v60, %v6081_v63 }
 0x7a3   : > { %v6068_v40 = vadd.f32 %v9022_v59, %v6067_v0 }
 0x7a4   : > { %v6083_v5 = vadd.f32 %v9024_v60, %v6082_v39 }
 0x7a5   : > { %v6072_v7 = vsel %vm6071_vm8, %v9022_v59, %v6068_v40 }
 0x7a6   : > { %v6087_v8 = vsel %vm6086_vm10, %v9024_v60, %v6083_v5  ;;  %v6077_v13 = vsel %vm6074_vm12, %v6076_v9, %v6072_v7 }
 0x7a7   : > { %v6092_v10 = vsel %vm6089_vm11, %v6091_v6, %v6087_v8 }
 0x7a8   : > { %v6096_v12 = vrot.slane %v6092_v10, 4 }
 0x7aa   : > { %v6097_v14 = vsel %vm1028_vm0, %v6077_v13, %v6096_v12 }
 0x7ab   : > { %6099 = vst [vmem:[%s700_s5] sm:$0xff] %v6097_v14 }
 0x7ac PF: > { %s33_s24 = sadd.s32 1, %s9291_s24  }
 0x7ad   : > { %p30_p7 = scmp.ge.s32.totalorder %s33_s24, 4  }
 0x7af   :  { %32 = sbr.rel (!%p30_p7) target bundleno = 12 (0xc), region = 222 }
 0x7b4   :  { %6137 = vsyncpa [#allocation7], 1 }
 0x7b5   :  { %6139 = vsyncpa [#allocation7 + $0x1], 1 }
 0x7b6   :  { %6140 = vsyncpa [#allocation9], 1 }
 0x7b7   :  { %6141 = vsyncpa [#allocation12], 1 }
 0x7b8   :  { %6142 = vsyncpa [#allocation15], 1 }
 0x7b9   :  { %6143 = vsyncpa [#allocation18], 1 }

</bundles_post_ra>
